<compile_context>
chip_gen: v6e
topology: v6e:2x2x1
jax: 0.10.0
libtpu: 0.0.40
codegen_flags: <defaults>
</compile_context>

<pallas_src>
import jax
import jax.numpy as jnp
from jax.experimental import pallas as pl
from jax.experimental.pallas import tpu as pltpu

NUM_CELLS = 2                                  # faithful maximum (see note above)
PAD = 2                                        # max padding over the 4 ops
NEG = float(jnp.finfo(jnp.float32).min)        # stands in for MaxPool2d's -inf pad
LANES = 128                                    # vreg lane width
NBS_MAX = 8                                    # lane groups per grid step


def _cdiv(a, b):
    return -(-a // b)


@jax.jit
def darts_forward(x_nchw, arch_w, c3w, c3b, c5w, c5b):
    N, C, H, W = x_nchw.shape
    assert C == 1, "OPS use Conv2d(1, 1, ...) -> single channel"
    x = x_nchw[:, 0, :, :]                     # (N, H, W)

    SW = W + 2 * PAD                           # per-image lane slot
    HP = H + 2 * PAD                           # padded slab height
    lanes = _cdiv(SW, LANES) * LANES           # slab lane width (multiple of 128)
    NB = lanes // SW                           # images packed per lane group
    G = _cdiv(N, NB)                           # lane groups in the batch
    # >=2 grid steps when possible (v7x has 2 TensorCores), else amortize steps.
    NBS = min(NBS_MAX, _cdiv(G, 2)) if G >= 2 else 1
    grid_n = _cdiv(G, NBS)
    G_pad = grid_n * NBS                       # all blocks full (no ragged block)
    N_pad = G_pad * NB

    # ---- wrapper-side packing: zero-padded, lane-dense slabs (wide DMAs) ----
    xp = jnp.pad(x, ((0, N_pad - N), (0, 0), (0, 0)))
    xp = xp.reshape(G_pad, NB, H, W)
    xp = jnp.pad(xp, ((0, 0), (0, 0), (PAD, PAD), (PAD, PAD)))      # (G,NB,HP,SW)
    xp = xp.transpose(0, 2, 1, 3).reshape(G_pad, HP, NB * SW)
    xp = jnp.pad(xp, ((0, 0), (0, 0), (0, lanes - NB * SW)))        # (G,HP,lanes)

    def kernel(x_ref, aw_ref, c3w_ref, c3b_ref, c5w_ref, c5b_ref, out_ref,
               slab_ref):
        # ---- interior masks, generated in-kernel (no VMEM mask input) -------
        def lane_mask(rows):
            li = jax.lax.broadcasted_iota(jnp.int32, (rows, lanes), 1)
            m = None
            for i in range(NB):
                lo = PAD + i * SW
                hit = (li >= lo) & (li < lo + W)
                m = hit if m is None else (m | hit)
            return m
        lane_ok_hp = lane_mask(HP)                       # (HP, lanes)
        lane_ok_h = lane_mask(H)                         # (H, lanes)
        ri = jax.lax.broadcasted_iota(jnp.int32, (HP, lanes), 0)
        full_mask = lane_ok_hp & (ri >= PAD) & (ri < PAD + H)

        # ---- hoisted scalar math: combined 5x5 conv weights / bias per cell --
        def _w(c, di, dj):
            w = aw_ref[c, 1] * c5w_ref[di, dj]
            if 1 <= di <= 3 and 1 <= dj <= 3:
                w = w + aw_ref[c, 0] * c3w_ref[di - 1, dj - 1]
            return w
        cw = [[[_w(c, di, dj) for dj in range(5)] for di in range(5)]
              for c in range(NUM_CELLS)]
        cb = [aw_ref[c, 0] * c3b_ref[0] + aw_ref[c, 1] * c5b_ref[0]
              for c in range(NUM_CELLS)]
        ap = [(aw_ref[c, 2], aw_ref[c, 3]) for c in range(NUM_CELLS)]

        # State hand-off slab: zeroed once per grid step; only interior rows
        # are rewritten per cell (border rows stay zero).
        slab_ref[...] = jnp.zeros((HP, lanes), jnp.float32)

        def cell(zs, c):
            # NEG-padded pool slab from the zero-padded conv slab: one select.
            ns = jnp.where(full_mask, zs, NEG)
            # Hoisted lane shifts: rolled[dj][r, l] == slab[r, l + dj - PAD]
            # (wrap-around only lands in pad/dead lanes, never read for outputs)
            rz = [zs if dj == PAD
                  else pltpu.roll(zs, shift=(PAD - dj) % lanes, axis=1)
                  for dj in range(5)]
            rn = [ns if dj == PAD
                  else pltpu.roll(ns, shift=(PAD - dj) % lanes, axis=1)
                  for dj in range(5)]
            # Combined conv (a0*conv3 + a1*conv5 folded into one 5x5): 25 taps.
            acc = None
            for di in range(5):
                for dj in range(5):
                    tap = cw[c][di][dj] * rz[dj][di:di + H, :]
                    acc = tap if acc is None else acc + tap
            acc = acc + cb[c]
            # pool3 from 9 taps; pool5 computed incrementally (16-tap ring).
            p3 = None
            for di in range(1, 4):
                for dj in range(1, 4):
                    v = rn[dj][di:di + H, :]
                    p3 = v if p3 is None else jnp.maximum(p3, v)
            ring = None
            for di in range(5):
                for dj in range(5):
                    if 1 <= di <= 3 and 1 <= dj <= 3:
                        continue
                    v = rn[dj][di:di + H, :]
                    ring = v if ring is None else jnp.maximum(ring, v)
            p5 = jnp.maximum(p3, ring)
            return acc + ap[c][0] * p3 + ap[c][1] * p5

        for g in range(NBS):                  # banding: one lane group at a time
            zs = x_ref[g]                     # (HP, lanes) zero-padded slab
            states = [zs[PAD:PAD + H, :]]
            for c in range(NUM_CELLS):
                if c > 0:
                    # Refresh interior rows only; gap/dead lanes -> 0 via a
                    # select (never arithmetic masking: gap lanes may be inf).
                    slab_ref[PAD:PAD + H, :] = jnp.where(lane_ok_h,
                                                         states[-1], 0.0)
                    zs = slab_ref[...]
                states.append(cell(zs, c))
            # DARTSNetwork.forward: sum(states[-2:])
            res = states[-2] + states[-1]
            # Lane-dense wide store; gap/dead lanes zeroed (stripped in wrapper).
            out_ref[g] = jnp.where(lane_ok_h, res, 0.0)

    out_packed = pl.pallas_call(
        kernel,
        out_shape=jax.ShapeDtypeStruct((G_pad, H, lanes), jnp.float32),
        grid=(grid_n,),
        in_specs=[
            pl.BlockSpec((NBS, HP, lanes), lambda b: (b, 0, 0)),       # packed x
            pl.BlockSpec((NUM_CELLS, 4), lambda b: (0, 0),
                         memory_space=pltpu.MemorySpace.SMEM),         # arch w
            pl.BlockSpec((3, 3), lambda b: (0, 0),
                         memory_space=pltpu.MemorySpace.SMEM),         # conv3 w
            pl.BlockSpec((1,), lambda b: (0,),
                         memory_space=pltpu.MemorySpace.SMEM),         # conv3 b
            pl.BlockSpec((5, 5), lambda b: (0, 0),
                         memory_space=pltpu.MemorySpace.SMEM),         # conv5 w
            pl.BlockSpec((1,), lambda b: (0,),
                         memory_space=pltpu.MemorySpace.SMEM),         # conv5 b
        ],
        out_specs=pl.BlockSpec((NBS, H, lanes), lambda b: (b, 0, 0)),
        scratch_shapes=[pltpu.VMEM((HP, lanes), jnp.float32)],         # hand-off
        compiler_params=pltpu.CompilerParams(
            dimension_semantics=("parallel",)),
    )(xp, arch_w, c3w, c3b, c5w, c5b)

    # ---- wrapper-side unpack: strip gap/pad/dead lanes and padded images ----
    o = out_packed[:, :, :NB * SW].reshape(G_pad, H, NB, SW)[:, :, :, PAD:PAD + W]
    o = o.transpose(0, 2, 1, 3).reshape(N_pad, H, W)[:N]
    return o[:, None, :, :]                    # back to NCHW


def _ref_forward(x, arch_w, c3w, c3b, c5w, c5b):
    """Pure-JAX (XLA) reference of the same semantics, for validation."""
    def conv(xx, w, b, pad):
        out = jax.lax.conv_general_dilated(
            xx, w.reshape(1, 1, *w.shape), (1, 1),
            [(pad, pad), (pad, pad)],
            dimension_numbers=('NCHW', 'OIHW', 'NCHW'))
        return out + b.reshape(1, 1, 1, 1)

    def pool(xx, k, pad):
        return jax.lax.reduce_window(
            xx, -jnp.inf, jax.lax.max, (1, 1, k, k), (1, 1, 1, 1),
            [(0, 0), (0, 0), (pad, pad), (pad, pad)])

    states = [x]
    for c in range(NUM_CELLS):
        cur = states[-1]
        states.append(arch_w[c, 0] * conv(cur, c3w, c3b, 1)
                      + arch_w[c, 1] * conv(cur, c5w, c5b, 2)
                      + arch_w[c, 2] * pool(cur, 3, 1)
                      + arch_w[c, 3] * pool(cur, 5, 2))
    return states[-2] + states[-1]


if __name__ == "__main__":
    key = jax.random.PRNGKey(0)
    kx, k1, k2, k3, k4, k5 = jax.random.split(key, 6)

    N, C, H, W = 2, 1, 16, 16
    x = jax.random.normal(kx, (N, C, H, W), jnp.float32)

    # Conv parameters (shared across cells, mirroring the module-level OPS dict)
    c3w = jax.random.normal(k1, (3, 3), jnp.float32) * (1.0 / 3.0)
    c3b = jax.random.normal(k2, (1,), jnp.float32) * 0.1
    c5w = jax.random.normal(k3, (5, 5), jnp.float32) * (1.0 / 5.0)
    c5b = jax.random.normal(k4, (1,), jnp.float32) * 0.1
    # Per-cell architecture weights (torch.randn(4) per cell)
    arch_w = jax.random.normal(k5, (NUM_CELLS, 4), jnp.float32)

    out = darts_forward(x, arch_w, c3w, c3b, c5w, c5b)
    out = jax.block_until_ready(out)

    ref = _ref_forward(x, arch_w, c3w, c3b, c5w, c5b)
    assert out.shape == (N, C, H, W)
    max_err = float(jnp.max(jnp.abs(out - ref)))
    assert jnp.allclose(out, ref, atol=1e-3, rtol=1e-3), f"max_err={max_err}"

    print("KERNEL_OK")
</pallas_src>

<mosaic_0001>
module attributes {stable_mosaic.version = 11 : i64} {
  func.func @kernel(%arg0: i32, %arg1: memref<1x20x128xf32, #tpu.memory_space<vmem>>, %arg2: memref<2x4xf32, #tpu.memory_space<smem>>, %arg3: memref<3x3xf32, #tpu.memory_space<smem>>, %arg4: memref<1xf32, #tpu.memory_space<smem>>, %arg5: memref<5x5xf32, #tpu.memory_space<smem>>, %arg6: memref<1xf32, #tpu.memory_space<smem>>, %arg7: memref<1x16x128xf32, #tpu.memory_space<vmem>>, %arg8: memref<20x128xf32, #tpu.memory_space<vmem>>) attributes {dimension_semantics = [#tpu.dimension_semantics<parallel>], iteration_bounds = array<i64: 1>, scalar_prefetch = 0 : i64, scratch_operands = 1 : i64, tpu.core_type = #tpu.core_type<tc>, window_params = [{transform_indices = @transform_0, window_bounds = array<i64: 1, 20, 128>}, {transform_indices = @transform_1, window_bounds = array<i64: 2, 4>}, {transform_indices = @transform_2, window_bounds = array<i64: 3, 3>}, {transform_indices = @transform_3, window_bounds = array<i64: 1>}, {transform_indices = @transform_4, window_bounds = array<i64: 5, 5>}, {transform_indices = @transform_5, window_bounds = array<i64: 1>}, {transform_indices = @transform_6, window_bounds = array<i64: 1, 16, 128>}]} {
    %0 = tpu.iota {dimensions = array<i32: 1>} : vector<20x128xi32>
    %c2_i32 = arith.constant 2 : i32
    %1 = vector.broadcast %c2_i32 : i32 to vector<20x128xi32>
    %2 = arith.cmpi sge, %0, %1 : vector<20x128xi32>
    %c18_i32 = arith.constant 18 : i32
    %3 = vector.broadcast %c18_i32 : i32 to vector<20x128xi32>
    %4 = arith.cmpi slt, %0, %3 : vector<20x128xi32>
    %5 = arith.andi %2, %4 : vector<20x128xi1>
    %c22_i32 = arith.constant 22 : i32
    %6 = vector.broadcast %c22_i32 : i32 to vector<20x128xi32>
    %7 = arith.cmpi sge, %0, %6 : vector<20x128xi32>
    %c38_i32 = arith.constant 38 : i32
    %8 = vector.broadcast %c38_i32 : i32 to vector<20x128xi32>
    %9 = arith.cmpi slt, %0, %8 : vector<20x128xi32>
    %10 = arith.andi %7, %9 : vector<20x128xi1>
    %11 = arith.ori %5, %10 : vector<20x128xi1>
    %c42_i32 = arith.constant 42 : i32
    %12 = vector.broadcast %c42_i32 : i32 to vector<20x128xi32>
    %13 = arith.cmpi sge, %0, %12 : vector<20x128xi32>
    %c58_i32 = arith.constant 58 : i32
    %14 = vector.broadcast %c58_i32 : i32 to vector<20x128xi32>
    %15 = arith.cmpi slt, %0, %14 : vector<20x128xi32>
    %16 = arith.andi %13, %15 : vector<20x128xi1>
    %17 = arith.ori %11, %16 : vector<20x128xi1>
    %c62_i32 = arith.constant 62 : i32
    %18 = vector.broadcast %c62_i32 : i32 to vector<20x128xi32>
    %19 = arith.cmpi sge, %0, %18 : vector<20x128xi32>
    %c78_i32 = arith.constant 78 : i32
    %20 = vector.broadcast %c78_i32 : i32 to vector<20x128xi32>
    %21 = arith.cmpi slt, %0, %20 : vector<20x128xi32>
    %22 = arith.andi %19, %21 : vector<20x128xi1>
    %23 = arith.ori %17, %22 : vector<20x128xi1>
    %c82_i32 = arith.constant 82 : i32
    %24 = vector.broadcast %c82_i32 : i32 to vector<20x128xi32>
    %25 = arith.cmpi sge, %0, %24 : vector<20x128xi32>
    %c98_i32 = arith.constant 98 : i32
    %26 = vector.broadcast %c98_i32 : i32 to vector<20x128xi32>
    %27 = arith.cmpi slt, %0, %26 : vector<20x128xi32>
    %28 = arith.andi %25, %27 : vector<20x128xi1>
    %29 = arith.ori %23, %28 : vector<20x128xi1>
    %c102_i32 = arith.constant 102 : i32
    %30 = vector.broadcast %c102_i32 : i32 to vector<20x128xi32>
    %31 = arith.cmpi sge, %0, %30 : vector<20x128xi32>
    %c118_i32 = arith.constant 118 : i32
    %32 = vector.broadcast %c118_i32 : i32 to vector<20x128xi32>
    %33 = arith.cmpi slt, %0, %32 : vector<20x128xi32>
    %34 = arith.andi %31, %33 : vector<20x128xi1>
    %35 = arith.ori %29, %34 : vector<20x128xi1>
    %36 = tpu.iota {dimensions = array<i32: 1>} : vector<16x128xi32>
    %c2_i32_0 = arith.constant 2 : i32
    %37 = vector.broadcast %c2_i32_0 : i32 to vector<16x128xi32>
    %38 = arith.cmpi sge, %36, %37 : vector<16x128xi32>
    %c18_i32_1 = arith.constant 18 : i32
    %39 = vector.broadcast %c18_i32_1 : i32 to vector<16x128xi32>
    %40 = arith.cmpi slt, %36, %39 : vector<16x128xi32>
    %41 = arith.andi %38, %40 : vector<16x128xi1>
    %c22_i32_2 = arith.constant 22 : i32
    %42 = vector.broadcast %c22_i32_2 : i32 to vector<16x128xi32>
    %43 = arith.cmpi sge, %36, %42 : vector<16x128xi32>
    %c38_i32_3 = arith.constant 38 : i32
    %44 = vector.broadcast %c38_i32_3 : i32 to vector<16x128xi32>
    %45 = arith.cmpi slt, %36, %44 : vector<16x128xi32>
    %46 = arith.andi %43, %45 : vector<16x128xi1>
    %47 = arith.ori %41, %46 : vector<16x128xi1>
    %c42_i32_4 = arith.constant 42 : i32
    %48 = vector.broadcast %c42_i32_4 : i32 to vector<16x128xi32>
    %49 = arith.cmpi sge, %36, %48 : vector<16x128xi32>
    %c58_i32_5 = arith.constant 58 : i32
    %50 = vector.broadcast %c58_i32_5 : i32 to vector<16x128xi32>
    %51 = arith.cmpi slt, %36, %50 : vector<16x128xi32>
    %52 = arith.andi %49, %51 : vector<16x128xi1>
    %53 = arith.ori %47, %52 : vector<16x128xi1>
    %c62_i32_6 = arith.constant 62 : i32
    %54 = vector.broadcast %c62_i32_6 : i32 to vector<16x128xi32>
    %55 = arith.cmpi sge, %36, %54 : vector<16x128xi32>
    %c78_i32_7 = arith.constant 78 : i32
    %56 = vector.broadcast %c78_i32_7 : i32 to vector<16x128xi32>
    %57 = arith.cmpi slt, %36, %56 : vector<16x128xi32>
    %58 = arith.andi %55, %57 : vector<16x128xi1>
    %59 = arith.ori %53, %58 : vector<16x128xi1>
    %c82_i32_8 = arith.constant 82 : i32
    %60 = vector.broadcast %c82_i32_8 : i32 to vector<16x128xi32>
    %61 = arith.cmpi sge, %36, %60 : vector<16x128xi32>
    %c98_i32_9 = arith.constant 98 : i32
    %62 = vector.broadcast %c98_i32_9 : i32 to vector<16x128xi32>
    %63 = arith.cmpi slt, %36, %62 : vector<16x128xi32>
    %64 = arith.andi %61, %63 : vector<16x128xi1>
    %65 = arith.ori %59, %64 : vector<16x128xi1>
    %c102_i32_10 = arith.constant 102 : i32
    %66 = vector.broadcast %c102_i32_10 : i32 to vector<16x128xi32>
    %67 = arith.cmpi sge, %36, %66 : vector<16x128xi32>
    %c118_i32_11 = arith.constant 118 : i32
    %68 = vector.broadcast %c118_i32_11 : i32 to vector<16x128xi32>
    %69 = arith.cmpi slt, %36, %68 : vector<16x128xi32>
    %70 = arith.andi %67, %69 : vector<16x128xi1>
    %71 = arith.ori %65, %70 : vector<16x128xi1>
    %72 = tpu.iota {dimensions = array<i32: 0>} : vector<20x128xi32>
    %c2_i32_12 = arith.constant 2 : i32
    %73 = vector.broadcast %c2_i32_12 : i32 to vector<20x128xi32>
    %74 = arith.cmpi sge, %72, %73 : vector<20x128xi32>
    %75 = arith.andi %35, %74 : vector<20x128xi1>
    %c18_i32_13 = arith.constant 18 : i32
    %76 = vector.broadcast %c18_i32_13 : i32 to vector<20x128xi32>
    %77 = arith.cmpi slt, %72, %76 : vector<20x128xi32>
    %78 = arith.andi %75, %77 : vector<20x128xi1>
    %c0 = arith.constant 0 : index
    %c1 = arith.constant 1 : index
    %79 = memref.load %arg2[%c0, %c1] : memref<2x4xf32, #tpu.memory_space<smem>>
    %c0_14 = arith.constant 0 : index
    %c0_15 = arith.constant 0 : index
    %80 = memref.load %arg5[%c0_14, %c0_15] : memref<5x5xf32, #tpu.memory_space<smem>>
    %81 = arith.mulf %79, %80 : f32
    %c0_16 = arith.constant 0 : index
    %c1_17 = arith.constant 1 : index
    %82 = memref.load %arg2[%c0_16, %c1_17] : memref<2x4xf32, #tpu.memory_space<smem>>
    %c0_18 = arith.constant 0 : index
    %c1_19 = arith.constant 1 : index
    %83 = memref.load %arg5[%c0_18, %c1_19] : memref<5x5xf32, #tpu.memory_space<smem>>
    %84 = arith.mulf %82, %83 : f32
    %c0_20 = arith.constant 0 : index
    %c1_21 = arith.constant 1 : index
    %85 = memref.load %arg2[%c0_20, %c1_21] : memref<2x4xf32, #tpu.memory_space<smem>>
    %c0_22 = arith.constant 0 : index
    %c2 = arith.constant 2 : index
    %86 = memref.load %arg5[%c0_22, %c2] : memref<5x5xf32, #tpu.memory_space<smem>>
    %87 = arith.mulf %85, %86 : f32
    %c0_23 = arith.constant 0 : index
    %c1_24 = arith.constant 1 : index
    %88 = memref.load %arg2[%c0_23, %c1_24] : memref<2x4xf32, #tpu.memory_space<smem>>
    %c0_25 = arith.constant 0 : index
    %c3 = arith.constant 3 : index
    %89 = memref.load %arg5[%c0_25, %c3] : memref<5x5xf32, #tpu.memory_space<smem>>
    %90 = arith.mulf %88, %89 : f32
    %c0_26 = arith.constant 0 : index
    %c1_27 = arith.constant 1 : index
    %91 = memref.load %arg2[%c0_26, %c1_27] : memref<2x4xf32, #tpu.memory_space<smem>>
    %c0_28 = arith.constant 0 : index
    %c4 = arith.constant 4 : index
    %92 = memref.load %arg5[%c0_28, %c4] : memref<5x5xf32, #tpu.memory_space<smem>>
    %93 = arith.mulf %91, %92 : f32
    %c0_29 = arith.constant 0 : index
    %c1_30 = arith.constant 1 : index
    %94 = memref.load %arg2[%c0_29, %c1_30] : memref<2x4xf32, #tpu.memory_space<smem>>
    %c1_31 = arith.constant 1 : index
    %c0_32 = arith.constant 0 : index
    %95 = memref.load %arg5[%c1_31, %c0_32] : memref<5x5xf32, #tpu.memory_space<smem>>
    %96 = arith.mulf %94, %95 : f32
    %c0_33 = arith.constant 0 : index
    %c1_34 = arith.constant 1 : index
    %97 = memref.load %arg2[%c0_33, %c1_34] : memref<2x4xf32, #tpu.memory_space<smem>>
    %c1_35 = arith.constant 1 : index
    %c1_36 = arith.constant 1 : index
    %98 = memref.load %arg5[%c1_35, %c1_36] : memref<5x5xf32, #tpu.memory_space<smem>>
    %99 = arith.mulf %97, %98 : f32
    %c0_37 = arith.constant 0 : index
    %c0_38 = arith.constant 0 : index
    %100 = memref.load %arg2[%c0_37, %c0_38] : memref<2x4xf32, #tpu.memory_space<smem>>
    %c0_39 = arith.constant 0 : index
    %c0_40 = arith.constant 0 : index
    %101 = memref.load %arg3[%c0_39, %c0_40] : memref<3x3xf32, #tpu.memory_space<smem>>
    %102 = arith.mulf %100, %101 : f32
    %103 = arith.addf %99, %102 : f32
    %c0_41 = arith.constant 0 : index
    %c1_42 = arith.constant 1 : index
    %104 = memref.load %arg2[%c0_41, %c1_42] : memref<2x4xf32, #tpu.memory_space<smem>>
    %c1_43 = arith.constant 1 : index
    %c2_44 = arith.constant 2 : index
    %105 = memref.load %arg5[%c1_43, %c2_44] : memref<5x5xf32, #tpu.memory_space<smem>>
    %106 = arith.mulf %104, %105 : f32
    %c0_45 = arith.constant 0 : index
    %c0_46 = arith.constant 0 : index
    %107 = memref.load %arg2[%c0_45, %c0_46] : memref<2x4xf32, #tpu.memory_space<smem>>
    %c0_47 = arith.constant 0 : index
    %c1_48 = arith.constant 1 : index
    %108 = memref.load %arg3[%c0_47, %c1_48] : memref<3x3xf32, #tpu.memory_space<smem>>
    %109 = arith.mulf %107, %108 : f32
    %110 = arith.addf %106, %109 : f32
    %c0_49 = arith.constant 0 : index
    %c1_50 = arith.constant 1 : index
    %111 = memref.load %arg2[%c0_49, %c1_50] : memref<2x4xf32, #tpu.memory_space<smem>>
    %c1_51 = arith.constant 1 : index
    %c3_52 = arith.constant 3 : index
    %112 = memref.load %arg5[%c1_51, %c3_52] : memref<5x5xf32, #tpu.memory_space<smem>>
    %113 = arith.mulf %111, %112 : f32
    %c0_53 = arith.constant 0 : index
    %c0_54 = arith.constant 0 : index
    %114 = memref.load %arg2[%c0_53, %c0_54] : memref<2x4xf32, #tpu.memory_space<smem>>
    %c0_55 = arith.constant 0 : index
    %c2_56 = arith.constant 2 : index
    %115 = memref.load %arg3[%c0_55, %c2_56] : memref<3x3xf32, #tpu.memory_space<smem>>
    %116 = arith.mulf %114, %115 : f32
    %117 = arith.addf %113, %116 : f32
    %c0_57 = arith.constant 0 : index
    %c1_58 = arith.constant 1 : index
    %118 = memref.load %arg2[%c0_57, %c1_58] : memref<2x4xf32, #tpu.memory_space<smem>>
    %c1_59 = arith.constant 1 : index
    %c4_60 = arith.constant 4 : index
    %119 = memref.load %arg5[%c1_59, %c4_60] : memref<5x5xf32, #tpu.memory_space<smem>>
    %120 = arith.mulf %118, %119 : f32
    %c0_61 = arith.constant 0 : index
    %c1_62 = arith.constant 1 : index
    %121 = memref.load %arg2[%c0_61, %c1_62] : memref<2x4xf32, #tpu.memory_space<smem>>
    %c2_63 = arith.constant 2 : index
    %c0_64 = arith.constant 0 : index
    %122 = memref.load %arg5[%c2_63, %c0_64] : memref<5x5xf32, #tpu.memory_space<smem>>
    %123 = arith.mulf %121, %122 : f32
    %c0_65 = arith.constant 0 : index
    %c1_66 = arith.constant 1 : index
    %124 = memref.load %arg2[%c0_65, %c1_66] : memref<2x4xf32, #tpu.memory_space<smem>>
    %c2_67 = arith.constant 2 : index
    %c1_68 = arith.constant 1 : index
    %125 = memref.load %arg5[%c2_67, %c1_68] : memref<5x5xf32, #tpu.memory_space<smem>>
    %126 = arith.mulf %124, %125 : f32
    %c0_69 = arith.constant 0 : index
    %c0_70 = arith.constant 0 : index
    %127 = memref.load %arg2[%c0_69, %c0_70] : memref<2x4xf32, #tpu.memory_space<smem>>
    %c1_71 = arith.constant 1 : index
    %c0_72 = arith.constant 0 : index
    %128 = memref.load %arg3[%c1_71, %c0_72] : memref<3x3xf32, #tpu.memory_space<smem>>
    %129 = arith.mulf %127, %128 : f32
    %130 = arith.addf %126, %129 : f32
    %c0_73 = arith.constant 0 : index
    %c1_74 = arith.constant 1 : index
    %131 = memref.load %arg2[%c0_73, %c1_74] : memref<2x4xf32, #tpu.memory_space<smem>>
    %c2_75 = arith.constant 2 : index
    %c2_76 = arith.constant 2 : index
    %132 = memref.load %arg5[%c2_75, %c2_76] : memref<5x5xf32, #tpu.memory_space<smem>>
    %133 = arith.mulf %131, %132 : f32
    %c0_77 = arith.constant 0 : index
    %c0_78 = arith.constant 0 : index
    %134 = memref.load %arg2[%c0_77, %c0_78] : memref<2x4xf32, #tpu.memory_space<smem>>
    %c1_79 = arith.constant 1 : index
    %c1_80 = arith.constant 1 : index
    %135 = memref.load %arg3[%c1_79, %c1_80] : memref<3x3xf32, #tpu.memory_space<smem>>
    %136 = arith.mulf %134, %135 : f32
    %137 = arith.addf %133, %136 : f32
    %c0_81 = arith.constant 0 : index
    %c1_82 = arith.constant 1 : index
    %138 = memref.load %arg2[%c0_81, %c1_82] : memref<2x4xf32, #tpu.memory_space<smem>>
    %c2_83 = arith.constant 2 : index
    %c3_84 = arith.constant 3 : index
    %139 = memref.load %arg5[%c2_83, %c3_84] : memref<5x5xf32, #tpu.memory_space<smem>>
    %140 = arith.mulf %138, %139 : f32
    %c0_85 = arith.constant 0 : index
    %c0_86 = arith.constant 0 : index
    %141 = memref.load %arg2[%c0_85, %c0_86] : memref<2x4xf32, #tpu.memory_space<smem>>
    %c1_87 = arith.constant 1 : index
    %c2_88 = arith.constant 2 : index
    %142 = memref.load %arg3[%c1_87, %c2_88] : memref<3x3xf32, #tpu.memory_space<smem>>
    %143 = arith.mulf %141, %142 : f32
    %144 = arith.addf %140, %143 : f32
    %c0_89 = arith.constant 0 : index
    %c1_90 = arith.constant 1 : index
    %145 = memref.load %arg2[%c0_89, %c1_90] : memref<2x4xf32, #tpu.memory_space<smem>>
    %c2_91 = arith.constant 2 : index
    %c4_92 = arith.constant 4 : index
    %146 = memref.load %arg5[%c2_91, %c4_92] : memref<5x5xf32, #tpu.memory_space<smem>>
    %147 = arith.mulf %145, %146 : f32
    %c0_93 = arith.constant 0 : index
    %c1_94 = arith.constant 1 : index
    %148 = memref.load %arg2[%c0_93, %c1_94] : memref<2x4xf32, #tpu.memory_space<smem>>
    %c3_95 = arith.constant 3 : index
    %c0_96 = arith.constant 0 : index
    %149 = memref.load %arg5[%c3_95, %c0_96] : memref<5x5xf32, #tpu.memory_space<smem>>
    %150 = arith.mulf %148, %149 : f32
    %c0_97 = arith.constant 0 : index
    %c1_98 = arith.constant 1 : index
    %151 = memref.load %arg2[%c0_97, %c1_98] : memref<2x4xf32, #tpu.memory_space<smem>>
    %c3_99 = arith.constant 3 : index
    %c1_100 = arith.constant 1 : index
    %152 = memref.load %arg5[%c3_99, %c1_100] : memref<5x5xf32, #tpu.memory_space<smem>>
    %153 = arith.mulf %151, %152 : f32
    %c0_101 = arith.constant 0 : index
    %c0_102 = arith.constant 0 : index
    %154 = memref.load %arg2[%c0_101, %c0_102] : memref<2x4xf32, #tpu.memory_space<smem>>
    %c2_103 = arith.constant 2 : index
    %c0_104 = arith.constant 0 : index
    %155 = memref.load %arg3[%c2_103, %c0_104] : memref<3x3xf32, #tpu.memory_space<smem>>
    %156 = arith.mulf %154, %155 : f32
    %157 = arith.addf %153, %156 : f32
    %c0_105 = arith.constant 0 : index
    %c1_106 = arith.constant 1 : index
    %158 = memref.load %arg2[%c0_105, %c1_106] : memref<2x4xf32, #tpu.memory_space<smem>>
    %c3_107 = arith.constant 3 : index
    %c2_108 = arith.constant 2 : index
    %159 = memref.load %arg5[%c3_107, %c2_108] : memref<5x5xf32, #tpu.memory_space<smem>>
    %160 = arith.mulf %158, %159 : f32
    %c0_109 = arith.constant 0 : index
    %c0_110 = arith.constant 0 : index
    %161 = memref.load %arg2[%c0_109, %c0_110] : memref<2x4xf32, #tpu.memory_space<smem>>
    %c2_111 = arith.constant 2 : index
    %c1_112 = arith.constant 1 : index
    %162 = memref.load %arg3[%c2_111, %c1_112] : memref<3x3xf32, #tpu.memory_space<smem>>
    %163 = arith.mulf %161, %162 : f32
    %164 = arith.addf %160, %163 : f32
    %c0_113 = arith.constant 0 : index
    %c1_114 = arith.constant 1 : index
    %165 = memref.load %arg2[%c0_113, %c1_114] : memref<2x4xf32, #tpu.memory_space<smem>>
    %c3_115 = arith.constant 3 : index
    %c3_116 = arith.constant 3 : index
    %166 = memref.load %arg5[%c3_115, %c3_116] : memref<5x5xf32, #tpu.memory_space<smem>>
    %167 = arith.mulf %165, %166 : f32
    %c0_117 = arith.constant 0 : index
    %c0_118 = arith.constant 0 : index
    %168 = memref.load %arg2[%c0_117, %c0_118] : memref<2x4xf32, #tpu.memory_space<smem>>
    %c2_119 = arith.constant 2 : index
    %c2_120 = arith.constant 2 : index
    %169 = memref.load %arg3[%c2_119, %c2_120] : memref<3x3xf32, #tpu.memory_space<smem>>
    %170 = arith.mulf %168, %169 : f32
    %171 = arith.addf %167, %170 : f32
    %c0_121 = arith.constant 0 : index
    %c1_122 = arith.constant 1 : index
    %172 = memref.load %arg2[%c0_121, %c1_122] : memref<2x4xf32, #tpu.memory_space<smem>>
    %c3_123 = arith.constant 3 : index
    %c4_124 = arith.constant 4 : index
    %173 = memref.load %arg5[%c3_123, %c4_124] : memref<5x5xf32, #tpu.memory_space<smem>>
    %174 = arith.mulf %172, %173 : f32
    %c0_125 = arith.constant 0 : index
    %c1_126 = arith.constant 1 : index
    %175 = memref.load %arg2[%c0_125, %c1_126] : memref<2x4xf32, #tpu.memory_space<smem>>
    %c4_127 = arith.constant 4 : index
    %c0_128 = arith.constant 0 : index
    %176 = memref.load %arg5[%c4_127, %c0_128] : memref<5x5xf32, #tpu.memory_space<smem>>
    %177 = arith.mulf %175, %176 : f32
    %c0_129 = arith.constant 0 : index
    %c1_130 = arith.constant 1 : index
    %178 = memref.load %arg2[%c0_129, %c1_130] : memref<2x4xf32, #tpu.memory_space<smem>>
    %c4_131 = arith.constant 4 : index
    %c1_132 = arith.constant 1 : index
    %179 = memref.load %arg5[%c4_131, %c1_132] : memref<5x5xf32, #tpu.memory_space<smem>>
    %180 = arith.mulf %178, %179 : f32
    %c0_133 = arith.constant 0 : index
    %c1_134 = arith.constant 1 : index
    %181 = memref.load %arg2[%c0_133, %c1_134] : memref<2x4xf32, #tpu.memory_space<smem>>
    %c4_135 = arith.constant 4 : index
    %c2_136 = arith.constant 2 : index
    %182 = memref.load %arg5[%c4_135, %c2_136] : memref<5x5xf32, #tpu.memory_space<smem>>
    %183 = arith.mulf %181, %182 : f32
    %c0_137 = arith.constant 0 : index
    %c1_138 = arith.constant 1 : index
    %184 = memref.load %arg2[%c0_137, %c1_138] : memref<2x4xf32, #tpu.memory_space<smem>>
    %c4_139 = arith.constant 4 : index
    %c3_140 = arith.constant 3 : index
    %185 = memref.load %arg5[%c4_139, %c3_140] : memref<5x5xf32, #tpu.memory_space<smem>>
    %186 = arith.mulf %184, %185 : f32
    %c0_141 = arith.constant 0 : index
    %c1_142 = arith.constant 1 : index
    %187 = memref.load %arg2[%c0_141, %c1_142] : memref<2x4xf32, #tpu.memory_space<smem>>
    %c4_143 = arith.constant 4 : index
    %c4_144 = arith.constant 4 : index
    %188 = memref.load %arg5[%c4_143, %c4_144] : memref<5x5xf32, #tpu.memory_space<smem>>
    %189 = arith.mulf %187, %188 : f32
    %c1_145 = arith.constant 1 : index
    %c1_146 = arith.constant 1 : index
    %190 = memref.load %arg2[%c1_145, %c1_146] : memref<2x4xf32, #tpu.memory_space<smem>>
    %c0_147 = arith.constant 0 : index
    %c0_148 = arith.constant 0 : index
    %191 = memref.load %arg5[%c0_147, %c0_148] : memref<5x5xf32, #tpu.memory_space<smem>>
    %192 = arith.mulf %190, %191 : f32
    %c1_149 = arith.constant 1 : index
    %c1_150 = arith.constant 1 : index
    %193 = memref.load %arg2[%c1_149, %c1_150] : memref<2x4xf32, #tpu.memory_space<smem>>
    %c0_151 = arith.constant 0 : index
    %c1_152 = arith.constant 1 : index
    %194 = memref.load %arg5[%c0_151, %c1_152] : memref<5x5xf32, #tpu.memory_space<smem>>
    %195 = arith.mulf %193, %194 : f32
    %c1_153 = arith.constant 1 : index
    %c1_154 = arith.constant 1 : index
    %196 = memref.load %arg2[%c1_153, %c1_154] : memref<2x4xf32, #tpu.memory_space<smem>>
    %c0_155 = arith.constant 0 : index
    %c2_156 = arith.constant 2 : index
    %197 = memref.load %arg5[%c0_155, %c2_156] : memref<5x5xf32, #tpu.memory_space<smem>>
    %198 = arith.mulf %196, %197 : f32
    %c1_157 = arith.constant 1 : index
    %c1_158 = arith.constant 1 : index
    %199 = memref.load %arg2[%c1_157, %c1_158] : memref<2x4xf32, #tpu.memory_space<smem>>
    %c0_159 = arith.constant 0 : index
    %c3_160 = arith.constant 3 : index
    %200 = memref.load %arg5[%c0_159, %c3_160] : memref<5x5xf32, #tpu.memory_space<smem>>
    %201 = arith.mulf %199, %200 : f32
    %c1_161 = arith.constant 1 : index
    %c1_162 = arith.constant 1 : index
    %202 = memref.load %arg2[%c1_161, %c1_162] : memref<2x4xf32, #tpu.memory_space<smem>>
    %c0_163 = arith.constant 0 : index
    %c4_164 = arith.constant 4 : index
    %203 = memref.load %arg5[%c0_163, %c4_164] : memref<5x5xf32, #tpu.memory_space<smem>>
    %204 = arith.mulf %202, %203 : f32
    %c1_165 = arith.constant 1 : index
    %c1_166 = arith.constant 1 : index
    %205 = memref.load %arg2[%c1_165, %c1_166] : memref<2x4xf32, #tpu.memory_space<smem>>
    %c1_167 = arith.constant 1 : index
    %c0_168 = arith.constant 0 : index
    %206 = memref.load %arg5[%c1_167, %c0_168] : memref<5x5xf32, #tpu.memory_space<smem>>
    %207 = arith.mulf %205, %206 : f32
    %c1_169 = arith.constant 1 : index
    %c1_170 = arith.constant 1 : index
    %208 = memref.load %arg2[%c1_169, %c1_170] : memref<2x4xf32, #tpu.memory_space<smem>>
    %c1_171 = arith.constant 1 : index
    %c1_172 = arith.constant 1 : index
    %209 = memref.load %arg5[%c1_171, %c1_172] : memref<5x5xf32, #tpu.memory_space<smem>>
    %210 = arith.mulf %208, %209 : f32
    %c1_173 = arith.constant 1 : index
    %c0_174 = arith.constant 0 : index
    %211 = memref.load %arg2[%c1_173, %c0_174] : memref<2x4xf32, #tpu.memory_space<smem>>
    %c0_175 = arith.constant 0 : index
    %c0_176 = arith.constant 0 : index
    %212 = memref.load %arg3[%c0_175, %c0_176] : memref<3x3xf32, #tpu.memory_space<smem>>
    %213 = arith.mulf %211, %212 : f32
    %214 = arith.addf %210, %213 : f32
    %c1_177 = arith.constant 1 : index
    %c1_178 = arith.constant 1 : index
    %215 = memref.load %arg2[%c1_177, %c1_178] : memref<2x4xf32, #tpu.memory_space<smem>>
    %c1_179 = arith.constant 1 : index
    %c2_180 = arith.constant 2 : index
    %216 = memref.load %arg5[%c1_179, %c2_180] : memref<5x5xf32, #tpu.memory_space<smem>>
    %217 = arith.mulf %215, %216 : f32
    %c1_181 = arith.constant 1 : index
    %c0_182 = arith.constant 0 : index
    %218 = memref.load %arg2[%c1_181, %c0_182] : memref<2x4xf32, #tpu.memory_space<smem>>
    %c0_183 = arith.constant 0 : index
    %c1_184 = arith.constant 1 : index
    %219 = memref.load %arg3[%c0_183, %c1_184] : memref<3x3xf32, #tpu.memory_space<smem>>
    %220 = arith.mulf %218, %219 : f32
    %221 = arith.addf %217, %220 : f32
    %c1_185 = arith.constant 1 : index
    %c1_186 = arith.constant 1 : index
    %222 = memref.load %arg2[%c1_185, %c1_186] : memref<2x4xf32, #tpu.memory_space<smem>>
    %c1_187 = arith.constant 1 : index
    %c3_188 = arith.constant 3 : index
    %223 = memref.load %arg5[%c1_187, %c3_188] : memref<5x5xf32, #tpu.memory_space<smem>>
    %224 = arith.mulf %222, %223 : f32
    %c1_189 = arith.constant 1 : index
    %c0_190 = arith.constant 0 : index
    %225 = memref.load %arg2[%c1_189, %c0_190] : memref<2x4xf32, #tpu.memory_space<smem>>
    %c0_191 = arith.constant 0 : index
    %c2_192 = arith.constant 2 : index
    %226 = memref.load %arg3[%c0_191, %c2_192] : memref<3x3xf32, #tpu.memory_space<smem>>
    %227 = arith.mulf %225, %226 : f32
    %228 = arith.addf %224, %227 : f32
    %c1_193 = arith.constant 1 : index
    %c1_194 = arith.constant 1 : index
    %229 = memref.load %arg2[%c1_193, %c1_194] : memref<2x4xf32, #tpu.memory_space<smem>>
    %c1_195 = arith.constant 1 : index
    %c4_196 = arith.constant 4 : index
    %230 = memref.load %arg5[%c1_195, %c4_196] : memref<5x5xf32, #tpu.memory_space<smem>>
    %231 = arith.mulf %229, %230 : f32
    %c1_197 = arith.constant 1 : index
    %c1_198 = arith.constant 1 : index
    %232 = memref.load %arg2[%c1_197, %c1_198] : memref<2x4xf32, #tpu.memory_space<smem>>
    %c2_199 = arith.constant 2 : index
    %c0_200 = arith.constant 0 : index
    %233 = memref.load %arg5[%c2_199, %c0_200] : memref<5x5xf32, #tpu.memory_space<smem>>
    %234 = arith.mulf %232, %233 : f32
    %c1_201 = arith.constant 1 : index
    %c1_202 = arith.constant 1 : index
    %235 = memref.load %arg2[%c1_201, %c1_202] : memref<2x4xf32, #tpu.memory_space<smem>>
    %c2_203 = arith.constant 2 : index
    %c1_204 = arith.constant 1 : index
    %236 = memref.load %arg5[%c2_203, %c1_204] : memref<5x5xf32, #tpu.memory_space<smem>>
    %237 = arith.mulf %235, %236 : f32
    %c1_205 = arith.constant 1 : index
    %c0_206 = arith.constant 0 : index
    %238 = memref.load %arg2[%c1_205, %c0_206] : memref<2x4xf32, #tpu.memory_space<smem>>
    %c1_207 = arith.constant 1 : index
    %c0_208 = arith.constant 0 : index
    %239 = memref.load %arg3[%c1_207, %c0_208] : memref<3x3xf32, #tpu.memory_space<smem>>
    %240 = arith.mulf %238, %239 : f32
    %241 = arith.addf %237, %240 : f32
    %c1_209 = arith.constant 1 : index
    %c1_210 = arith.constant 1 : index
    %242 = memref.load %arg2[%c1_209, %c1_210] : memref<2x4xf32, #tpu.memory_space<smem>>
    %c2_211 = arith.constant 2 : index
    %c2_212 = arith.constant 2 : index
    %243 = memref.load %arg5[%c2_211, %c2_212] : memref<5x5xf32, #tpu.memory_space<smem>>
    %244 = arith.mulf %242, %243 : f32
    %c1_213 = arith.constant 1 : index
    %c0_214 = arith.constant 0 : index
    %245 = memref.load %arg2[%c1_213, %c0_214] : memref<2x4xf32, #tpu.memory_space<smem>>
    %c1_215 = arith.constant 1 : index
    %c1_216 = arith.constant 1 : index
    %246 = memref.load %arg3[%c1_215, %c1_216] : memref<3x3xf32, #tpu.memory_space<smem>>
    %247 = arith.mulf %245, %246 : f32
    %248 = arith.addf %244, %247 : f32
    %c1_217 = arith.constant 1 : index
    %c1_218 = arith.constant 1 : index
    %249 = memref.load %arg2[%c1_217, %c1_218] : memref<2x4xf32, #tpu.memory_space<smem>>
    %c2_219 = arith.constant 2 : index
    %c3_220 = arith.constant 3 : index
    %250 = memref.load %arg5[%c2_219, %c3_220] : memref<5x5xf32, #tpu.memory_space<smem>>
    %251 = arith.mulf %249, %250 : f32
    %c1_221 = arith.constant 1 : index
    %c0_222 = arith.constant 0 : index
    %252 = memref.load %arg2[%c1_221, %c0_222] : memref<2x4xf32, #tpu.memory_space<smem>>
    %c1_223 = arith.constant 1 : index
    %c2_224 = arith.constant 2 : index
    %253 = memref.load %arg3[%c1_223, %c2_224] : memref<3x3xf32, #tpu.memory_space<smem>>
    %254 = arith.mulf %252, %253 : f32
    %255 = arith.addf %251, %254 : f32
    %c1_225 = arith.constant 1 : index
    %c1_226 = arith.constant 1 : index
    %256 = memref.load %arg2[%c1_225, %c1_226] : memref<2x4xf32, #tpu.memory_space<smem>>
    %c2_227 = arith.constant 2 : index
    %c4_228 = arith.constant 4 : index
    %257 = memref.load %arg5[%c2_227, %c4_228] : memref<5x5xf32, #tpu.memory_space<smem>>
    %258 = arith.mulf %256, %257 : f32
    %c1_229 = arith.constant 1 : index
    %c1_230 = arith.constant 1 : index
    %259 = memref.load %arg2[%c1_229, %c1_230] : memref<2x4xf32, #tpu.memory_space<smem>>
    %c3_231 = arith.constant 3 : index
    %c0_232 = arith.constant 0 : index
    %260 = memref.load %arg5[%c3_231, %c0_232] : memref<5x5xf32, #tpu.memory_space<smem>>
    %261 = arith.mulf %259, %260 : f32
    %c1_233 = arith.constant 1 : index
    %c1_234 = arith.constant 1 : index
    %262 = memref.load %arg2[%c1_233, %c1_234] : memref<2x4xf32, #tpu.memory_space<smem>>
    %c3_235 = arith.constant 3 : index
    %c1_236 = arith.constant 1 : index
    %263 = memref.load %arg5[%c3_235, %c1_236] : memref<5x5xf32, #tpu.memory_space<smem>>
    %264 = arith.mulf %262, %263 : f32
    %c1_237 = arith.constant 1 : index
    %c0_238 = arith.constant 0 : index
    %265 = memref.load %arg2[%c1_237, %c0_238] : memref<2x4xf32, #tpu.memory_space<smem>>
    %c2_239 = arith.constant 2 : index
    %c0_240 = arith.constant 0 : index
    %266 = memref.load %arg3[%c2_239, %c0_240] : memref<3x3xf32, #tpu.memory_space<smem>>
    %267 = arith.mulf %265, %266 : f32
    %268 = arith.addf %264, %267 : f32
    %c1_241 = arith.constant 1 : index
    %c1_242 = arith.constant 1 : index
    %269 = memref.load %arg2[%c1_241, %c1_242] : memref<2x4xf32, #tpu.memory_space<smem>>
    %c3_243 = arith.constant 3 : index
    %c2_244 = arith.constant 2 : index
    %270 = memref.load %arg5[%c3_243, %c2_244] : memref<5x5xf32, #tpu.memory_space<smem>>
    %271 = arith.mulf %269, %270 : f32
    %c1_245 = arith.constant 1 : index
    %c0_246 = arith.constant 0 : index
    %272 = memref.load %arg2[%c1_245, %c0_246] : memref<2x4xf32, #tpu.memory_space<smem>>
    %c2_247 = arith.constant 2 : index
    %c1_248 = arith.constant 1 : index
    %273 = memref.load %arg3[%c2_247, %c1_248] : memref<3x3xf32, #tpu.memory_space<smem>>
    %274 = arith.mulf %272, %273 : f32
    %275 = arith.addf %271, %274 : f32
    %c1_249 = arith.constant 1 : index
    %c1_250 = arith.constant 1 : index
    %276 = memref.load %arg2[%c1_249, %c1_250] : memref<2x4xf32, #tpu.memory_space<smem>>
    %c3_251 = arith.constant 3 : index
    %c3_252 = arith.constant 3 : index
    %277 = memref.load %arg5[%c3_251, %c3_252] : memref<5x5xf32, #tpu.memory_space<smem>>
    %278 = arith.mulf %276, %277 : f32
    %c1_253 = arith.constant 1 : index
    %c0_254 = arith.constant 0 : index
    %279 = memref.load %arg2[%c1_253, %c0_254] : memref<2x4xf32, #tpu.memory_space<smem>>
    %c2_255 = arith.constant 2 : index
    %c2_256 = arith.constant 2 : index
    %280 = memref.load %arg3[%c2_255, %c2_256] : memref<3x3xf32, #tpu.memory_space<smem>>
    %281 = arith.mulf %279, %280 : f32
    %282 = arith.addf %278, %281 : f32
    %c1_257 = arith.constant 1 : index
    %c1_258 = arith.constant 1 : index
    %283 = memref.load %arg2[%c1_257, %c1_258] : memref<2x4xf32, #tpu.memory_space<smem>>
    %c3_259 = arith.constant 3 : index
    %c4_260 = arith.constant 4 : index
    %284 = memref.load %arg5[%c3_259, %c4_260] : memref<5x5xf32, #tpu.memory_space<smem>>
    %285 = arith.mulf %283, %284 : f32
    %c1_261 = arith.constant 1 : index
    %c1_262 = arith.constant 1 : index
    %286 = memref.load %arg2[%c1_261, %c1_262] : memref<2x4xf32, #tpu.memory_space<smem>>
    %c4_263 = arith.constant 4 : index
    %c0_264 = arith.constant 0 : index
    %287 = memref.load %arg5[%c4_263, %c0_264] : memref<5x5xf32, #tpu.memory_space<smem>>
    %288 = arith.mulf %286, %287 : f32
    %c1_265 = arith.constant 1 : index
    %c1_266 = arith.constant 1 : index
    %289 = memref.load %arg2[%c1_265, %c1_266] : memref<2x4xf32, #tpu.memory_space<smem>>
    %c4_267 = arith.constant 4 : index
    %c1_268 = arith.constant 1 : index
    %290 = memref.load %arg5[%c4_267, %c1_268] : memref<5x5xf32, #tpu.memory_space<smem>>
    %291 = arith.mulf %289, %290 : f32
    %c1_269 = arith.constant 1 : index
    %c1_270 = arith.constant 1 : index
    %292 = memref.load %arg2[%c1_269, %c1_270] : memref<2x4xf32, #tpu.memory_space<smem>>
    %c4_271 = arith.constant 4 : index
    %c2_272 = arith.constant 2 : index
    %293 = memref.load %arg5[%c4_271, %c2_272] : memref<5x5xf32, #tpu.memory_space<smem>>
    %294 = arith.mulf %292, %293 : f32
    %c1_273 = arith.constant 1 : index
    %c1_274 = arith.constant 1 : index
    %295 = memref.load %arg2[%c1_273, %c1_274] : memref<2x4xf32, #tpu.memory_space<smem>>
    %c4_275 = arith.constant 4 : index
    %c3_276 = arith.constant 3 : index
    %296 = memref.load %arg5[%c4_275, %c3_276] : memref<5x5xf32, #tpu.memory_space<smem>>
    %297 = arith.mulf %295, %296 : f32
    %c1_277 = arith.constant 1 : index
    %c1_278 = arith.constant 1 : index
    %298 = memref.load %arg2[%c1_277, %c1_278] : memref<2x4xf32, #tpu.memory_space<smem>>
    %c4_279 = arith.constant 4 : index
    %c4_280 = arith.constant 4 : index
    %299 = memref.load %arg5[%c4_279, %c4_280] : memref<5x5xf32, #tpu.memory_space<smem>>
    %300 = arith.mulf %298, %299 : f32
    %c0_281 = arith.constant 0 : index
    %c0_282 = arith.constant 0 : index
    %301 = memref.load %arg2[%c0_281, %c0_282] : memref<2x4xf32, #tpu.memory_space<smem>>
    %c0_283 = arith.constant 0 : index
    %302 = memref.load %arg4[%c0_283] : memref<1xf32, #tpu.memory_space<smem>>
    %303 = arith.mulf %301, %302 : f32
    %c0_284 = arith.constant 0 : index
    %c1_285 = arith.constant 1 : index
    %304 = memref.load %arg2[%c0_284, %c1_285] : memref<2x4xf32, #tpu.memory_space<smem>>
    %c0_286 = arith.constant 0 : index
    %305 = memref.load %arg6[%c0_286] : memref<1xf32, #tpu.memory_space<smem>>
    %306 = arith.mulf %304, %305 : f32
    %307 = arith.addf %303, %306 : f32
    %c1_287 = arith.constant 1 : index
    %c0_288 = arith.constant 0 : index
    %308 = memref.load %arg2[%c1_287, %c0_288] : memref<2x4xf32, #tpu.memory_space<smem>>
    %c0_289 = arith.constant 0 : index
    %309 = memref.load %arg4[%c0_289] : memref<1xf32, #tpu.memory_space<smem>>
    %310 = arith.mulf %308, %309 : f32
    %c1_290 = arith.constant 1 : index
    %c1_291 = arith.constant 1 : index
    %311 = memref.load %arg2[%c1_290, %c1_291] : memref<2x4xf32, #tpu.memory_space<smem>>
    %c0_292 = arith.constant 0 : index
    %312 = memref.load %arg6[%c0_292] : memref<1xf32, #tpu.memory_space<smem>>
    %313 = arith.mulf %311, %312 : f32
    %314 = arith.addf %310, %313 : f32
    %c0_293 = arith.constant 0 : index
    %c2_294 = arith.constant 2 : index
    %315 = memref.load %arg2[%c0_293, %c2_294] : memref<2x4xf32, #tpu.memory_space<smem>>
    %c0_295 = arith.constant 0 : index
    %c3_296 = arith.constant 3 : index
    %316 = memref.load %arg2[%c0_295, %c3_296] : memref<2x4xf32, #tpu.memory_space<smem>>
    %c1_297 = arith.constant 1 : index
    %c2_298 = arith.constant 2 : index
    %317 = memref.load %arg2[%c1_297, %c2_298] : memref<2x4xf32, #tpu.memory_space<smem>>
    %c1_299 = arith.constant 1 : index
    %c3_300 = arith.constant 3 : index
    %318 = memref.load %arg2[%c1_299, %c3_300] : memref<2x4xf32, #tpu.memory_space<smem>>
    %cst = arith.constant 0.000000e+00 : f32
    %319 = vector.broadcast %cst : f32 to vector<20x128xf32>
    %c0_301 = arith.constant 0 : index
    %c0_302 = arith.constant 0 : index
    %320 = vector.load %arg8[%c0_301, %c0_302] : memref<20x128xf32, #tpu.memory_space<vmem>>, vector<20x128xf32>
    tpu.vector_store %arg8[%c0_301, %c0_302], %319 {strides = array<i32>} : memref<20x128xf32, #tpu.memory_space<vmem>>, vector<20x128xf32>,
    %c0_303 = arith.constant 0 : index
    %c0_304 = arith.constant 0 : index
    %c0_305 = arith.constant 0 : index
    %321 = vector.load %arg1[%c0_303, %c0_304, %c0_305] : memref<1x20x128xf32, #tpu.memory_space<vmem>>, vector<1x20x128xf32>
    %322 = vector.shape_cast %321 : vector<1x20x128xf32> to vector<20x128xf32>
    %cst_306 = arith.constant -3.40282347E+38 : f32
    %323 = vector.broadcast %cst_306 : f32 to vector<20x128xf32>
    %324 = arith.select %78, %322, %323 : vector<20x128xi1>, vector<20x128xf32>
    %c2_i32_307 = arith.constant 2 : i32
    %325 = tpu.dynamic_rotate %322 by %c2_i32_307 dim 1 : vector<20x128xf32>, i32 -> vector<20x128xf32>
    %c1_i32 = arith.constant 1 : i32
    %326 = tpu.dynamic_rotate %322 by %c1_i32 dim 1 : vector<20x128xf32>, i32 -> vector<20x128xf32>
    %c127_i32 = arith.constant 127 : i32
    %327 = tpu.dynamic_rotate %322 by %c127_i32 dim 1 : vector<20x128xf32>, i32 -> vector<20x128xf32>
    %c126_i32 = arith.constant 126 : i32
    %328 = tpu.dynamic_rotate %322 by %c126_i32 dim 1 : vector<20x128xf32>, i32 -> vector<20x128xf32>
    %c2_i32_308 = arith.constant 2 : i32
    %329 = tpu.dynamic_rotate %324 by %c2_i32_308 dim 1 : vector<20x128xf32>, i32 -> vector<20x128xf32>
    %c1_i32_309 = arith.constant 1 : i32
    %330 = tpu.dynamic_rotate %324 by %c1_i32_309 dim 1 : vector<20x128xf32>, i32 -> vector<20x128xf32>
    %c127_i32_310 = arith.constant 127 : i32
    %331 = tpu.dynamic_rotate %324 by %c127_i32_310 dim 1 : vector<20x128xf32>, i32 -> vector<20x128xf32>
    %c126_i32_311 = arith.constant 126 : i32
    %332 = tpu.dynamic_rotate %324 by %c126_i32_311 dim 1 : vector<20x128xf32>, i32 -> vector<20x128xf32>
    %333 = vector.extract_strided_slice %325 {offsets = [0, 0], sizes = [16, 128], strides = [1, 1]} : vector<20x128xf32> to vector<16x128xf32>
    %334 = vector.broadcast %81 : f32 to vector<16x128xf32>
    %335 = arith.mulf %334, %333 : vector<16x128xf32>
    %336 = vector.extract_strided_slice %326 {offsets = [0, 0], sizes = [16, 128], strides = [1, 1]} : vector<20x128xf32> to vector<16x128xf32>
    %337 = vector.broadcast %84 : f32 to vector<16x128xf32>
    %338 = arith.mulf %337, %336 : vector<16x128xf32>
    %339 = arith.addf %335, %338 : vector<16x128xf32>
    %340 = vector.extract_strided_slice %322 {offsets = [0, 0], sizes = [16, 128], strides = [1, 1]} : vector<20x128xf32> to vector<16x128xf32>
    %341 = vector.broadcast %87 : f32 to vector<16x128xf32>
    %342 = arith.mulf %341, %340 : vector<16x128xf32>
    %343 = arith.addf %339, %342 : vector<16x128xf32>
    %344 = vector.extract_strided_slice %327 {offsets = [0, 0], sizes = [16, 128], strides = [1, 1]} : vector<20x128xf32> to vector<16x128xf32>
    %345 = vector.broadcast %90 : f32 to vector<16x128xf32>
    %346 = arith.mulf %345, %344 : vector<16x128xf32>
    %347 = arith.addf %343, %346 : vector<16x128xf32>
    %348 = vector.extract_strided_slice %328 {offsets = [0, 0], sizes = [16, 128], strides = [1, 1]} : vector<20x128xf32> to vector<16x128xf32>
    %349 = vector.broadcast %93 : f32 to vector<16x128xf32>
    %350 = arith.mulf %349, %348 : vector<16x128xf32>
    %351 = arith.addf %347, %350 : vector<16x128xf32>
    %352 = vector.extract_strided_slice %325 {offsets = [1, 0], sizes = [16, 128], strides = [1, 1]} : vector<20x128xf32> to vector<16x128xf32>
    %353 = vector.broadcast %96 : f32 to vector<16x128xf32>
    %354 = arith.mulf %353, %352 : vector<16x128xf32>
    %355 = arith.addf %351, %354 : vector<16x128xf32>
    %356 = vector.extract_strided_slice %326 {offsets = [1, 0], sizes = [16, 128], strides = [1, 1]} : vector<20x128xf32> to vector<16x128xf32>
    %357 = vector.broadcast %103 : f32 to vector<16x128xf32>
    %358 = arith.mulf %357, %356 : vector<16x128xf32>
    %359 = arith.addf %355, %358 : vector<16x128xf32>
    %360 = vector.extract_strided_slice %322 {offsets = [1, 0], sizes = [16, 128], strides = [1, 1]} : vector<20x128xf32> to vector<16x128xf32>
    %361 = vector.broadcast %110 : f32 to vector<16x128xf32>
    %362 = arith.mulf %361, %360 : vector<16x128xf32>
    %363 = arith.addf %359, %362 : vector<16x128xf32>
    %364 = vector.extract_strided_slice %327 {offsets = [1, 0], sizes = [16, 128], strides = [1, 1]} : vector<20x128xf32> to vector<16x128xf32>
    %365 = vector.broadcast %117 : f32 to vector<16x128xf32>
    %366 = arith.mulf %365, %364 : vector<16x128xf32>
    %367 = arith.addf %363, %366 : vector<16x128xf32>
    %368 = vector.extract_strided_slice %328 {offsets = [1, 0], sizes = [16, 128], strides = [1, 1]} : vector<20x128xf32> to vector<16x128xf32>
    %369 = vector.broadcast %120 : f32 to vector<16x128xf32>
    %370 = arith.mulf %369, %368 : vector<16x128xf32>
    %371 = arith.addf %367, %370 : vector<16x128xf32>
    %372 = vector.extract_strided_slice %325 {offsets = [2, 0], sizes = [16, 128], strides = [1, 1]} : vector<20x128xf32> to vector<16x128xf32>
    %373 = vector.broadcast %123 : f32 to vector<16x128xf32>
    %374 = arith.mulf %373, %372 : vector<16x128xf32>
    %375 = arith.addf %371, %374 : vector<16x128xf32>
    %376 = vector.extract_strided_slice %326 {offsets = [2, 0], sizes = [16, 128], strides = [1, 1]} : vector<20x128xf32> to vector<16x128xf32>
    %377 = vector.broadcast %130 : f32 to vector<16x128xf32>
    %378 = arith.mulf %377, %376 : vector<16x128xf32>
    %379 = arith.addf %375, %378 : vector<16x128xf32>
    %380 = vector.extract_strided_slice %322 {offsets = [2, 0], sizes = [16, 128], strides = [1, 1]} : vector<20x128xf32> to vector<16x128xf32>
    %381 = vector.broadcast %137 : f32 to vector<16x128xf32>
    %382 = arith.mulf %381, %380 : vector<16x128xf32>
    %383 = arith.addf %379, %382 : vector<16x128xf32>
    %384 = vector.extract_strided_slice %327 {offsets = [2, 0], sizes = [16, 128], strides = [1, 1]} : vector<20x128xf32> to vector<16x128xf32>
    %385 = vector.broadcast %144 : f32 to vector<16x128xf32>
    %386 = arith.mulf %385, %384 : vector<16x128xf32>
    %387 = arith.addf %383, %386 : vector<16x128xf32>
    %388 = vector.extract_strided_slice %328 {offsets = [2, 0], sizes = [16, 128], strides = [1, 1]} : vector<20x128xf32> to vector<16x128xf32>
    %389 = vector.broadcast %147 : f32 to vector<16x128xf32>
    %390 = arith.mulf %389, %388 : vector<16x128xf32>
    %391 = arith.addf %387, %390 : vector<16x128xf32>
    %392 = vector.extract_strided_slice %325 {offsets = [3, 0], sizes = [16, 128], strides = [1, 1]} : vector<20x128xf32> to vector<16x128xf32>
    %393 = vector.broadcast %150 : f32 to vector<16x128xf32>
    %394 = arith.mulf %393, %392 : vector<16x128xf32>
    %395 = arith.addf %391, %394 : vector<16x128xf32>
    %396 = vector.extract_strided_slice %326 {offsets = [3, 0], sizes = [16, 128], strides = [1, 1]} : vector<20x128xf32> to vector<16x128xf32>
    %397 = vector.broadcast %157 : f32 to vector<16x128xf32>
    %398 = arith.mulf %397, %396 : vector<16x128xf32>
    %399 = arith.addf %395, %398 : vector<16x128xf32>
    %400 = vector.extract_strided_slice %322 {offsets = [3, 0], sizes = [16, 128], strides = [1, 1]} : vector<20x128xf32> to vector<16x128xf32>
    %401 = vector.broadcast %164 : f32 to vector<16x128xf32>
    %402 = arith.mulf %401, %400 : vector<16x128xf32>
    %403 = arith.addf %399, %402 : vector<16x128xf32>
    %404 = vector.extract_strided_slice %327 {offsets = [3, 0], sizes = [16, 128], strides = [1, 1]} : vector<20x128xf32> to vector<16x128xf32>
    %405 = vector.broadcast %171 : f32 to vector<16x128xf32>
    %406 = arith.mulf %405, %404 : vector<16x128xf32>
    %407 = arith.addf %403, %406 : vector<16x128xf32>
    %408 = vector.extract_strided_slice %328 {offsets = [3, 0], sizes = [16, 128], strides = [1, 1]} : vector<20x128xf32> to vector<16x128xf32>
    %409 = vector.broadcast %174 : f32 to vector<16x128xf32>
    %410 = arith.mulf %409, %408 : vector<16x128xf32>
    %411 = arith.addf %407, %410 : vector<16x128xf32>
    %412 = vector.extract_strided_slice %325 {offsets = [4, 0], sizes = [16, 128], strides = [1, 1]} : vector<20x128xf32> to vector<16x128xf32>
    %413 = vector.broadcast %177 : f32 to vector<16x128xf32>
    %414 = arith.mulf %413, %412 : vector<16x128xf32>
    %415 = arith.addf %411, %414 : vector<16x128xf32>
    %416 = vector.extract_strided_slice %326 {offsets = [4, 0], sizes = [16, 128], strides = [1, 1]} : vector<20x128xf32> to vector<16x128xf32>
    %417 = vector.broadcast %180 : f32 to vector<16x128xf32>
    %418 = arith.mulf %417, %416 : vector<16x128xf32>
    %419 = arith.addf %415, %418 : vector<16x128xf32>
    %420 = vector.extract_strided_slice %322 {offsets = [4, 0], sizes = [16, 128], strides = [1, 1]} : vector<20x128xf32> to vector<16x128xf32>
    %421 = vector.broadcast %183 : f32 to vector<16x128xf32>
    %422 = arith.mulf %421, %420 : vector<16x128xf32>
    %423 = arith.addf %419, %422 : vector<16x128xf32>
    %424 = vector.extract_strided_slice %327 {offsets = [4, 0], sizes = [16, 128], strides = [1, 1]} : vector<20x128xf32> to vector<16x128xf32>
    %425 = vector.broadcast %186 : f32 to vector<16x128xf32>
    %426 = arith.mulf %425, %424 : vector<16x128xf32>
    %427 = arith.addf %423, %426 : vector<16x128xf32>
    %428 = vector.extract_strided_slice %328 {offsets = [4, 0], sizes = [16, 128], strides = [1, 1]} : vector<20x128xf32> to vector<16x128xf32>
    %429 = vector.broadcast %189 : f32 to vector<16x128xf32>
    %430 = arith.mulf %429, %428 : vector<16x128xf32>
    %431 = arith.addf %427, %430 : vector<16x128xf32>
    %432 = vector.broadcast %307 : f32 to vector<16x128xf32>
    %433 = arith.addf %431, %432 : vector<16x128xf32>
    %434 = vector.extract_strided_slice %330 {offsets = [1, 0], sizes = [16, 128], strides = [1, 1]} : vector<20x128xf32> to vector<16x128xf32>
    %435 = vector.extract_strided_slice %324 {offsets = [1, 0], sizes = [16, 128], strides = [1, 1]} : vector<20x128xf32> to vector<16x128xf32>
    %436 = arith.maximumf %434, %435 : vector<16x128xf32>
    %437 = vector.extract_strided_slice %331 {offsets = [1, 0], sizes = [16, 128], strides = [1, 1]} : vector<20x128xf32> to vector<16x128xf32>
    %438 = arith.maximumf %436, %437 : vector<16x128xf32>
    %439 = vector.extract_strided_slice %330 {offsets = [2, 0], sizes = [16, 128], strides = [1, 1]} : vector<20x128xf32> to vector<16x128xf32>
    %440 = arith.maximumf %438, %439 : vector<16x128xf32>
    %441 = vector.extract_strided_slice %324 {offsets = [2, 0], sizes = [16, 128], strides = [1, 1]} : vector<20x128xf32> to vector<16x128xf32>
    %442 = arith.maximumf %440, %441 : vector<16x128xf32>
    %443 = vector.extract_strided_slice %331 {offsets = [2, 0], sizes = [16, 128], strides = [1, 1]} : vector<20x128xf32> to vector<16x128xf32>
    %444 = arith.maximumf %442, %443 : vector<16x128xf32>
    %445 = vector.extract_strided_slice %330 {offsets = [3, 0], sizes = [16, 128], strides = [1, 1]} : vector<20x128xf32> to vector<16x128xf32>
    %446 = arith.maximumf %444, %445 : vector<16x128xf32>
    %447 = vector.extract_strided_slice %324 {offsets = [3, 0], sizes = [16, 128], strides = [1, 1]} : vector<20x128xf32> to vector<16x128xf32>
    %448 = arith.maximumf %446, %447 : vector<16x128xf32>
    %449 = vector.extract_strided_slice %331 {offsets = [3, 0], sizes = [16, 128], strides = [1, 1]} : vector<20x128xf32> to vector<16x128xf32>
    %450 = arith.maximumf %448, %449 : vector<16x128xf32>
    %451 = vector.extract_strided_slice %329 {offsets = [0, 0], sizes = [16, 128], strides = [1, 1]} : vector<20x128xf32> to vector<16x128xf32>
    %452 = vector.extract_strided_slice %330 {offsets = [0, 0], sizes = [16, 128], strides = [1, 1]} : vector<20x128xf32> to vector<16x128xf32>
    %453 = arith.maximumf %451, %452 : vector<16x128xf32>
    %454 = vector.extract_strided_slice %324 {offsets = [0, 0], sizes = [16, 128], strides = [1, 1]} : vector<20x128xf32> to vector<16x128xf32>
    %455 = arith.maximumf %453, %454 : vector<16x128xf32>
    %456 = vector.extract_strided_slice %331 {offsets = [0, 0], sizes = [16, 128], strides = [1, 1]} : vector<20x128xf32> to vector<16x128xf32>
    %457 = arith.maximumf %455, %456 : vector<16x128xf32>
    %458 = vector.extract_strided_slice %332 {offsets = [0, 0], sizes = [16, 128], strides = [1, 1]} : vector<20x128xf32> to vector<16x128xf32>
    %459 = arith.maximumf %457, %458 : vector<16x128xf32>
    %460 = vector.extract_strided_slice %329 {offsets = [1, 0], sizes = [16, 128], strides = [1, 1]} : vector<20x128xf32> to vector<16x128xf32>
    %461 = arith.maximumf %459, %460 : vector<16x128xf32>
    %462 = vector.extract_strided_slice %332 {offsets = [1, 0], sizes = [16, 128], strides = [1, 1]} : vector<20x128xf32> to vector<16x128xf32>
    %463 = arith.maximumf %461, %462 : vector<16x128xf32>
    %464 = vector.extract_strided_slice %329 {offsets = [2, 0], sizes = [16, 128], strides = [1, 1]} : vector<20x128xf32> to vector<16x128xf32>
    %465 = arith.maximumf %463, %464 : vector<16x128xf32>
    %466 = vector.extract_strided_slice %332 {offsets = [2, 0], sizes = [16, 128], strides = [1, 1]} : vector<20x128xf32> to vector<16x128xf32>
    %467 = arith.maximumf %465, %466 : vector<16x128xf32>
    %468 = vector.extract_strided_slice %329 {offsets = [3, 0], sizes = [16, 128], strides = [1, 1]} : vector<20x128xf32> to vector<16x128xf32>
    %469 = arith.maximumf %467, %468 : vector<16x128xf32>
    %470 = vector.extract_strided_slice %332 {offsets = [3, 0], sizes = [16, 128], strides = [1, 1]} : vector<20x128xf32> to vector<16x128xf32>
    %471 = arith.maximumf %469, %470 : vector<16x128xf32>
    %472 = vector.extract_strided_slice %329 {offsets = [4, 0], sizes = [16, 128], strides = [1, 1]} : vector<20x128xf32> to vector<16x128xf32>
    %473 = arith.maximumf %471, %472 : vector<16x128xf32>
    %474 = vector.extract_strided_slice %330 {offsets = [4, 0], sizes = [16, 128], strides = [1, 1]} : vector<20x128xf32> to vector<16x128xf32>
    %475 = arith.maximumf %473, %474 : vector<16x128xf32>
    %476 = vector.extract_strided_slice %324 {offsets = [4, 0], sizes = [16, 128], strides = [1, 1]} : vector<20x128xf32> to vector<16x128xf32>
    %477 = arith.maximumf %475, %476 : vector<16x128xf32>
    %478 = vector.extract_strided_slice %331 {offsets = [4, 0], sizes = [16, 128], strides = [1, 1]} : vector<20x128xf32> to vector<16x128xf32>
    %479 = arith.maximumf %477, %478 : vector<16x128xf32>
    %480 = vector.extract_strided_slice %332 {offsets = [4, 0], sizes = [16, 128], strides = [1, 1]} : vector<20x128xf32> to vector<16x128xf32>
    %481 = arith.maximumf %479, %480 : vector<16x128xf32>
    %482 = arith.maximumf %450, %481 : vector<16x128xf32>
    %483 = vector.broadcast %315 : f32 to vector<16x128xf32>
    %484 = arith.mulf %483, %450 : vector<16x128xf32>
    %485 = arith.addf %433, %484 : vector<16x128xf32>
    %486 = vector.broadcast %316 : f32 to vector<16x128xf32>
    %487 = arith.mulf %486, %482 : vector<16x128xf32>
    %488 = arith.addf %485, %487 : vector<16x128xf32>
    %cst_312 = arith.constant 0.000000e+00 : f32
    %489 = vector.broadcast %cst_312 : f32 to vector<16x128xf32>
    %490 = arith.select %71, %488, %489 : vector<16x128xi1>, vector<16x128xf32>
    %c2_313 = arith.constant 2 : index
    %c0_314 = arith.constant 0 : index
    %491 = vector.load %arg8[%c2_313, %c0_314] : memref<20x128xf32, #tpu.memory_space<vmem>>, vector<16x128xf32>
    tpu.vector_store %arg8[%c2_313, %c0_314], %490 {strides = array<i32>} : memref<20x128xf32, #tpu.memory_space<vmem>>, vector<16x128xf32>,
    %c0_315 = arith.constant 0 : index
    %c0_316 = arith.constant 0 : index
    %492 = vector.load %arg8[%c0_315, %c0_316] : memref<20x128xf32, #tpu.memory_space<vmem>>, vector<20x128xf32>
    %cst_317 = arith.constant -3.40282347E+38 : f32
    %493 = vector.broadcast %cst_317 : f32 to vector<20x128xf32>
    %494 = arith.select %78, %492, %493 : vector<20x128xi1>, vector<20x128xf32>
    %c2_i32_318 = arith.constant 2 : i32
    %495 = tpu.dynamic_rotate %492 by %c2_i32_318 dim 1 : vector<20x128xf32>, i32 -> vector<20x128xf32>
    %c1_i32_319 = arith.constant 1 : i32
    %496 = tpu.dynamic_rotate %492 by %c1_i32_319 dim 1 : vector<20x128xf32>, i32 -> vector<20x128xf32>
    %c127_i32_320 = arith.constant 127 : i32
    %497 = tpu.dynamic_rotate %492 by %c127_i32_320 dim 1 : vector<20x128xf32>, i32 -> vector<20x128xf32>
    %c126_i32_321 = arith.constant 126 : i32
    %498 = tpu.dynamic_rotate %492 by %c126_i32_321 dim 1 : vector<20x128xf32>, i32 -> vector<20x128xf32>
    %c2_i32_322 = arith.constant 2 : i32
    %499 = tpu.dynamic_rotate %494 by %c2_i32_322 dim 1 : vector<20x128xf32>, i32 -> vector<20x128xf32>
    %c1_i32_323 = arith.constant 1 : i32
    %500 = tpu.dynamic_rotate %494 by %c1_i32_323 dim 1 : vector<20x128xf32>, i32 -> vector<20x128xf32>
    %c127_i32_324 = arith.constant 127 : i32
    %501 = tpu.dynamic_rotate %494 by %c127_i32_324 dim 1 : vector<20x128xf32>, i32 -> vector<20x128xf32>
    %c126_i32_325 = arith.constant 126 : i32
    %502 = tpu.dynamic_rotate %494 by %c126_i32_325 dim 1 : vector<20x128xf32>, i32 -> vector<20x128xf32>
    %503 = vector.extract_strided_slice %495 {offsets = [0, 0], sizes = [16, 128], strides = [1, 1]} : vector<20x128xf32> to vector<16x128xf32>
    %504 = vector.broadcast %192 : f32 to vector<16x128xf32>
    %505 = arith.mulf %504, %503 : vector<16x128xf32>
    %506 = vector.extract_strided_slice %496 {offsets = [0, 0], sizes = [16, 128], strides = [1, 1]} : vector<20x128xf32> to vector<16x128xf32>
    %507 = vector.broadcast %195 : f32 to vector<16x128xf32>
    %508 = arith.mulf %507, %506 : vector<16x128xf32>
    %509 = arith.addf %505, %508 : vector<16x128xf32>
    %510 = vector.extract_strided_slice %492 {offsets = [0, 0], sizes = [16, 128], strides = [1, 1]} : vector<20x128xf32> to vector<16x128xf32>
    %511 = vector.broadcast %198 : f32 to vector<16x128xf32>
    %512 = arith.mulf %511, %510 : vector<16x128xf32>
    %513 = arith.addf %509, %512 : vector<16x128xf32>
    %514 = vector.extract_strided_slice %497 {offsets = [0, 0], sizes = [16, 128], strides = [1, 1]} : vector<20x128xf32> to vector<16x128xf32>
    %515 = vector.broadcast %201 : f32 to vector<16x128xf32>
    %516 = arith.mulf %515, %514 : vector<16x128xf32>
    %517 = arith.addf %513, %516 : vector<16x128xf32>
    %518 = vector.extract_strided_slice %498 {offsets = [0, 0], sizes = [16, 128], strides = [1, 1]} : vector<20x128xf32> to vector<16x128xf32>
    %519 = vector.broadcast %204 : f32 to vector<16x128xf32>
    %520 = arith.mulf %519, %518 : vector<16x128xf32>
    %521 = arith.addf %517, %520 : vector<16x128xf32>
    %522 = vector.extract_strided_slice %495 {offsets = [1, 0], sizes = [16, 128], strides = [1, 1]} : vector<20x128xf32> to vector<16x128xf32>
    %523 = vector.broadcast %207 : f32 to vector<16x128xf32>
    %524 = arith.mulf %523, %522 : vector<16x128xf32>
    %525 = arith.addf %521, %524 : vector<16x128xf32>
    %526 = vector.extract_strided_slice %496 {offsets = [1, 0], sizes = [16, 128], strides = [1, 1]} : vector<20x128xf32> to vector<16x128xf32>
    %527 = vector.broadcast %214 : f32 to vector<16x128xf32>
    %528 = arith.mulf %527, %526 : vector<16x128xf32>
    %529 = arith.addf %525, %528 : vector<16x128xf32>
    %530 = vector.extract_strided_slice %492 {offsets = [1, 0], sizes = [16, 128], strides = [1, 1]} : vector<20x128xf32> to vector<16x128xf32>
    %531 = vector.broadcast %221 : f32 to vector<16x128xf32>
    %532 = arith.mulf %531, %530 : vector<16x128xf32>
    %533 = arith.addf %529, %532 : vector<16x128xf32>
    %534 = vector.extract_strided_slice %497 {offsets = [1, 0], sizes = [16, 128], strides = [1, 1]} : vector<20x128xf32> to vector<16x128xf32>
    %535 = vector.broadcast %228 : f32 to vector<16x128xf32>
    %536 = arith.mulf %535, %534 : vector<16x128xf32>
    %537 = arith.addf %533, %536 : vector<16x128xf32>
    %538 = vector.extract_strided_slice %498 {offsets = [1, 0], sizes = [16, 128], strides = [1, 1]} : vector<20x128xf32> to vector<16x128xf32>
    %539 = vector.broadcast %231 : f32 to vector<16x128xf32>
    %540 = arith.mulf %539, %538 : vector<16x128xf32>
    %541 = arith.addf %537, %540 : vector<16x128xf32>
    %542 = vector.extract_strided_slice %495 {offsets = [2, 0], sizes = [16, 128], strides = [1, 1]} : vector<20x128xf32> to vector<16x128xf32>
    %543 = vector.broadcast %234 : f32 to vector<16x128xf32>
    %544 = arith.mulf %543, %542 : vector<16x128xf32>
    %545 = arith.addf %541, %544 : vector<16x128xf32>
    %546 = vector.extract_strided_slice %496 {offsets = [2, 0], sizes = [16, 128], strides = [1, 1]} : vector<20x128xf32> to vector<16x128xf32>
    %547 = vector.broadcast %241 : f32 to vector<16x128xf32>
    %548 = arith.mulf %547, %546 : vector<16x128xf32>
    %549 = arith.addf %545, %548 : vector<16x128xf32>
    %550 = vector.extract_strided_slice %492 {offsets = [2, 0], sizes = [16, 128], strides = [1, 1]} : vector<20x128xf32> to vector<16x128xf32>
    %551 = vector.broadcast %248 : f32 to vector<16x128xf32>
    %552 = arith.mulf %551, %550 : vector<16x128xf32>
    %553 = arith.addf %549, %552 : vector<16x128xf32>
    %554 = vector.extract_strided_slice %497 {offsets = [2, 0], sizes = [16, 128], strides = [1, 1]} : vector<20x128xf32> to vector<16x128xf32>
    %555 = vector.broadcast %255 : f32 to vector<16x128xf32>
    %556 = arith.mulf %555, %554 : vector<16x128xf32>
    %557 = arith.addf %553, %556 : vector<16x128xf32>
    %558 = vector.extract_strided_slice %498 {offsets = [2, 0], sizes = [16, 128], strides = [1, 1]} : vector<20x128xf32> to vector<16x128xf32>
    %559 = vector.broadcast %258 : f32 to vector<16x128xf32>
    %560 = arith.mulf %559, %558 : vector<16x128xf32>
    %561 = arith.addf %557, %560 : vector<16x128xf32>
    %562 = vector.extract_strided_slice %495 {offsets = [3, 0], sizes = [16, 128], strides = [1, 1]} : vector<20x128xf32> to vector<16x128xf32>
    %563 = vector.broadcast %261 : f32 to vector<16x128xf32>
    %564 = arith.mulf %563, %562 : vector<16x128xf32>
    %565 = arith.addf %561, %564 : vector<16x128xf32>
    %566 = vector.extract_strided_slice %496 {offsets = [3, 0], sizes = [16, 128], strides = [1, 1]} : vector<20x128xf32> to vector<16x128xf32>
    %567 = vector.broadcast %268 : f32 to vector<16x128xf32>
    %568 = arith.mulf %567, %566 : vector<16x128xf32>
    %569 = arith.addf %565, %568 : vector<16x128xf32>
    %570 = vector.extract_strided_slice %492 {offsets = [3, 0], sizes = [16, 128], strides = [1, 1]} : vector<20x128xf32> to vector<16x128xf32>
    %571 = vector.broadcast %275 : f32 to vector<16x128xf32>
    %572 = arith.mulf %571, %570 : vector<16x128xf32>
    %573 = arith.addf %569, %572 : vector<16x128xf32>
    %574 = vector.extract_strided_slice %497 {offsets = [3, 0], sizes = [16, 128], strides = [1, 1]} : vector<20x128xf32> to vector<16x128xf32>
    %575 = vector.broadcast %282 : f32 to vector<16x128xf32>
    %576 = arith.mulf %575, %574 : vector<16x128xf32>
    %577 = arith.addf %573, %576 : vector<16x128xf32>
    %578 = vector.extract_strided_slice %498 {offsets = [3, 0], sizes = [16, 128], strides = [1, 1]} : vector<20x128xf32> to vector<16x128xf32>
    %579 = vector.broadcast %285 : f32 to vector<16x128xf32>
    %580 = arith.mulf %579, %578 : vector<16x128xf32>
    %581 = arith.addf %577, %580 : vector<16x128xf32>
    %582 = vector.extract_strided_slice %495 {offsets = [4, 0], sizes = [16, 128], strides = [1, 1]} : vector<20x128xf32> to vector<16x128xf32>
    %583 = vector.broadcast %288 : f32 to vector<16x128xf32>
    %584 = arith.mulf %583, %582 : vector<16x128xf32>
    %585 = arith.addf %581, %584 : vector<16x128xf32>
    %586 = vector.extract_strided_slice %496 {offsets = [4, 0], sizes = [16, 128], strides = [1, 1]} : vector<20x128xf32> to vector<16x128xf32>
    %587 = vector.broadcast %291 : f32 to vector<16x128xf32>
    %588 = arith.mulf %587, %586 : vector<16x128xf32>
    %589 = arith.addf %585, %588 : vector<16x128xf32>
    %590 = vector.extract_strided_slice %492 {offsets = [4, 0], sizes = [16, 128], strides = [1, 1]} : vector<20x128xf32> to vector<16x128xf32>
    %591 = vector.broadcast %294 : f32 to vector<16x128xf32>
    %592 = arith.mulf %591, %590 : vector<16x128xf32>
    %593 = arith.addf %589, %592 : vector<16x128xf32>
    %594 = vector.extract_strided_slice %497 {offsets = [4, 0], sizes = [16, 128], strides = [1, 1]} : vector<20x128xf32> to vector<16x128xf32>
    %595 = vector.broadcast %297 : f32 to vector<16x128xf32>
    %596 = arith.mulf %595, %594 : vector<16x128xf32>
    %597 = arith.addf %593, %596 : vector<16x128xf32>
    %598 = vector.extract_strided_slice %498 {offsets = [4, 0], sizes = [16, 128], strides = [1, 1]} : vector<20x128xf32> to vector<16x128xf32>
    %599 = vector.broadcast %300 : f32 to vector<16x128xf32>
    %600 = arith.mulf %599, %598 : vector<16x128xf32>
    %601 = arith.addf %597, %600 : vector<16x128xf32>
    %602 = vector.broadcast %314 : f32 to vector<16x128xf32>
    %603 = arith.addf %601, %602 : vector<16x128xf32>
    %604 = vector.extract_strided_slice %500 {offsets = [1, 0], sizes = [16, 128], strides = [1, 1]} : vector<20x128xf32> to vector<16x128xf32>
    %605 = vector.extract_strided_slice %494 {offsets = [1, 0], sizes = [16, 128], strides = [1, 1]} : vector<20x128xf32> to vector<16x128xf32>
    %606 = arith.maximumf %604, %605 : vector<16x128xf32>
    %607 = vector.extract_strided_slice %501 {offsets = [1, 0], sizes = [16, 128], strides = [1, 1]} : vector<20x128xf32> to vector<16x128xf32>
    %608 = arith.maximumf %606, %607 : vector<16x128xf32>
    %609 = vector.extract_strided_slice %500 {offsets = [2, 0], sizes = [16, 128], strides = [1, 1]} : vector<20x128xf32> to vector<16x128xf32>
    %610 = arith.maximumf %608, %609 : vector<16x128xf32>
    %611 = vector.extract_strided_slice %494 {offsets = [2, 0], sizes = [16, 128], strides = [1, 1]} : vector<20x128xf32> to vector<16x128xf32>
    %612 = arith.maximumf %610, %611 : vector<16x128xf32>
    %613 = vector.extract_strided_slice %501 {offsets = [2, 0], sizes = [16, 128], strides = [1, 1]} : vector<20x128xf32> to vector<16x128xf32>
    %614 = arith.maximumf %612, %613 : vector<16x128xf32>
    %615 = vector.extract_strided_slice %500 {offsets = [3, 0], sizes = [16, 128], strides = [1, 1]} : vector<20x128xf32> to vector<16x128xf32>
    %616 = arith.maximumf %614, %615 : vector<16x128xf32>
    %617 = vector.extract_strided_slice %494 {offsets = [3, 0], sizes = [16, 128], strides = [1, 1]} : vector<20x128xf32> to vector<16x128xf32>
    %618 = arith.maximumf %616, %617 : vector<16x128xf32>
    %619 = vector.extract_strided_slice %501 {offsets = [3, 0], sizes = [16, 128], strides = [1, 1]} : vector<20x128xf32> to vector<16x128xf32>
    %620 = arith.maximumf %618, %619 : vector<16x128xf32>
    %621 = vector.extract_strided_slice %499 {offsets = [0, 0], sizes = [16, 128], strides = [1, 1]} : vector<20x128xf32> to vector<16x128xf32>
    %622 = vector.extract_strided_slice %500 {offsets = [0, 0], sizes = [16, 128], strides = [1, 1]} : vector<20x128xf32> to vector<16x128xf32>
    %623 = arith.maximumf %621, %622 : vector<16x128xf32>
    %624 = vector.extract_strided_slice %494 {offsets = [0, 0], sizes = [16, 128], strides = [1, 1]} : vector<20x128xf32> to vector<16x128xf32>
    %625 = arith.maximumf %623, %624 : vector<16x128xf32>
    %626 = vector.extract_strided_slice %501 {offsets = [0, 0], sizes = [16, 128], strides = [1, 1]} : vector<20x128xf32> to vector<16x128xf32>
    %627 = arith.maximumf %625, %626 : vector<16x128xf32>
    %628 = vector.extract_strided_slice %502 {offsets = [0, 0], sizes = [16, 128], strides = [1, 1]} : vector<20x128xf32> to vector<16x128xf32>
    %629 = arith.maximumf %627, %628 : vector<16x128xf32>
    %630 = vector.extract_strided_slice %499 {offsets = [1, 0], sizes = [16, 128], strides = [1, 1]} : vector<20x128xf32> to vector<16x128xf32>
    %631 = arith.maximumf %629, %630 : vector<16x128xf32>
    %632 = vector.extract_strided_slice %502 {offsets = [1, 0], sizes = [16, 128], strides = [1, 1]} : vector<20x128xf32> to vector<16x128xf32>
    %633 = arith.maximumf %631, %632 : vector<16x128xf32>
    %634 = vector.extract_strided_slice %499 {offsets = [2, 0], sizes = [16, 128], strides = [1, 1]} : vector<20x128xf32> to vector<16x128xf32>
    %635 = arith.maximumf %633, %634 : vector<16x128xf32>
    %636 = vector.extract_strided_slice %502 {offsets = [2, 0], sizes = [16, 128], strides = [1, 1]} : vector<20x128xf32> to vector<16x128xf32>
    %637 = arith.maximumf %635, %636 : vector<16x128xf32>
    %638 = vector.extract_strided_slice %499 {offsets = [3, 0], sizes = [16, 128], strides = [1, 1]} : vector<20x128xf32> to vector<16x128xf32>
    %639 = arith.maximumf %637, %638 : vector<16x128xf32>
    %640 = vector.extract_strided_slice %502 {offsets = [3, 0], sizes = [16, 128], strides = [1, 1]} : vector<20x128xf32> to vector<16x128xf32>
    %641 = arith.maximumf %639, %640 : vector<16x128xf32>
    %642 = vector.extract_strided_slice %499 {offsets = [4, 0], sizes = [16, 128], strides = [1, 1]} : vector<20x128xf32> to vector<16x128xf32>
    %643 = arith.maximumf %641, %642 : vector<16x128xf32>
    %644 = vector.extract_strided_slice %500 {offsets = [4, 0], sizes = [16, 128], strides = [1, 1]} : vector<20x128xf32> to vector<16x128xf32>
    %645 = arith.maximumf %643, %644 : vector<16x128xf32>
    %646 = vector.extract_strided_slice %494 {offsets = [4, 0], sizes = [16, 128], strides = [1, 1]} : vector<20x128xf32> to vector<16x128xf32>
    %647 = arith.maximumf %645, %646 : vector<16x128xf32>
    %648 = vector.extract_strided_slice %501 {offsets = [4, 0], sizes = [16, 128], strides = [1, 1]} : vector<20x128xf32> to vector<16x128xf32>
    %649 = arith.maximumf %647, %648 : vector<16x128xf32>
    %650 = vector.extract_strided_slice %502 {offsets = [4, 0], sizes = [16, 128], strides = [1, 1]} : vector<20x128xf32> to vector<16x128xf32>
    %651 = arith.maximumf %649, %650 : vector<16x128xf32>
    %652 = arith.maximumf %620, %651 : vector<16x128xf32>
    %653 = vector.broadcast %317 : f32 to vector<16x128xf32>
    %654 = arith.mulf %653, %620 : vector<16x128xf32>
    %655 = arith.addf %603, %654 : vector<16x128xf32>
    %656 = vector.broadcast %318 : f32 to vector<16x128xf32>
    %657 = arith.mulf %656, %652 : vector<16x128xf32>
    %658 = arith.addf %655, %657 : vector<16x128xf32>
    %659 = arith.addf %488, %658 : vector<16x128xf32>
    %cst_326 = arith.constant 0.000000e+00 : f32
    %660 = vector.broadcast %cst_326 : f32 to vector<16x128xf32>
    %661 = arith.select %71, %659, %660 : vector<16x128xi1>, vector<16x128xf32>
    %c0_327 = arith.constant 0 : index
    %c0_328 = arith.constant 0 : index
    %c0_329 = arith.constant 0 : index
    %662 = vector.load %arg7[%c0_327, %c0_328, %c0_329] : memref<1x16x128xf32, #tpu.memory_space<vmem>>, vector<1x16x128xf32>
    %663 = vector.shape_cast %662 : vector<1x16x128xf32> to vector<16x128xf32>
    %664 = vector.shape_cast %661 : vector<16x128xf32> to vector<1x16x128xf32>
    tpu.vector_store %arg7[%c0_327, %c0_328, %c0_329], %664 {strides = array<i32>} : memref<1x16x128xf32, #tpu.memory_space<vmem>>, vector<1x16x128xf32>,
    return
  }
  func.func @transform_0(%arg0: i32) -> (i32, i32, i32) {
    %c0_i32 = arith.constant 0 : i32
    %c0_i32_0 = arith.constant 0 : i32
    %c0_i32_1 = arith.constant 0 : i32
    return %arg0, %c0_i32, %c0_i32_0 : i32, i32, i32
  }
  func.func @transform_1(%arg0: i32) -> (i32, i32) {
    %c0_i32 = arith.constant 0 : i32
    %c0_i32_0 = arith.constant 0 : i32
    %c0_i32_1 = arith.constant 0 : i32
    return %c0_i32, %c0_i32_0 : i32, i32
  }
  func.func @transform_2(%arg0: i32) -> (i32, i32) {
    %c0_i32 = arith.constant 0 : i32
    %c0_i32_0 = arith.constant 0 : i32
    %c0_i32_1 = arith.constant 0 : i32
    return %c0_i32, %c0_i32_0 : i32, i32
  }
  func.func @transform_3(%arg0: i32) -> i32 {
    %c0_i32 = arith.constant 0 : i32
    %c0_i32_0 = arith.constant 0 : i32
    return %c0_i32 : i32
  }
  func.func @transform_4(%arg0: i32) -> (i32, i32) {
    %c0_i32 = arith.constant 0 : i32
    %c0_i32_0 = arith.constant 0 : i32
    %c0_i32_1 = arith.constant 0 : i32
    return %c0_i32, %c0_i32_0 : i32, i32
  }
  func.func @transform_5(%arg0: i32) -> i32 {
    %c0_i32 = arith.constant 0 : i32
    %c0_i32_0 = arith.constant 0 : i32
    return %c0_i32 : i32
  }
  func.func @transform_6(%arg0: i32) -> (i32, i32, i32) {
    %c0_i32 = arith.constant 0 : i32
    %c0_i32_0 = arith.constant 0 : i32
    %c0_i32_1 = arith.constant 0 : i32
    return %arg0, %c0_i32, %c0_i32_0 : i32, i32, i32
  }
}

</mosaic_0001>

<bundles_post_ra>
// kernel: darts_forward.1
= control target key start
LH: loop header
LB: loop body
LE: loop exit
PB: predicated region body
PF: predicated region fallthrough
CT: control target
= control target key end

     0   :  { %s3184_s0 = inlined_call_operand.vmem [shape: f32[1,20,128], index: 0, kind: input, shape index: {}]   ;;  %s3185_s1 = inlined_call_operand.vmem [shape: f32[2,4], index: 1, kind: input, shape index: {}]   ;;  %s3186_s2 = inlined_call_operand.vmem [shape: f32[3,3], index: 2, kind: input, shape index: {}]   ;;  %s3187_s3 = inlined_call_operand.<no memory space> [shape: f32[1], index: 3, kind: input, shape index: {}]   ;;  %s3188_s4 = inlined_call_operand.vmem [shape: f32[5,5], index: 4, kind: input, shape index: {}]   ;;  %s3189_s5 = inlined_call_operand.<no memory space> [shape: f32[1], index: 5, kind: input, shape index: {}]   ;;  %s3190_s6 = inlined_call_operand.vmem [shape: f32[1,16,128], index: 6, kind: output, shape index: {}]  }
   0x1   :  { %3265 = sst [smem:[#allocation56_spill]] %s3187_s3 }
   0x2   :  { %3266 = sst [smem:[#allocation57_spill]] %s3189_s5 }
   0x3   :  { %3267 = sst [smem:[#allocation58_spill]] %s3190_s6 }
   0x4   :  { %13 = vsyncpa [#allocation6], 0 }
   0x5   :  { %14 = vsyncpa [#allocation8], 0  ;;  %s33_s23 = sshll.u32 %s3186_s2, 4  ;;  %s23_s26 = sshll.u32 %s3185_s1, 4  ;;  %s34_s23 = int_to_ptr.vmem [resolvable:$true] %s33_s23  ;;  %s24_s26 = int_to_ptr.vmem [resolvable:$true] %s23_s26 }
   0x6   :  { %s1583_s27 = scalar_lea.vmem %s34_s23, 64  ;;  %p1588_p1 = scmp.lt.s32.totalorder %s34_s23, %s34_s23 }
   0x7   :  { %p1584_p0 = scmp.ne.s32.totalorder %s34_s23, %s1583_s27  ;;  %p1589_p2 = scmp.lt.s32.totalorder %s1583_s27, %s1583_s27 }
   0x9   :  { %p1590_p3 = por %p1589_p2, %p1588_p1 }
   0xb   :  { %p1591_p4 = pnand %p1590_p3, %p1584_p0 }
   0xd   :  { %1594 = shalt.err (!%p1591_p4)
}
   0xe   :  { %s1623_s28 = smov [#allocation7]   ;;  %s1595_s29 = scalar_lea.vmem %s24_s26, 32 }
   0xf   :  { %36 = dma.vmem_to_smem %s34_s23, 64, %s1623_s28, [#allocation8]  }
  0x10   :  { %p1596_p5 = scmp.ne.s32.totalorder %s24_s26, %s1595_s29  ;;  %p1600_p6 = scmp.lt.s32.totalorder %s24_s26, %s24_s26 }
  0x11   :  { %p1601_p7 = scmp.lt.s32.totalorder %s1595_s29, %s1595_s29 }
  0x13   :  { %p1602_p8 = por %p1601_p7, %p1600_p6 }
  0x15   :  { %p1603_p9 = pnand %p1602_p8, %p1596_p5 }
  0x17   :  { %1606 = shalt.err (!%p1603_p9)
}
  0x18   :  { %s1624_s2 = smov [#allocation5]   ;;  %s45_s7 = sshll.u32 %s3188_s4, 4  ;;  %s46_s7 = int_to_ptr.vmem [resolvable:$true] %s45_s7 }
  0x19   :  { %26 = dma.vmem_to_smem %s24_s26, 32, %s1624_s2, [#allocation6]  }
  0x1a   :  { %s1607_s8 = scalar_lea.vmem %s46_s7, 128  ;;  %p1612_p11 = scmp.lt.s32.totalorder %s46_s7, %s46_s7 }
  0x1b   :  { %p1608_p10 = scmp.ne.s32.totalorder %s46_s7, %s1607_s8  ;;  %p1613_p12 = scmp.lt.s32.totalorder %s1607_s8, %s1607_s8 }
  0x1d   :  { %p1614_p13 = por %p1613_p12, %p1612_p11 }
  0x1f   :  { %p1615_p0 = pnand %p1614_p13, %p1608_p10 }
  0x21   :  { %1618 = shalt.err (!%p1615_p0)
}
  0x22   :  { %s1625_s9 = smov [#allocation9]  }
  0x23   :  { %48 = dma.vmem_to_smem %s46_s7, 128, %s1625_s9, [#allocation8]  }
  0x24   :  { %1619 = dma.done.wait [#allocation6], 32  }
  0x25   :  { %1620 = vsyncadd [#allocation6], 4294967264 }
  0x26   :  { %1621 = dma.done.wait [#allocation8], 192  }
  0x27   :  { %1622 = vsyncadd [#allocation8], 4294967104 }
  0x28   :  { %60 = sfence }
  0x29   :  { %v1678_v0 = vld [vmem:[%s3184_s0] sm:$0xff]  ;;  %v61_v1 = vlaneseq  ;;  %s3195_s4 = smov 1   ;;  %s3197_s12 = smov 2   ;;  %v1687_v2 = vld [vmem:[%s3184_s0 + $0x8] sm:$0xff]  ;;  %v1700_v4 = vld [vmem:[%s3184_s0 + $0x10] sm:$0xf] }
  0x2a   :  { %253 = vrot.lane.b32.xlu1 %v1678_v0, %s3195_s4  ;;  %247 = vrot.lane.b32.xlu0 %v1678_v0, %s3197_s12  ;;  %s3193_s15 = smov 127   ;;  %s3191_s18 = smov 126   ;;  %v3268_v6 = vmov 0  ;;  %v3271_v7 = vmov 0  ;;  %v3276_v11 = vmov 0  ;;  %v1630_v49 = vmov 0.0  }
  0x2b   :  { %v62_v3 = vand.u32 127, %v61_v1  ;;  %v87_v5 = vshrl.u32 %v61_v1, 7  ;;  %s1738_s0 = sld [smem:[#allocation5 + $0x1]]  ;;  %238 = vst [vmem:[#allocation2] sm:$0xff] %v1630_v49  ;;  %239 = vst [vmem:[#allocation2 + $0x8] sm:$0xff] %v1630_v49 }
  0x2c   :  { %s1740_s19 = sld [smem:[#allocation5]]  ;;  %240 = vst [vmem:[#allocation2 + $0x10] sm:$0xf] %v1630_v49 }
  0x2d   :  { %vm63_vm0 = vcmp.ge.s32.totalorder %v62_v3, 2  ;;  %vm64_vm1 = vcmp.lt.s32.totalorder %v62_v3, 18  ;;  %vm66_vm2 = vcmp.ge.s32.totalorder %v62_v3, 22  ;;  %vm67_vm3 = vcmp.lt.s32.totalorder %v62_v3, 38  ;;  %s1742_s20 = sld [smem:[#allocation9 + $0x82]] }
  0x2e   :  { %255 = vrot.lane.b32.xlu1 %v1687_v2, %s3195_s4  ;;  %249 = vrot.lane.b32.xlu0 %v1687_v2, %s3197_s12  ;;  %vm65_vm4 = vmand %vm63_vm0, %vm64_vm1  ;;  %vm70_vm5 = vcmp.ge.s32.totalorder %v62_v3, 42  ;;  %vm71_vm6 = vcmp.lt.s32.totalorder %v62_v3, 58  ;;  %vm74_vm9 = vcmp.ge.s32.totalorder %v62_v3, 62  ;;  %vm75_vm10 = vcmp.lt.s32.totalorder %v62_v3, 78  ;;  %s1744_s21 = sld [smem:[#allocation7 + $0x1]] }
  0x2f   :  { %vm68_vm7 = vmand %vm66_vm2, %vm67_vm3  ;;  %vm78_vm13 = vcmp.ge.s32.totalorder %v62_v3, 82  ;;  %vm79_vm14 = vcmp.lt.s32.totalorder %v62_v3, 98  ;;  %vm82_vm1 = vcmp.ge.s32.totalorder %v62_v3, 102  ;;  %vm83_vm2 = vcmp.lt.s32.totalorder %v62_v3, 118  ;;  %s1756_s22 = sld [smem:[#allocation9 + $0x102]] }
  0x30   :  { %vm69_vm8 = vmor %vm65_vm4, %vm68_vm7  ;;  %vm90_vm7 = vcmp.ge.s32.totalorder %v87_v5, 2  ;;  %v89_v10 = vadd.s32 16, %v87_v5  ;;  %s1758_s23 = sld [smem:[#allocation7 + $0x81]] }
  0x31   :  { %vm72_vm11 = vmand %vm70_vm5, %vm71_vm6  ;;  %s1773_s26 = sld [smem:[#allocation9 + $0x182]] }
  0x32   :  { %261 = vrot.lane.b32.xlu1 %v1687_v2, %s3193_s15  ;;  %259 = vrot.lane.b32.xlu0 %v1678_v0, %s3193_s15  ;;  %vm73_vm12 = vmor %vm69_vm8, %vm72_vm11  ;;  %s1781_s29 = sld [smem:[#allocation7 + $0x101]]  ;;  %vm325_vm11 = vcmask 1046528  }
  0x33   :  { %vm76_vm15 = vmand %vm74_vm9, %vm75_vm10  ;;  %3274 = sst [smem:[#allocation14_spill]] %s1742_s20  ;;  %vm98_vm9 = vcmp.lt.s32.totalorder %v89_v10, 18  ;;  %s122_s24 = smul.f32 %s1742_s20, %s1738_s0 }
  0x34   :  { %vm77_vm0 = vmor %vm73_vm12, %vm76_vm15  ;;  %3275 = sst [smem:[#allocation15_spill]] %s1744_s21  ;;  %s124_s25 = smul.f32 %s1744_s21, %s1740_s19  ;;  %vm406_vm12 = vcmask 1045504   ;;  %vm841_vm15 = vcmask 1040384  }
  0x35   :  { %vm80_vm3 = vmand %vm78_vm13, %vm79_vm14  ;;  %s141_s28 = smul.f32 %s1756_s22, %s1738_s0  ;;  %s1796_s8 = sld [smem:[#allocation9 + $0x202]]  ;;  %vm487_vm13 = vcmask 1044480   ;;  %vm568_vm14 = vcmask 1043456  }
  0x36   :  { %265 = vrot.lane.b32.xlu1 %v1678_v0, %s3191_s18  ;;  %251 = vrot.lane.b32.xlu0 %v1700_v4, %s3197_s12  ;;  %vm81_vm4 = vmor %vm77_vm0, %vm80_vm3  ;;  %s125_s27 = sadd.f32 %s124_s25, %s122_s24  ;;  %s143_s2 = smul.f32 %s1758_s23, %s1740_s19 }
  0x37   :  { %vm84_vm5 = vmand %vm82_vm1, %vm83_vm2  ;;  %s160_s30 = smul.f32 %s1773_s26, %s1738_s0  ;;  %s1837_s11 = sld [smem:[#allocation9 + $0x1]] }
  0x38   :  { %vm1706_vm6 = vmor %vm81_vm4, %vm84_vm5  ;;  %v351_v13 = vstv %s125_s27  ;;  %s144_s1 = sadd.f32 %s143_s2, %s141_s28  ;;  %s162_s7 = smul.f32 %s1781_s29, %s1740_s19 }
  0x39   :  { %v3269_v6 = vsel %vm1706_vm6, 4294967295, %v3268_v6  ;;  %vm1716_vm8 = vmand %vm1706_vm6, %vm90_vm7  ;;  %v1727_v8 = vsel %vm1706_vm6, %v1687_v2, -3.4028235e+38  ;;  %v352_v14 = vmul.f32 %v351_v13, %v1678_v0  ;;  %v353_v15 = vmul.f32 %v351_v13, %v1687_v2  ;;  %s1839_s13 = sld [smem:[#allocation9]] }
  0x3a   :  { %3270 = vst [vmem:[#allocation12_spill] sm:$0xff] %v3269_v6  ;;  %257 = vrot.lane.b32.xlu1 %v1700_v4, %s3195_s4  ;;  %267 = vrot.lane.b32.xlu0 %v1687_v2, %s3191_s18  ;;  %v3272_v7 = vsel %vm1716_vm8, 4294967295, %v3271_v7  ;;  %v1732_v9 = vsel %vm1716_vm8, %v1678_v0, -3.4028235e+38  ;;  %vm1752_vm10 = vmand %vm1706_vm6, %vm98_vm9  ;;  %v354_v16 = vmul.f32 %v351_v13, %v1700_v4  ;;  %v432_v20 = vstv %s144_s1  ;;  %s163_s9 = sadd.f32 %s162_s7, %s160_s30 }
  0x3b   :  { %3273 = vst [vmem:[#allocation13_spill] sm:$0xff] %v3272_v7  ;;  %v3277_v11 = vsel %vm1752_vm10, 4294967295, %v3276_v11  ;;  %v1769_v12 = vsel %vm1752_vm10, %v1700_v4, -3.4028235e+38  ;;  %v358_v17 = vrot.slane %v352_v14, 1  ;;  %v359_v18 = vrot.slane %v353_v15, 1  ;;  %s176_s10 = smul.f32 %s1796_s8, %s1738_s0 }
  0x3c   :  { %3278 = vst [vmem:[#allocation16_spill] sm:$0xff] %v3277_v11  ;;  %3279 = vst [vmem:[#allocation17_spill] sm:$0xff] %v1769_v12  ;;  %v361_v19 = vrot.slane %v354_v16, 1  ;;  %3280 = sst [smem:[#allocation18_spill]] %s1796_s8  ;;  %v433_v23 = vmul.f32 %v432_v20, %v1678_v0  ;;  %v434_v24 = vmul.f32 %v432_v20, %v1687_v2  ;;  %v435_v25 = vmul.f32 %v432_v20, %v1700_v4 }
  0x3d   :  { %v1799_v21 = vsel %vm325_vm11, %v358_v17, %v359_v18  ;;  %v513_v30 = vstv %s163_s9  ;;  %v594_v38 = vstv %s176_s10  ;;  %s1841_s14 = sld [smem:[#allocation9 + $0x2]]  ;;  %v668_v5 = vrot.slane %v1732_v9, 1 }
  0x3e   :  { %269 = vrot.lane.b32.xlu1 %v1700_v4, %s3191_s18  ;;  %263 = vrot.lane.b32.xlu0 %v1700_v4, %s3193_s15  ;;  %v1802_v22 = vsel %vm325_vm11, %v359_v18, %v361_v19  ;;  %v439_v26 = vrot.slane %v433_v23, 2  ;;  %v440_v27 = vrot.slane %v434_v24, 2  ;;  %v442_v28 = vrot.slane %v435_v25, 2  ;;  %s1843_s16 = sld [smem:[#allocation9 + $0x3]] }
  0x3f   :  { %v514_v32 = vmul.f32 %v513_v30, %v1678_v0  ;;  %v515_v33 = vmul.f32 %v513_v30, %v1687_v2  ;;  %v516_v34 = vmul.f32 %v513_v30, %v1700_v4  ;;  %v595_v41 = vmul.f32 %v594_v38, %v1678_v0  ;;  %3282 = sst [smem:[#allocation20_spill]] %s1839_s13 }
  0x40   :  { %v1812_v29 = vsel %vm406_vm12, %v439_v26, %v440_v27  ;;  %v1815_v31 = vsel %vm406_vm12, %v440_v27, %v442_v28  ;;  %v596_v42 = vmul.f32 %v594_v38, %v1687_v2  ;;  %v597_v43 = vmul.f32 %v594_v38, %v1700_v4  ;;  %s1845_s17 = sld [smem:[#allocation9 + $0x4]] }
  0x41   :  { %v520_v35 = vrot.slane %v514_v32, 3  ;;  %v521_v36 = vrot.slane %v515_v33, 3  ;;  %v523_v37 = vrot.slane %v516_v34, 3  ;;  %v601_v44 = vrot.slane %v595_v41, 4  ;;  %s1847_s24 = sld [smem:[#allocation9 + $0x80]] }
  0x42   :  { %273 = vrot.lane.b32.xlu1 %v1727_v8, %s3197_s12  ;;  %271 = vrot.lane.b32.xlu0 %v1732_v9, %s3197_s12  ;;  %v602_v45 = vrot.slane %v596_v42, 4  ;;  %v604_v46 = vrot.slane %v597_v43, 4  ;;  %s1849_s25 = sld [smem:[#allocation9 + $0x100]]  ;;  %v669_v4 = vrot.slane %v1727_v8, 1  ;;  %v705_v14 = vrot.slane %v1727_v8, 2 }
  0x43   :  { %v1823_v39 = vsel %vm487_vm13, %v520_v35, %v521_v36  ;;  %v1826_v40 = vsel %vm487_vm13, %v521_v36, %v523_v37  ;;  %3283 = sst [smem:[#allocation21_spill]] %s1841_s14  ;;  %v704_v15 = vrot.slane %v1732_v9, 2  ;;  %v813_v17 = vrot.slane %v1727_v8, 4 }
  0x44   :  { %v1832_v47 = vsel %vm568_vm14, %v601_v44, %v602_v45  ;;  %v1835_v48 = vsel %vm568_vm14, %v602_v45, %v604_v46  ;;  %3284 = sst [smem:[#allocation22_spill]] %s1843_s16  ;;  %v812_v18 = vrot.slane %v1732_v9, 4  ;;  %v3248_v19 = vrot.slane %v1769_v12, 1 }
  0x45   :  { %3281 = vst [vmem:[#allocation19_spill] sm:$0xff] %v1835_v48  ;;  %s1851_s27 = sld [smem:[#allocation9 + $0x180]]  ;;  %v3247_v27 = vrot.slane %v1769_v12, 2  ;;  %v2088_v32 = vsel %vm325_vm11, %v668_v5, %v669_v4  ;;  %v815_v33 = vrot.slane %v1769_v12, 4  ;;  %v2098_v37 = vsel %vm406_vm12, %v704_v15, %v705_v14 }
  0x46   :  { %279 = vrot.lane.b32.xlu1 %v1727_v8, %s3195_s4  ;;  %277 = vrot.lane.b32.xlu0 %v1732_v9, %s3195_s4  ;;  %3285 = sst [smem:[#allocation23_spill]] %s1845_s17  ;;  %3348 = vst [vmem:[#allocation50_spill] sm:$0xff] %v2098_v37  ;;  %v2102_v42 = vsel %vm568_vm14, %v812_v18, %v813_v17  ;;  %v2107_v43 = vsel %vm325_vm11, %v669_v4, %v3248_v19 }
  0x47   :  { %3286 = sst [smem:[#allocation24_spill]] %s1847_s24  ;;  %3349 = vst [vmem:[#allocation51_spill] sm:$0xff] %v2102_v42  ;;  %3350 = vst [vmem:[#allocation52_spill] sm:$0xff] %v2107_v43  ;;  %v2128_v15 = vsel %vm568_vm14, %v813_v17, %v815_v33 }
  0x48   :  { %3287 = sst [smem:[#allocation25_spill]] %s1849_s25  ;;  %3352 = vst [vmem:[#allocation54_spill] sm:$0xff] %v2128_v15 }
  0x49   :  { %s1855_s2 = sld [smem:[#allocation9 + $0x200]] }
  0x4a   :  { %285 = vrot.lane.b32.xlu1 %v1727_v8, %s3193_s15  ;;  %283 = vrot.lane.b32.xlu0 %v1732_v9, %s3193_s15  ;;  %s1859_s30 = sld [smem:[#allocation9 + $0x81]] }
  0x4b   :  { %3288 = sst [smem:[#allocation26_spill]] %s1851_s27 }
  0x4c   :  { %s1865_s10 = sld [smem:[#allocation7]] }
  0x4d   :  { %s1877_s28 = sld [smem:[#allocation9 + $0x181]] }
  0x4e   :  { %289 = vrot.lane.b32.xlu1 %v1732_v9, %s3191_s18  ;;  %275 = vrot.lane.b32.xlu0 %v1769_v12, %s3197_s12  ;;  %s1873_s12 = sld [smem:[#allocation7 + $0x80]] }
  0x4f   :  { %3289 = sst [smem:[#allocation27_spill]] %s1855_s2 }
  0x50   :  { %3290 = sst [smem:[#allocation28_spill]] %s1859_s30 }
  0x51   :  { %s1881_s7 = sld [smem:[#allocation7 + $0x100]] }
  0x52   :  { %293 = vrot.lane.b32.xlu1 %v1769_v12, %s3191_s18  ;;  %291 = vrot.lane.b32.xlu0 %v1727_v8, %s3191_s18  ;;  %3291 = sst [smem:[#allocation29_spill]] %s1865_s10 }
  0x53   :  { %3294 = sst [smem:[#allocation32_spill]] %s1877_s28 }
  0x54   :  { %3293 = sst [smem:[#allocation31_spill]] %s1873_s12 }
  0x55   :  { %s1885_s6 = sld [smem:[#allocation9 + $0x201]] }
  0x56   :  { %287 = vrot.lane.b32.xlu1 %v1769_v12, %s3193_s15  ;;  %281 = vrot.lane.b32.xlu0 %v1769_v12, %s3195_s4  ;;  %s1869_s15 = sld [smem:[#allocation9 + $0x101]] }
  0x57   :  { %3295 = sst [smem:[#allocation33_spill]] %s1881_s7  ;;  %s157_s1 = smul.f32 %s1881_s7, %s1740_s19 }
  0x58   :  { %s1889_s4 = sld [smem:[#allocation5 + $0x81]] }
  0x59   :  { %s1895_s25 = sld [smem:[#allocation5 + $0x80]] }
  0x5a   :  { %s1901_s2 = sld [smem:[#allocation9 + $0x84]] }
  0x5b   :  { %3296 = sst [smem:[#allocation34_spill]] %s1885_s6 }
  0x5c   :  { %3292 = sst [smem:[#allocation30_spill]] %s1869_s15 }
  0x5d   :  { %s1905_s27 = sld [smem:[#allocation9 + $0x104]] }
  0x5e   :  { %3297 = sst [smem:[#allocation35_spill]] %s1889_s4  ;;  %s203_s20 = smul.f32 %s1889_s4, %s1756_s22 }
  0x5f   :  { %3298 = sst [smem:[#allocation36_spill]] %s1895_s25  ;;  %s204_s7 = smul.f32 %s1895_s25, %s1758_s23 }
  0x60   :  { %3299 = sst [smem:[#allocation37_spill]] %s1901_s2  ;;  %s214_s6 = smul.f32 %s1889_s4, %s1773_s26 }
  0x61   :  { %s1909_s21 = sld [smem:[#allocation9 + $0x184]]  ;;  %s215_s22 = smul.f32 %s1895_s25, %s1781_s29 }
  0x62   :  { %s1913_s3 = sld [smem:[#allocation9 + $0x83]]  ;;  %s3313_s23 = smov %s1843_s16 }
  0x63   :  { %3300 = sst [smem:[#allocation38_spill]] %s1905_s27  ;;  %s3315_s27 = smul.f32 %s1841_s14, %s1738_s0 }
  0x64   :  { %s1917_s18 = sld [smem:[#allocation7 + $0x2]] }
  0x65   :  { %s1919_s8 = sld [smem:[#allocation9 + $0x103]]  ;;  %v303_v50 = vstv %s3315_s27  ;;  %s3325_s27 = smul.f32 %s1837_s11, %s1738_s0 }
  0x66   :  { %s1923_s24 = sld [smem:[#allocation7 + $0x82]]  ;;  %v1988_v53 = vmul.f32 %v303_v50, %v1687_v2  ;;  %v1996_v55 = vmul.f32 %v303_v50, %v1678_v0 }
  0x67   :  { %3301 = sst [smem:[#allocation39_spill]] %s1909_s21  ;;  %v298_v51 = vstv %s3325_s27 }
  0x68   :  { %3302 = sst [smem:[#allocation40_spill]] %s1913_s3 }
  0x69   :  { %s1927_s9 = sld [smem:[#allocation9 + $0x183]] }
  0x6a   :  { %3303 = sst [smem:[#allocation41_spill]] %s1917_s18  ;;  %s129_s25 = smul.f32 %s1917_s18, %s1740_s19 }
  0x6b   :  { %3304 = sst [smem:[#allocation42_spill]] %s1919_s8  ;;  %s146_s2 = smul.f32 %s1919_s8, %s1738_s0 }
  0x6c   :  { %3305 = sst [smem:[#allocation43_spill]] %s1923_s24 }
  0x6d   :  { %s1931_s17 = sadd.f32 %s204_s7, %s203_s20  ;;  %s148_s20 = smul.f32 %s1923_s24, %s1740_s19 }
  0x6e   :  { %s1937_s21 = sld [smem:[#allocation7 + $0x102]]  ;;  %s3321_s7 = smul.f32 %s1869_s15, %s1738_s0 }
  0x6f   :  { %3306 = sst [smem:[#allocation44_spill]] %s1927_s9  ;;  %s165_s14 = smul.f32 %s1927_s9, %s1738_s0 }
  0x70   :  { %3307 = sst [smem:[#allocation45_spill]] %s1931_s17  ;;  %s127_s17 = smul.f32 %s1913_s3, %s1738_s0 }
  0x71   :  { %s1941_s13 = sadd.f32 %s215_s22, %s214_s6  ;;  %s3316_s6 = smul.f32 %s1859_s30, %s1738_s0 }
  0x72   :  { %s1943_s26 = sld [smem:[#allocation9 + $0x204]]  ;;  %s3317_s22 = smul.f32 %s1865_s10, %s1740_s19 }
  0x73   :  { %3309 = sst [smem:[#allocation47_spill]] %s1941_s13  ;;  %s3322_s3 = smul.f32 %s1873_s12, %s1740_s19 }
  0x74   :  { %3308 = sst [smem:[#allocation46_spill]] %s1937_s21  ;;  %s3326_s30 = smul.f32 %s1877_s28, %s1738_s0 }
  0x75   :  { %s3312_s29 = sld [smem:[#allocation20_spill]]  ;;  %s167_s24 = smul.f32 %s1937_s21, %s1740_s19 }
  0x76   :  { %s1955_s16 = sld [smem:[#allocation9 + $0x203]] }
  0x77   :  { %s3318_s13 = sld [smem:[#allocation39_spill]] }
  0x78   :  { %3310 = sst [smem:[#allocation48_spill]] %s1943_s26 }
  0x79   :  { %s120_s26 = sadd.f32 %s3317_s22, %s3316_s6 }
  0x7a   :  { %s3319_s4 = sld [smem:[#allocation23_spill]] }
  0x7b   :  { %s3320_s5 = sld [smem:[#allocation24_spill]]  ;;  %s3329_s15 = smul.f32 %s1738_s0, %s3312_s29  ;;  %v2031_v63 = vstv %s120_s26 }
  0x7c   :  { %3314 = sst [smem:[#allocation20_spill]] %s1955_s16  ;;  %s3376_s26 = smov 1  }
  0x7d   :  { %s139_s18 = sadd.f32 %s3322_s3, %s3321_s7  ;;  %v295_v52 = vstv %s3329_s15  ;;  %s3330_s3 = smul.f32 %s3313_s23, %s1738_s0 }
  0x7e   :  { %s3323_s8 = sld [smem:[#allocation25_spill]]  ;;  %s170_s27 = smul.f32 %s3318_s13, %s1738_s0 }
  0x7f   :  { %s3324_s16 = sld [smem:[#allocation26_spill]]  ;;  %v1993_v54 = vstv %s3330_s3  ;;  %v2033_v0 = vstv %s139_s18 }
  0x80   :  { %s3327_s10 = sld [smem:[#allocation48_spill]]  ;;  %v2054_v13 = vstv %s170_s27 }
  0x81   :  { %s158_s6 = sadd.f32 %s157_s1, %s3326_s30  ;;  %s3333_s30 = smul.f32 %s3319_s4, %s1738_s0 }
  0x82   :  { %s3328_s22 = sld [smem:[#allocation27_spill]]  ;;  %s3334_s15 = smul.f32 %s3320_s5, %s1738_s0 }
  0x83   :  { %s3331_s7 = sld [smem:[#allocation34_spill]]  ;;  %v2005_v56 = vstv %s3333_s30  ;;  %v2040_v2 = vstv %s158_s6 }
  0x84   :  { %s3332_s9 = sld [smem:[#allocation37_spill]]  ;;  %v2010_v57 = vstv %s3334_s15  ;;  %s3335_s21 = smul.f32 %s3323_s8, %s1738_s0 }
  0x85   :  { %s2000_s1 = sld [smem:[#allocation5 + $0x2]]  ;;  %s3336_s28 = smul.f32 %s3324_s16, %s1738_s0 }
  0x86   :  { %v2015_v58 = vstv %s3335_s21  ;;  %s3337_s3 = sld [smem:[#allocation38_spill]]  ;;  %s180_s12 = smul.f32 %s3327_s10, %s1738_s0 }
  0x87   :  { %v2020_v59 = vstv %s3336_s28  ;;  %s3338_s13 = sld [smem:[#allocation20_spill]] }
  0x88   :  { %s130_s23 = sadd.f32 %s129_s25, %s127_s17  ;;  %s3339_s30 = smul.f32 %s3328_s22, %s1738_s0  ;;  %v2072_v16 = vstv %s180_s12 }
  0x89   :  { %s3340_s21 = smul.f32 %s3331_s7, %s1738_s0  ;;  %s149_s28 = sadd.f32 %s148_s20, %s146_s2 }
  0x8a   :  { %v2029_v62 = vstv %s3339_s30  ;;  %s3341_s15 = smul.f32 %s3332_s9, %s1738_s0  ;;  %s168_s17 = sadd.f32 %s167_s24, %s165_s14  ;;  %v2080_v26 = vstv %s130_s23 }
  0x8b   :  { %v2038_v1 = vstv %s3340_s21  ;;  %s3343_s21 = sld [smem:[#allocation56_spill]]  ;;  %v2083_v28 = vstv %s149_s28  ;;  %v2095_v36 = vstv %s2000_s1  ;;  %s3377_s30 = smov 127  }
  0x8c   :  { %v2045_v3 = vstv %s3341_s15  ;;  %s3342_s25 = smul.f32 %s3337_s3, %s1738_s0  ;;  %s3345_s10 = sld [smem:[#allocation57_spill]]  ;;  %v2085_v30 = vstv %s168_s17  ;;  %3347 = vst [vmem:[#allocation49_spill] sm:$0xff] %v2095_v36 }
  0x8d   :  { %s178_s18 = smul.f32 %s3338_s13, %s1738_s0  ;;  %s2461_s12 = sld [smem:[#allocation5 + $0x3]] }
  0x8e   :  { %v2052_v10 = vstv %s3342_s25  ;;  %s3366_s14 = sld [smem:[#allocation15_spill]] }
  0x8f   :  { %v2091_v34 = vstv %s178_s18  ;;  %s3367_s24 = sld [smem:[#allocation36_spill]]  ;;  %s3375_s18 = smov 2  }
  0x90   :  { %s3369_s23 = sld [smem:[#allocation18_spill]] }
  0x91   :  { %s3344_s2 = smul.f32 %s1740_s19, %s3343_s21  ;;  %s3364_s19 = sld [smem:[#allocation35_spill]] }
  0x92   :  { %s3346_s15 = smul.f32 %s1738_s0, %s3345_s10  ;;  %s3363_s0 = sld [smem:[#allocation14_spill]] }
  0x93   :  { %s3370_s27 = sld [smem:[#allocation45_spill]] }
  0x94   :  { %s2068_s9 = sadd.f32 %s3346_s15, %s3344_s2  ;;  %s3379_s2 = smov 126  }
  0x95   :  { %s3371_s1 = sld [smem:[#allocation47_spill]]  ;;  %s193_s28 = smul.f32 %s3367_s24, %s3366_s14 }
  0x96   :  { %s3381_s20 = sld [smem:[#allocation21_spill]] }
  0x97   :  { %s223_s25 = smul.f32 %s3364_s19, %s3369_s23  ;;  %s3383_s6 = sld [smem:[#allocation22_spill]] }
  0x98   :  { %s3386_s15 = sld [smem:[#allocation28_spill]]  ;;  %s210_s10 = smul.f32 %s3364_s19, %s3324_s16 }
  0x99   :  { %s3389_s14 = sld [smem:[#allocation31_spill]]  ;;  %s221_s21 = smul.f32 %s3364_s19, %s3328_s22 }
  0x9a   :  { %s3390_s23 = sld [smem:[#allocation32_spill]]  ;;  %s222_s16 = smul.f32 %s3364_s19, %s3331_s7 }
  0x9b   :  { %s3395_s22 = sld [smem:[#allocation41_spill]] }
  0x9c   :  { %v2024_v60 = vpop.permute.xlu1 %253  ;;  %v248_v61 = vpop.permute.xlu0 %247  ;;  %s3396_s13 = sld [smem:[#allocation48_spill]] }
  0x9d   :  { %v299_v20 = vmul.f32 %v298_v51, %v2024_v60  ;;  %v296_v23 = vmul.f32 %v295_v52, %v248_v61  ;;  %v319_v49 = vmul.f32 %v2010_v57, %v248_v61  ;;  %v400_v50 = vmul.f32 %v2015_v58, %v248_v61 }
  0x9e   :  { %v336_v19 = vmul.f32 %v2031_v63, %v2024_v60  ;;  %v417_v17 = vmul.f32 %v2033_v0, %v2024_v60  ;;  %v498_v36 = vmul.f32 %v2040_v2, %v2024_v60 }
  0x9f   :  { %v301_v44 = vadd.f32 %v299_v20, %v296_v23  ;;  %v481_v20 = vmul.f32 %v2020_v59, %v248_v61  ;;  %v326_v6 = vrot.slane %v319_v49, 1 }
  0xa0   :  { %v2078_v24 = vpop.permute.xlu1 %255  ;;  %v250_v25 = vpop.permute.xlu0 %249 }
  0xa1   :  { %v300_v38 = vmul.f32 %v298_v51, %v2078_v24  ;;  %v297_v41 = vmul.f32 %v295_v52, %v250_v25  ;;  %v2118_v51 = vsel %vm406_vm12, %v705_v14, %v3247_v27  ;;  %v320_v52 = vmul.f32 %v2010_v57, %v250_v25 }
  0xa2   :  { %3351 = vst [vmem:[#allocation53_spill] sm:$0xff] %v2118_v51  ;;  %v2122_v5 = vmul.f32 %v2015_v58, %v250_v25  ;;  %v2125_v4 = vmul.f32 %v2020_v59, %v250_v25  ;;  %v2134_v23 = vmul.f32 %v2029_v62, %v250_v25  ;;  %v337_v14 = vmul.f32 %v2031_v63, %v2078_v24 }
  0xa3   :  { %v302_v35 = vadd.f32 %v300_v38, %v297_v41  ;;  %v562_v27 = vmul.f32 %v2029_v62, %v248_v61  ;;  %v306_v33 = vadd.f32 %v1996_v55, %v301_v44  ;;  %v407_v25 = vrot.slane %v400_v50, 2 }
  0xa4   :  { %v2109_v45 = vpop.permute.xlu1 %261  ;;  %v2111_v46 = vpop.permute.xlu0 %259  ;;  %v327_v61 = vrot.slane %v320_v52, 1  ;;  %v408_v41 = vrot.slane %v2122_v5, 2  ;;  %v489_v51 = vrot.slane %v2125_v4, 3  ;;  %v570_v55 = vrot.slane %v2134_v23, 4 }
  0xa5   :  { %v309_v18 = vmul.f32 %v1993_v54, %v2111_v46  ;;  %v343_v44 = vrot.slane %v337_v14, 1  ;;  %v307_v49 = vadd.f32 %v1988_v53, %v302_v35  ;;  %v310_v50 = vmul.f32 %v1993_v54, %v2109_v45 }
  0xa6   :  { %v488_v43 = vrot.slane %v481_v20, 3  ;;  %v2159_v37 = vmul.f32 %v2033_v0, %v2078_v24  ;;  %v569_v5 = vrot.slane %v562_v27, 4  ;;  %v342_v4 = vrot.slane %v336_v19, 1 }
  0xa7   :  { %v311_v15 = vadd.f32 %v309_v18, %v306_v33  ;;  %v423_v18 = vrot.slane %v417_v17, 2  ;;  %v2165_v23 = vsel %vm406_vm12, %v407_v25, %v408_v41  ;;  %v499_v54 = vmul.f32 %v2040_v2, %v2078_v24 }
  0xa8   :  { %v2144_v11 = vpop.permute.xlu1 %265  ;;  %v252_v7 = vpop.permute.xlu0 %251  ;;  %v2168_v53 = vsel %vm487_vm13, %v488_v43, %v489_v51  ;;  %v344_v27 = vsel %vm325_vm11, %v342_v4, %v343_v44  ;;  %v312_v20 = vadd.f32 %v310_v50, %v307_v49  ;;  %v424_v14 = vrot.slane %v2159_v37, 2 }
  0xa9   :  { %v314_v38 = vmul.f32 %v2005_v56, %v2144_v11  ;;  %v321_v42 = vmul.f32 %v2010_v57, %v252_v7  ;;  %v328_v57 = vsel %vm325_vm11, %v326_v6, %v327_v61  ;;  %v402_v6 = vmul.f32 %v2015_v58, %v252_v7 }
  0xaa   :  { %v483_v25 = vmul.f32 %v2020_v59, %v252_v7  ;;  %v505_v48 = vrot.slane %v499_v54, 3  ;;  %v580_v37 = vmul.f32 %v2038_v1, %v2078_v24  ;;  %v368_v59 = vmul.f32 %v2080_v26, %v2111_v46 }
  0xab   :  { %v316_v52 = vadd.f32 %v314_v38, %v311_v15  ;;  %v329_v35 = vrot.slane %v321_v42, 1  ;;  %v2173_v15 = vsel %vm568_vm14, %v569_v5, %v570_v55  ;;  %v564_v42 = vmul.f32 %v2029_v62, %v252_v7 }
  0xac   :  { %v258_v12 = vpop.permute.xlu1 %257  ;;  %v2161_v33 = vpop.permute.xlu0 %267  ;;  %v504_v5 = vrot.slane %v498_v36, 3  ;;  %v410_v7 = vrot.slane %v402_v6, 2 }
  0xad   :  { %v338_v19 = vmul.f32 %v2031_v63, %v258_v12  ;;  %v315_v43 = vmul.f32 %v2005_v56, %v2161_v33  ;;  %v333_v17 = vadd.f32 %v328_v57, %v316_v52  ;;  %v579_v63 = vmul.f32 %v2038_v1, %v2024_v60 }
  0xae   :  { %v330_v49 = vsel %vm325_vm11, %v327_v61, %v329_v35  ;;  %v419_v62 = vmul.f32 %v2033_v0, %v258_v12  ;;  %v500_v36 = vmul.f32 %v2040_v2, %v258_v12  ;;  %v491_v60 = vrot.slane %v483_v25, 3 }
  0xaf   :  { %v345_v38 = vrot.slane %v338_v19, 1  ;;  %v317_v4 = vadd.f32 %v315_v43, %v312_v20  ;;  %v572_v52 = vrot.slane %v564_v42, 4  ;;  %v349_v57 = vadd.f32 %v344_v27, %v333_v17 }
  0xb0   :  { %v2189_v56 = vpop.permute.xlu1 %269  ;;  %v581_v61 = vmul.f32 %v2038_v1, %v258_v12  ;;  %v385_v54 = vmul.f32 %v2045_v3, %v2161_v33  ;;  %v2204_v0 = vsel %vm487_vm13, %v504_v5, %v505_v48  ;;  %v585_v2 = vrot.slane %v579_v63, 4  ;;  %v2211_v6 = vpop.permute.xlu0 %263 }
  0xb1   :  { %v346_v58 = vsel %vm325_vm11, %v343_v44, %v345_v38  ;;  %v334_v50 = vadd.f32 %v330_v49, %v317_v4  ;;  %v2197_v44 = vsel %vm406_vm12, %v423_v18, %v424_v14  ;;  %v386_v35 = vmul.f32 %v2045_v3, %v2189_v56 }
  0xb2   :  { %v586_v19 = vrot.slane %v580_v37, 4  ;;  %v384_v27 = vmul.f32 %v2045_v3, %v2144_v11  ;;  %v411_v12 = vsel %vm406_vm12, %v408_v41, %v410_v7  ;;  %v426_v1 = vrot.slane %v419_v62, 2 }
  0xb3   :  { %v350_v24 = vadd.f32 %v346_v58, %v334_v50  ;;  %v507_v18 = vrot.slane %v500_v36, 3  ;;  %v465_v20 = vmul.f32 %v2052_v10, %v2144_v11  ;;  %v2214_v43 = vsel %vm487_vm13, %v489_v51, %v491_v60 }
  0xb4   :  { %v2217_v17 = vsel %vm568_vm14, %v570_v55, %v572_v52  ;;  %v588_v25 = vrot.slane %v581_v61, 4  ;;  %v365_v42 = vadd.f32 %v1799_v21, %v349_v57  ;;  %v391_v38 = vrot.slane %v385_v54, 1  ;;  %v2241_v36 = vpop.permute.xlu1 %273  ;;  %v2246_v50 = vpop.permute.xlu0 %271 }
  0xb5   :  { %v393_v3 = vrot.slane %v386_v35, 1  ;;  %v466_v41 = vmul.f32 %v2052_v10, %v2161_v33  ;;  %v366_v5 = vadd.f32 %v1802_v22, %v350_v24  ;;  %v467_v63 = vmul.f32 %v2052_v10, %v2189_v56 }
  0xb6   :  { %v369_v51 = vmul.f32 %v2080_v26, %v2109_v45  ;;  %v370_v55 = vmul.f32 %v2080_v26, %v2211_v6  ;;  %v374_v4 = vrot.slane %v368_v59, 1  ;;  %v427_v49 = vsel %vm406_vm12, %v424_v14, %v426_v1 }
  0xb7   :  { %v2231_v21 = vsel %vm487_vm13, %v505_v48, %v507_v18  ;;  %v2234_v58 = vsel %vm568_vm14, %v585_v2, %v586_v19  ;;  %v390_v37 = vrot.slane %v384_v27, 1  ;;  %v2237_v22 = vsel %vm568_vm14, %v586_v19, %v588_v25 }
  0xb8   :  { %v546_v10 = vmul.f32 %v2054_v13, %v2144_v11  ;;  %v375_v7 = vrot.slane %v369_v51, 1  ;;  %v377_v62 = vrot.slane %v370_v55, 1  ;;  %v471_v14 = vrot.slane %v465_v20, 2  ;;  %v2281_v55 = vpop.permute.xlu0 %277 }
  0xb9   :  { %v392_v26 = vsel %vm325_vm11, %v390_v37, %v391_v38  ;;  %v472_v59 = vrot.slane %v466_v41, 2  ;;  %v547_v48 = vmul.f32 %v2054_v13, %v2161_v33  ;;  %v394_v60 = vsel %vm325_vm11, %v391_v38, %v393_v3 }
  0xba   :  { %v474_v52 = vrot.slane %v467_v63, 2  ;;  %v376_v57 = vsel %vm325_vm11, %v374_v4, %v375_v7  ;;  %v378_v61 = vsel %vm325_vm11, %v375_v7, %v377_v62  ;;  %v548_v24 = vmul.f32 %v2054_v13, %v2189_v56 }
  0xbb   :  { %v381_v54 = vadd.f32 %v376_v57, %v365_v42  ;;  %v382_v35 = vadd.f32 %v378_v61, %v366_v5  ;;  %v449_v2 = vmul.f32 %v2083_v28, %v2111_v46  ;;  %v552_v19 = vrot.slane %v546_v10, 3  ;;  %v2274_v5 = vpop.permute.xlu1 %279 }
  0xbc   :  { %v2257_v27 = vmul.f32 %v2072_v16, %v2144_v11  ;;  %v450_v1 = vmul.f32 %v2083_v28, %v2109_v45  ;;  %v451_v18 = vmul.f32 %v2083_v28, %v2211_v6  ;;  %v473_v20 = vsel %vm406_vm12, %v471_v14, %v472_v59 }
  0xbd   :  { %v553_v25 = vrot.slane %v547_v48, 3  ;;  %v397_v13 = vadd.f32 %v392_v26, %v381_v54  ;;  %v398_v42 = vadd.f32 %v394_v60, %v382_v35  ;;  %v2266_v38 = vmul.f32 %v2072_v16, %v2161_v33 }
  0xbe   :  { %v530_v3 = vmul.f32 %v2085_v30, %v2111_v46  ;;  %v531_v11 = vmul.f32 %v2085_v30, %v2109_v45  ;;  %v532_v41 = vmul.f32 %v2085_v30, %v2211_v6  ;;  %v2278_v28 = vmul.f32 %v2072_v16, %v2189_v56 }
  0xbf   :  { %v414_v63 = vadd.f32 %v2165_v23, %v397_v13  ;;  %v415_v51 = vadd.f32 %v411_v12, %v398_v42  ;;  %v455_v33 = vrot.slane %v449_v2, 2  ;;  %v456_v4 = vrot.slane %v450_v1, 2  ;;  %v2297_v57 = vpop.permute.xlu1 %285 }
  0xc0   :  { %v458_v37 = vrot.slane %v451_v18, 2  ;;  %v611_v10 = vmul.f32 %v2091_v34, %v2111_v46  ;;  %v612_v30 = vmul.f32 %v2091_v34, %v2109_v45  ;;  %v475_v7 = vsel %vm406_vm12, %v472_v59, %v474_v52 }
  0xc1   :  { %v555_v62 = vrot.slane %v548_v24, 3  ;;  %v430_v16 = vadd.f32 %v2197_v44, %v414_v63  ;;  %v431_v56 = vadd.f32 %v427_v49, %v415_v51  ;;  %v633_v23 = vrot.slane %v2257_v27, 4 }
  0xc2   :  { %v536_v12 = vrot.slane %v530_v3, 3  ;;  %v537_v26 = vrot.slane %v531_v11, 3  ;;  %v539_v14 = vrot.slane %v532_v41, 3  ;;  %v554_v48 = vsel %vm487_vm13, %v552_v19, %v553_v25 }
  0xc3   :  { %v446_v60 = vadd.f32 %v1812_v29, %v430_v16  ;;  %v447_v46 = vadd.f32 %v1815_v31, %v431_v56  ;;  %v613_v45 = vmul.f32 %v2091_v34, %v2211_v6  ;;  %v457_v59 = vsel %vm406_vm12, %v455_v33, %v456_v4  ;;  %v2301_v29 = vpop.permute.xlu0 %283 }
  0xc4   :  { %v459_v52 = vsel %vm406_vm12, %v456_v4, %v458_v37  ;;  %v617_v44 = vrot.slane %v611_v10, 4  ;;  %v618_v49 = vrot.slane %v612_v30, 4  ;;  %v634_v61 = vrot.slane %v2266_v38, 4  ;;  %v2325_v30 = vpop.permute.xlu1 %289 }
  0xc5   :  { %v636_v24 = vrot.slane %v2278_v28, 4  ;;  %v462_v54 = vadd.f32 %v457_v59, %v446_v60  ;;  %v463_v35 = vadd.f32 %v459_v52, %v447_v46  ;;  %v556_v31 = vsel %vm487_vm13, %v553_v25, %v555_v62 }
  0xc6   :  { %v538_v34 = vsel %vm487_vm13, %v536_v12, %v537_v26  ;;  %v540_v6 = vsel %vm487_vm13, %v537_v26, %v539_v14  ;;  %v738_v2 = vrot.slane %v2241_v36, 1  ;;  %v620_v18 = vrot.slane %v613_v45, 4 }
  0xc7   :  { %v478_v19 = vadd.f32 %v473_v20, %v462_v54  ;;  %v479_v1 = vadd.f32 %v475_v7, %v463_v35  ;;  %v759_v13 = vrot.slane %v2241_v36, 2  ;;  %v2309_v42 = vsel %vm568_vm14, %v617_v44, %v618_v49  ;;  %v2331_v16 = vpop.permute.xlu0 %275 }
  0xc8   :  { %v777_v3 = vrot.slane %v2241_v36, 3  ;;  %v795_v11 = vrot.slane %v2241_v36, 4  ;;  %v726_v25 = vmax.f32 %v2246_v50, %v2281_v55  ;;  %v737_v20 = vrot.slane %v2246_v50, 1 }
  0xc9   :  { %v495_v41 = vadd.f32 %v2168_v53, %v478_v19  ;;  %v496_v63 = vadd.f32 %v2214_v43, %v479_v1  ;;  %v758_v51 = vrot.slane %v2246_v50, 2  ;;  %v776_v33 = vrot.slane %v2246_v50, 3  ;;  %v2369_v1 = vpop.permute.xlu1 %293 }
  0xca   :  { %v794_v4 = vrot.slane %v2246_v50, 4  ;;  %v727_v37 = vmax.f32 %v2241_v36, %v2274_v5  ;;  %v645_v10 = vmax.f32 %v2281_v55, %v1732_v9  ;;  %v655_v7 = vrot.slane %v2274_v5, 1 }
  0xcb   :  { %v511_v53 = vadd.f32 %v2204_v0, %v495_v41  ;;  %v512_v43 = vadd.f32 %v2231_v21, %v496_v63  ;;  %v654_v62 = vrot.slane %v2281_v55, 1  ;;  %v2334_v50 = vsel %vm568_vm14, %v618_v49, %v620_v18 }
  0xcc   :  { %v646_v56 = vmax.f32 %v2274_v5, %v1727_v8  ;;  %v728_v12 = vmax.f32 %v726_v25, %v1732_v9  ;;  %v648_v26 = vmax.f32 %v645_v10, %v2301_v29  ;;  %v2345_v14 = vsel %vm406_vm12, %v758_v51, %v759_v13  ;;  %v2373_v25 = vpop.permute.xlu0 %291 }
  0xcd   :  { %v527_v0 = vadd.f32 %v1823_v39, %v511_v53  ;;  %v528_v21 = vadd.f32 %v1826_v40, %v512_v43  ;;  %v694_v60 = vrot.slane %v2274_v5, 2  ;;  %v2351_v46 = vsel %vm487_vm13, %v776_v33, %v777_v3 }
  0xce   :  { %v2356_v9 = vsel %vm568_vm14, %v794_v4, %v795_v11  ;;  %v693_v39 = vrot.slane %v2281_v55, 2  ;;  %v729_v40 = vmax.f32 %v727_v37, %v1727_v8  ;;  %v804_v52 = vrot.slane %v2274_v5, 4 }
  0xcf   :  { %v543_v45 = vadd.f32 %v538_v34, %v527_v0  ;;  %v544_v59 = vadd.f32 %v540_v6, %v528_v21  ;;  %v656_v44 = vsel %vm325_vm11, %v654_v62, %v655_v7  ;;  %v803_v49 = vrot.slane %v2281_v55, 4  ;;  %v3353_v21 = vld [vmem:[#allocation19_spill] sm:$0xff] }
  0xd0   :  { %v2366_v54 = vmax.f32 %v646_v56, %v2297_v57  ;;  %v662_v35 = vmax.f32 %v648_v26, %v656_v44  ;;  %v730_v19 = vmax.f32 %v728_v12, %v2301_v29  ;;  %v683_v34 = vrot.slane %v2297_v57, 1 }
  0xd1   :  { %v559_v18 = vadd.f32 %v554_v48, %v543_v45  ;;  %v560_v8 = vadd.f32 %v556_v31, %v544_v59  ;;  %v740_v6 = vrot.slane %v2331_v16, 1  ;;  %v695_v55 = vsel %vm406_vm12, %v693_v39, %v694_v60 }
  0xd2   :  { %v731_v41 = vmax.f32 %v729_v40, %v2297_v57  ;;  %v682_v63 = vrot.slane %v2301_v29, 1  ;;  %v732_v51 = vmax.f32 %v730_v19, %v2325_v30  ;;  %v739_v31 = vsel %vm325_vm11, %v737_v20, %v738_v2 }
  0xd3   :  { %v576_v33 = vadd.f32 %v2173_v15, %v559_v18  ;;  %v577_v48 = vadd.f32 %v2217_v17, %v560_v8  ;;  %v752_v4 = vrot.slane %v2369_v1, 1  ;;  %v676_v37 = vmax.f32 %v662_v35, %v2088_v32 }
  0xd4   :  { %v749_v10 = vrot.slane %v2325_v30, 1  ;;  %v761_v53 = vrot.slane %v2331_v16, 2  ;;  %v733_v43 = vmax.f32 %v731_v41, %v2373_v25  ;;  %v741_v17 = vsel %vm325_vm11, %v738_v2, %v740_v6  ;;  %v282_v41 = vpop.permute.xlu0 %281 }
  0xd5   :  { %v592_v62 = vadd.f32 %v2234_v58, %v576_v33  ;;  %v593_v15 = vadd.f32 %v2237_v22, %v577_v48  ;;  %v750_v20 = vrot.slane %v2373_v25, 1  ;;  %v744_v56 = vmax.f32 %v732_v51, %v739_v31 }
  0xd6   :  { %v770_v12 = vrot.slane %v2369_v1, 2  ;;  %v745_v32 = vmax.f32 %v733_v43, %v741_v17  ;;  %v768_v26 = vrot.slane %v2373_v25, 2  ;;  %v805_v2 = vsel %vm568_vm14, %v803_v49, %v804_v52  ;;  %v3354_v43 = vld [vmem:[#allocation17_spill] sm:$0xff] }
  0xd7   :  { %v2400_v0 = vadd.f32 %v1832_v47, %v592_v62  ;;  %v2403_v39 = vadd.f32 %v3353_v21, %v593_v15  ;;  %v751_v58 = vsel %vm325_vm11, %v749_v10, %v750_v20  ;;  %v753_v22 = vsel %vm325_vm11, %v750_v20, %v752_v4 }
  0xd8   :  { %v716_v40 = vrot.slane %v2297_v57, 2  ;;  %v756_v45 = vmax.f32 %v744_v56, %v751_v58  ;;  %v757_v59 = vmax.f32 %v745_v32, %v753_v22  ;;  %v684_v47 = vsel %vm325_vm11, %v682_v63, %v683_v34  ;;  %v288_v56 = vpop.permute.xlu1 %287 }
  0xd9   :  { %v767_v44 = vrot.slane %v2325_v30, 2  ;;  %v762_v35 = vsel %vm406_vm12, %v759_v13, %v761_v53  ;;  %v779_v19 = vrot.slane %v2331_v16, 3  ;;  %v690_v18 = vmax.f32 %v676_v37, %v684_v47  ;;  %v3355_v47 = vld [vmem:[#allocation50_spill] sm:$0xff] }
  0xda   :  { %v715_v8 = vrot.slane %v2301_v29, 2  ;;  %v765_v49 = vmax.f32 %v756_v45, %v2345_v14  ;;  %v766_v6 = vmax.f32 %v757_v59, %v762_v35  ;;  %v788_v51 = vrot.slane %v2369_v1, 3 }
  0xdb   :  { %v769_v33 = vsel %vm406_vm12, %v767_v44, %v768_v26  ;;  %v771_v63 = vsel %vm406_vm12, %v768_v26, %v770_v12  ;;  %v786_v48 = vrot.slane %v2373_v25, 3  ;;  %v822_v31 = vrot.slane %v2297_v57, 4 }
  0xdc   :  { %v821_v13 = vrot.slane %v2301_v29, 4  ;;  %v774_v4 = vmax.f32 %v765_v49, %v769_v33  ;;  %v775_v37 = vmax.f32 %v766_v6, %v771_v63  ;;  %v785_v10 = vrot.slane %v2325_v30, 3  ;;  %v3357_v33 = vld [vmem:[#allocation52_spill] sm:$0xff] }
  0xdd   :  { %v780_v14 = vsel %vm487_vm13, %v777_v3, %v779_v19  ;;  %v797_v53 = vrot.slane %v2331_v16, 4  ;;  %v647_v62 = vmax.f32 %v282_v41, %v3354_v43  ;;  %v701_v15 = vmax.f32 %v690_v18, %v695_v55 }
  0xde   :  { %v717_v17 = vsel %vm406_vm12, %v715_v8, %v716_v40  ;;  %v783_v20 = vmax.f32 %v774_v4, %v2351_v46  ;;  %v784_v29 = vmax.f32 %v775_v37, %v780_v14  ;;  %v787_v12 = vsel %vm487_vm13, %v785_v10, %v786_v48  ;;  %v3358_v37 = vld [vmem:[#allocation51_spill] sm:$0xff] }
  0xdf   :  { %v789_v32 = vsel %vm487_vm13, %v786_v48, %v788_v51  ;;  %v650_v26 = vmax.f32 %v647_v62, %v288_v56  ;;  %v657_v21 = vrot.slane %v282_v41, 1  ;;  %v823_v3 = vsel %vm568_vm14, %v821_v13, %v822_v31 }
  0xe0   :  { %v792_v16 = vmax.f32 %v783_v20, %v787_v12  ;;  %v793_v58 = vmax.f32 %v784_v29, %v789_v32  ;;  %v806_v22 = vrot.slane %v282_v41, 4  ;;  %v798_v55 = vsel %vm568_vm14, %v795_v11, %v797_v53 }
  0xe1   :  { %v685_v45 = vrot.slane %v288_v56, 1  ;;  %v658_v46 = vsel %vm325_vm11, %v655_v7, %v657_v21  ;;  %v664_v59 = vmax.f32 %v650_v26, %v657_v21  ;;  %v712_v44 = vmax.f32 %v701_v15, %v3355_v47 }
  0xe2   :  { %v801_v35 = vmax.f32 %v792_v16, %v2356_v9  ;;  %v802_v19 = vmax.f32 %v793_v58, %v798_v55  ;;  %v663_v18 = vmax.f32 %v2366_v54, %v658_v46  ;;  %v824_v8 = vrot.slane %v288_v56, 4 }
  0xe3   :  { %v3356_v49 = vrot.slane %v3354_v43, 1  ;;  %v696_v36 = vrot.slane %v282_v41, 2  ;;  %v807_v11 = vsel %vm568_vm14, %v804_v52, %v806_v22  ;;  %v830_v51 = vrot.slane %v2325_v30, 4  ;;  %v3359_v30 = vld [vmem:[#allocation54_spill] sm:$0xff] }
  0xe4   :  { %v810_v7 = vmax.f32 %v801_v35, %v805_v2  ;;  %v677_v63 = vmax.f32 %v663_v18, %v3357_v33  ;;  %v811_v48 = vmax.f32 %v802_v19, %v807_v11  ;;  %v833_v9 = vrot.slane %v2369_v1, 4 }
  0xe5   :  { %v678_v6 = vmax.f32 %v664_v59, %v3356_v49  ;;  %v831_v13 = vrot.slane %v2373_v25, 4  ;;  %v686_v54 = vsel %vm325_vm11, %v683_v34, %v685_v45  ;;  %v723_v4 = vmax.f32 %v712_v44, %v717_v17 }
  0xe6   :  { %v819_v52 = vmax.f32 %v810_v7, %v3358_v37  ;;  %v691_v10 = vmax.f32 %v677_v63, %v686_v54  ;;  %v820_v2 = vmax.f32 %v811_v48, %v3359_v30  ;;  %v718_v14 = vrot.slane %v288_v56, 2 }
  0xe7   :  { %v692_v41 = vmax.f32 %v678_v6, %v685_v45  ;;  %v825_v53 = vsel %vm568_vm14, %v822_v31, %v824_v8  ;;  %v697_v1 = vsel %vm406_vm12, %v694_v60, %v696_v36  ;;  %v624_v34 = vadd.f32 %v2309_v42, %v2400_v0  ;;  %v3361_v60 = vld [vmem:[#allocation53_spill] sm:$0xff] }
  0xe8   :  { %v828_v62 = vmax.f32 %v819_v52, %v823_v3  ;;  %v702_v15 = vmax.f32 %v691_v10, %v697_v1  ;;  %v829_v20 = vmax.f32 %v820_v2, %v825_v53  ;;  %v625_v17 = vadd.f32 %v2334_v50, %v2403_v39 }
  0xe9   :  { %v703_v25 = vmax.f32 %v692_v41, %v696_v36  ;;  %v832_v29 = vsel %vm568_vm14, %v830_v51, %v831_v13  ;;  %v834_v56 = vsel %vm568_vm14, %v831_v13, %v833_v9  ;;  %v3360_v31 = vrot.slane %v3354_v43, 2  ;;  %v3362_v43 = vld [vmem:[#allocation49_spill] sm:$0xff] }
  0xea   :  { %v837_v12 = vmax.f32 %v828_v62, %v832_v29  ;;  %v713_v32 = vmax.f32 %v702_v15, %v3361_v60  ;;  %v838_v26 = vmax.f32 %v829_v20, %v834_v56  ;;  %v635_v42 = vsel %vm568_vm14, %v633_v23, %v634_v61 }
  0xeb   :  { %v714_v5 = vmax.f32 %v703_v25, %v3360_v31  ;;  %v637_v50 = vsel %vm568_vm14, %v634_v61, %v636_v24  ;;  %v719_v0 = vsel %vm406_vm12, %v716_v40, %v718_v14  ;;  %v852_v21 = vmul.f32 %v3362_v43, %v723_v4 }
  0xec   :  { %v842_v3 = vrot.slane %v837_v12, 7  ;;  %v724_v16 = vmax.f32 %v713_v32, %v719_v0  ;;  %v843_v58 = vrot.slane %v838_v26, 7  ;;  %v640_v27 = vadd.f32 %v635_v42, %v624_v34 }
  0xed   :  { %v725_v39 = vmax.f32 %v714_v5, %v718_v14  ;;  %v641_v23 = vadd.f32 %v637_v50, %v625_v17  ;;  %v867_v22 = vstv %s2461_s12  ;;  %v858_v45 = vrot.slane %v852_v21, 1  ;;  %s3387_s12 = sld [smem:[#allocation29_spill]] }
  0xee   :  { %v848_v38 = vmax.f32 %v723_v4, %v842_v3  ;;  %v844_v61 = vsel %vm841_vm15, %v842_v3, %v843_v58  ;;  %v853_v57 = vmul.f32 %v3362_v43, %v724_v16  ;;  %v3365_v44 = vstv %s2068_s9  ;;  %s192_s9 = smul.f32 %s3364_s19, %s3363_s0  ;;  %s3388_s0 = sld [smem:[#allocation30_spill]] }
  0xef   :  { %v854_v28 = vmul.f32 %v3362_v43, %v725_v39  ;;  %v850_v24 = vmax.f32 %v725_v39, %v843_v58  ;;  %v849_v40 = vmax.f32 %v724_v16, %v844_v61  ;;  %v643_v35 = vadd.f32 %v3365_v44, %v640_v27 }
  0xf0   :  { %v859_v46 = vrot.slane %v853_v57, 1  ;;  %v868_v59 = vmul.f32 %v867_v22, %v848_v38  ;;  %v3368_v18 = vmov %v3365_v44  ;;  %s194_s17 = sadd.f32 %s193_s28, %s192_s9  ;;  %v1076_v52 = vstv %s3370_s27  ;;  %s182_s9 = smul.f32 %s3364_s19, %s3312_s29 }
  0xf1   :  { %v861_v55 = vrot.slane %v854_v28, 1  ;;  %v870_v47 = vmul.f32 %v867_v22, %v850_v24  ;;  %v869_v19 = vmul.f32 %v867_v22, %v849_v40  ;;  %v644_v8 = vadd.f32 %v3368_v18, %v641_v23  ;;  %s3391_s27 = sld [smem:[#allocation33_spill]]  ;;  %s183_s28 = smul.f32 %s3364_s19, %s1837_s11 }
  0xf2   :  { %v860_v49 = vsel %vm325_vm11, %v858_v45, %v859_v46  ;;  %v874_v11 = vrot.slane %v868_v59, 1  ;;  %v996_v37 = vstv %s194_s17  ;;  %v1156_v14 = vstv %s3371_s1  ;;  %s184_s1 = smul.f32 %s3364_s19, %s3381_s20  ;;  %s3394_s29 = sld [smem:[#allocation40_spill]] }
  0xf3   :  { %v862_v6 = vsel %vm325_vm11, %v859_v46, %v861_v55  ;;  %v877_v36 = vrot.slane %v870_v47, 1  ;;  %v875_v51 = vrot.slane %v869_v19, 1  ;;  %v865_v7 = vadd.f32 %v860_v49, %v643_v35  ;;  %s187_s17 = smul.f32 %s3364_s19, %s3320_s5 }
  0xf4   :  { %v866_v33 = vadd.f32 %v862_v6, %v644_v8  ;;  %v1236_v53 = vstv %s223_s25  ;;  %s3392_s25 = sld [smem:[#allocation37_spill]]  ;;  %s190_s20 = smul.f32 %s3367_s24, %s3387_s12  ;;  %v941_v47 = vstv %s182_s9  ;;  %v944_v44 = vstv %s183_s28 }
  0xf5   :  { %v876_v63 = vsel %vm325_vm11, %v874_v11, %v875_v51  ;;  %v878_v48 = vsel %vm325_vm11, %v875_v51, %v877_v36  ;;  %s200_s11 = smul.f32 %s3364_s19, %s3388_s0  ;;  %v949_v35 = vstv %s184_s1  ;;  %v2654_v19 = vstv %s187_s17  ;;  %s3399_s1 = sld [smem:[#allocation42_spill]] }
  0xf6   :  { %v2504_v9 = vadd.f32 %v876_v63, %v865_v7  ;;  %v2506_v13 = vadd.f32 %v878_v48, %v866_v33  ;;  %s201_s5 = smul.f32 %s3367_s24, %s3389_s14  ;;  %v2662_v49 = vstv %s210_s10  ;;  %v2664_v6 = vstv %s221_s21  ;;  %s3400_s10 = sld [smem:[#allocation43_spill]] }
  0xf7   :  { %s209_s12 = smul.f32 %s3364_s19, %s3337_s3  ;;  %s3401_s21 = sld [smem:[#allocation44_spill]] }
  0xf8   :  { %3372 = vst [vmem:[#allocation19_spill] sm:$0xff] %v2504_v9  ;;  %3373 = vst [vmem:[#allocation17_spill] sm:$0xff] %v2506_v13  ;;  %v883_v41 = vsel %vm1706_vm6, %v2504_v9, 0.0  ;;  %v884_v4 = vsel %vm1706_vm6, %v2506_v13, 0.0  ;;  %s202_s0 = sadd.f32 %s201_s5, %s200_s11  ;;  %s195_s7 = smul.f32 %s3364_s19, %s3394_s29 }
  0xf9   :  { %885 = vst [vmem:[#allocation2 + $0x2] sm:$0xff] %v883_v41  ;;  %886 = vst [vmem:[#allocation2 + $0xa] sm:$0xff] %v884_v4  ;;  %s196_s9 = smul.f32 %s3367_s24, %s3395_s22  ;;  %s2741_s3 = sld [smem:[#allocation5 + $0x82]] }
  0xfa   :  { %s198_s4 = smul.f32 %s3364_s19, %s3392_s25  ;;  %s3118_s5 = sld [smem:[#allocation5 + $0x83]] }
  0xfb   :  { %s225_s28 = smul.f32 %s3364_s19, %s3396_s13 }
  0xfc   :  { %s206_s17 = smul.f32 %s3364_s19, %s3399_s1 }
 0x100   :  { %v2521_v10 = vld [vmem:[#allocation2 + $0x8] sm:$0xff]  ;;  %v2523_v30 = vld [vmem:[#allocation2] sm:$0xff]  ;;  %v889_v2 = vld [vmem:[#allocation2 + $0x10] sm:$0xf] }
 0x101   :  { %895 = vrot.lane.b32.xlu1 %v2521_v10, %s3375_s18  ;;  %893 = vrot.lane.b32.xlu0 %v2523_v30, %s3375_s18  ;;  %v998_v1 = vmul.f32 %v996_v37, %v2521_v10  ;;  %v999_v25 = vmul.f32 %v996_v37, %v889_v2  ;;  %v1078_v34 = vmul.f32 %v1076_v52, %v2521_v10  ;;  %v2581_v40 = vsel %vm1706_vm6, %v2521_v10, -3.4028235e+38 }
 0x102   :  { %v1079_v62 = vmul.f32 %v1076_v52, %v889_v2  ;;  %v1158_v15 = vmul.f32 %v1156_v14, %v2521_v10  ;;  %v1159_v20 = vmul.f32 %v1156_v14, %v889_v2  ;;  %v1238_v17 = vmul.f32 %v1236_v53, %v2521_v10 }
 0x103   :  { %v1004_v29 = vrot.slane %v998_v1, 1  ;;  %v1006_v56 = vrot.slane %v999_v25, 1  ;;  %v1084_v31 = vrot.slane %v1078_v34, 2  ;;  %v1239_v32 = vmul.f32 %v1236_v53, %v889_v2 }
 0x104   :  { %v1086_v5 = vrot.slane %v1079_v62, 2  ;;  %v1164_v12 = vrot.slane %v1158_v15, 3  ;;  %v1166_v60 = vrot.slane %v1159_v20, 3  ;;  %v1244_v42 = vrot.slane %v1238_v17, 4 }
 0x105   :  { %901 = vrot.lane.b32.xlu1 %v2521_v10, %s3376_s26  ;;  %899 = vrot.lane.b32.xlu0 %v2523_v30, %s3376_s26  ;;  %v2539_v26 = vsel %vm325_vm11, %v1004_v29, %v1006_v56  ;;  %v997_v50 = vmul.f32 %v996_v37, %v2523_v30  ;;  %v1246_v43 = vrot.slane %v1239_v32, 4  ;;  %v1077_v3 = vmul.f32 %v1076_v52, %v2523_v30 }
 0x106   :  { %v2543_v0 = vsel %vm406_vm12, %v1084_v31, %v1086_v5  ;;  %v2546_v39 = vsel %vm487_vm13, %v1164_v12, %v1166_v60  ;;  %v1157_v58 = vmul.f32 %v1156_v14, %v2523_v30  ;;  %v1237_v27 = vmul.f32 %v1236_v53, %v2523_v30 }
 0x107   :  { %v1003_v21 = vrot.slane %v997_v50, 1  ;;  %v2554_v16 = vsel %vm568_vm14, %v1244_v42, %v1246_v43  ;;  %v1083_v22 = vrot.slane %v1077_v3, 2  ;;  %v2586_v45 = vsel %vm1716_vm8, %v2523_v30, -3.4028235e+38 }
 0x108   :  { %3378 = vst [vmem:[#allocation50_spill] sm:$0xff] %v2554_v16  ;;  %v1163_v28 = vrot.slane %v1157_v58, 3  ;;  %v1243_v38 = vrot.slane %v1237_v27, 4  ;;  %v2602_v59 = vsel %vm1752_vm10, %v889_v2, -3.4028235e+38  ;;  %v1311_v36 = vrot.slane %v2581_v40, 1 }
 0x109   :  { %907 = vrot.lane.b32.xlu1 %v2521_v10, %s3377_s30  ;;  %905 = vrot.lane.b32.xlu0 %v2523_v30, %s3377_s30  ;;  %v2559_v23 = vsel %vm325_vm11, %v1003_v21, %v1004_v29  ;;  %v2562_v61 = vsel %vm406_vm12, %v1083_v22, %v1084_v31  ;;  %3385 = vst [vmem:[#allocation51_spill] sm:$0xff] %v2602_v59  ;;  %v1347_v11 = vrot.slane %v2581_v40, 2  ;;  %v1310_v51 = vrot.slane %v2586_v45, 1 }
 0x10a   :  { %v2568_v24 = vsel %vm487_vm13, %v1163_v28, %v1164_v12  ;;  %v2571_v57 = vsel %vm568_vm14, %v1243_v38, %v1244_v42  ;;  %v1346_v7 = vrot.slane %v2586_v45, 2  ;;  %v2675_v48 = vmul.f32 %v949_v35, %v2521_v10 }
 0x10b   :  { %3380 = vst [vmem:[#allocation52_spill] sm:$0xff] %v2571_v57  ;;  %v950_v41 = vmul.f32 %v949_v35, %v2523_v30  ;;  %v2685_v52 = vstv %s202_s0  ;;  %v2692_v14 = vstv %s222_s16  ;;  %v2697_v53 = vstv %s198_s4  ;;  %s3405_s4 = sld [smem:[#allocation20_spill]] }
 0x10c   :  { %v1455_v1 = vrot.slane %v2581_v40, 4  ;;  %v1454_v25 = vrot.slane %v2586_v45, 4  ;;  %v2712_v34 = vstv %s225_s28  ;;  %v2717_v62 = vsel %vm325_vm11, %v1310_v51, %v1311_v36  ;;  %s3425_s16 = sld [smem:[#allocation56_spill]] }
 0x10d   :  { %911 = vrot.lane.b32.xlu1 %v2523_v30, %s3379_s2  ;;  %897 = vrot.lane.b32.xlu0 %v889_v2, %s3375_s18  ;;  %v2720_v15 = vsel %vm406_vm12, %v1346_v7, %v1347_v11  ;;  %v3260_v20 = vrot.slane %v2602_v59, 1  ;;  %v1457_v58 = vrot.slane %v2602_v59, 4  ;;  %s3427_s0 = sld [smem:[#allocation57_spill]] }
 0x10e   :  { %3404 = vst [vmem:[#allocation54_spill] sm:$0xff] %v2720_v15  ;;  %v2748_v3 = vsel %vm568_vm14, %v1454_v25, %v1455_v1 }
 0x10f   :  { %3406 = vst [vmem:[#allocation53_spill] sm:$0xff] %v2748_v3  ;;  %v2758_v38 = vsel %vm325_vm11, %v1311_v36, %v3260_v20 }
 0x110   :  { %3407 = vst [vmem:[#allocation49_spill] sm:$0xff] %v2758_v38 }
 0x111   :  { %903 = vrot.lane.b32.xlu1 %v889_v2, %s3376_s26  ;;  %913 = vrot.lane.b32.xlu0 %v2521_v10, %s3379_s2  ;;  %v2704_v10 = vstv %s209_s12  ;;  %s224_s29 = smul.f32 %s3364_s19, %s3405_s4 }
 0x112   :  { %s231_s22 = smul.f32 %s3367_s24, %s3425_s16 }
 0x113   :  { %v2772_v36 = vstv %s224_s29 }
 0x115   :  { %915 = vrot.lane.b32.xlu1 %v889_v2, %s3379_s2  ;;  %909 = vrot.lane.b32.xlu0 %v889_v2, %s3377_s30 }
 0x119   :  { %919 = vrot.lane.b32.xlu1 %v2581_v40, %s3375_s18  ;;  %917 = vrot.lane.b32.xlu0 %v2586_v45, %s3375_s18 }
 0x11d   :  { %925 = vrot.lane.b32.xlu1 %v2581_v40, %s3376_s26  ;;  %923 = vrot.lane.b32.xlu0 %v2586_v45, %s3376_s26 }
 0x121   :  { %931 = vrot.lane.b32.xlu1 %v2581_v40, %s3377_s30  ;;  %929 = vrot.lane.b32.xlu0 %v2586_v45, %s3377_s30 }
 0x125   :  { %935 = vrot.lane.b32.xlu1 %v2586_v45, %s3379_s2  ;;  %921 = vrot.lane.b32.xlu0 %v2602_v59, %s3375_s18  ;;  %s185_s18 = smul.f32 %s3364_s19, %s3383_s6 }
 0x126   :  { %s211_s6 = smul.f32 %s3364_s19, %s3390_s23 }
 0x127   :  { %v2658_v18 = vstv %s185_s18  ;;  %s3403_s18 = sld [smem:[#allocation46_spill]] }
 0x129   :  { %939 = vrot.lane.b32.xlu1 %v2602_v59, %s3379_s2  ;;  %937 = vrot.lane.b32.xlu0 %v2581_v40, %s3379_s2  ;;  %s199_s2 = smul.f32 %s3364_s19, %s3323_s8 }
 0x12a   :  { %s212_s8 = smul.f32 %s3367_s24, %s3391_s27  ;;  %s3397_s27 = sld [smem:[#allocation23_spill]] }
 0x12b   :  { %v2660_v8 = vstv %s199_s2  ;;  %s197_s2 = sadd.f32 %s196_s9, %s195_s7 }
 0x12c   :  { %s213_s23 = sadd.f32 %s212_s8, %s211_s6 }
 0x12d   :  { %933 = vrot.lane.b32.xlu1 %v2602_v59, %s3377_s30  ;;  %927 = vrot.lane.b32.xlu0 %v2602_v59, %s3376_s26  ;;  %s3393_s30 = sld [smem:[#allocation39_spill]]  ;;  %s188_s26 = smul.f32 %s3364_s19, %s3386_s15  ;;  %v2745_v21 = vstv %s197_s2 }
 0x12e   :  { %v2687_v2 = vstv %s213_s23  ;;  %s218_s7 = smul.f32 %s3367_s24, %s3403_s18 }
 0x12f   :  { %s191_s15 = sadd.f32 %s190_s20, %s188_s26  ;;  %s217_s20 = smul.f32 %s3364_s19, %s3401_s21 }
 0x130   :  { %s3402_s13 = smul.f32 %s3364_s19, %s3397_s27  ;;  %s3434_s27 = sld [smem:[#allocation58_spill]] }
 0x131   :  { %v2683_v37 = vstv %s191_s15  ;;  %s219_s11 = sadd.f32 %s218_s7, %s217_s20 }
 0x132   :  { %v2681_v4 = vstv %s3402_s13 }
 0x133   :  { %s220_s14 = smul.f32 %s3364_s19, %s3393_s30 }
 0x134   :  { %s207_s30 = smul.f32 %s3367_s24, %s3400_s10 }
 0x135   :  { %v2706_v30 = vstv %s220_s14  ;;  %s232_s14 = smul.f32 %s3364_s19, %s3427_s0 }
 0x136   :  { %s208_s25 = sadd.f32 %s207_s30, %s206_s17 }
 0x137   :  { %s233_s19 = sadd.f32 %s232_s14, %s231_s22 }
 0x138   :  { %v2770_v13 = vstv %s208_s25 }
 0x173   :  { %v896_v33 = vpop.permute.xlu1 %895  ;;  %v894_v63 = vpop.permute.xlu0 %893 }
 0x174   :  { %v965_v56 = vmul.f32 %v2654_v19, %v894_v63  ;;  %v2727_v31 = vmul.f32 %v2654_v19, %v896_v33  ;;  %v1045_v5 = vmul.f32 %v2660_v8, %v894_v63  ;;  %v2735_v32 = vmul.f32 %v2660_v8, %v896_v33 }
 0x175   :  { %v1125_v42 = vmul.f32 %v2662_v49, %v894_v63  ;;  %v2739_v50 = vmul.f32 %v2662_v49, %v896_v33  ;;  %v942_v43 = vmul.f32 %v941_v47, %v894_v63  ;;  %v1205_v22 = vmul.f32 %v2664_v6, %v894_v63 }
 0x176   :  { %v2753_v28 = vmul.f32 %v2664_v6, %v896_v33  ;;  %v943_v55 = vmul.f32 %v941_v47, %v896_v33  ;;  %v971_v7 = vrot.slane %v965_v56, 1  ;;  %v972_v25 = vrot.slane %v2727_v31, 1 }
 0x177   :  { %v902_v17 = vpop.permute.xlu1 %901  ;;  %v2723_v29 = vpop.permute.xlu0 %899  ;;  %v1131_v12 = vrot.slane %v1125_v42, 3  ;;  %v3408_v47 = vrot.slane %v2602_v59, 2  ;;  %v2780_v56 = vsel %vm568_vm14, %v1455_v1, %v1457_v58  ;;  %v3411_v58 = vrot.slane %v2735_v32, 2 }
 0x178   :  { %v945_v60 = vmul.f32 %v944_v44, %v2723_v29  ;;  %v946_v27 = vmul.f32 %v944_v44, %v902_v17  ;;  %v1051_v44 = vrot.slane %v1045_v5, 2  ;;  %3410 = vst [vmem:[#allocation16_spill] sm:$0xff] %v2780_v56  ;;  %v1211_v5 = vrot.slane %v1205_v22, 4 }
 0x179   :  { %v2777_v33 = vsel %vm406_vm12, %v1347_v11, %v3408_v47  ;;  %v982_v42 = vmul.f32 %v2683_v37, %v902_v17  ;;  %v981_v11 = vmul.f32 %v2683_v37, %v2723_v29  ;;  %v2790_v47 = vstv %s219_s11 }
 0x17a   :  { %v947_v46 = vadd.f32 %v945_v60, %v942_v43  ;;  %3409 = vst [vmem:[#allocation13_spill] sm:$0xff] %v2777_v33  ;;  %v948_v31 = vadd.f32 %v946_v27, %v943_v55  ;;  %v973_v1 = vsel %vm325_vm11, %v971_v7, %v972_v25  ;;  %v2796_v27 = vsel %vm406_vm12, %v1051_v44, %v3411_v58 }
 0x17b   :  { %v2760_v35 = vpop.permute.xlu1 %907  ;;  %v2762_v51 = vpop.permute.xlu0 %905  ;;  %v2804_v55 = vstv %s2741_s3  ;;  %v2810_v9 = vmul.f32 %v2685_v52, %v902_v17  ;;  %v2813_v7 = vmul.f32 %v2687_v2, %v902_v17  ;;  %v987_v3 = vrot.slane %v981_v11, 1 }
 0x17c   :  { %v952_v43 = vadd.f32 %v950_v41, %v947_v46  ;;  %v955_v20 = vmul.f32 %v2658_v18, %v2762_v51  ;;  %v3412_v41 = vrot.slane %v2739_v50, 3  ;;  %3413 = vst [vmem:[#allocation55_spill] sm:$0xff] %v2804_v55  ;;  %v953_v44 = vadd.f32 %v2675_v48, %v948_v31 }
 0x17d   :  { %v956_v58 = vmul.f32 %v2658_v18, %v2760_v35  ;;  %v988_v55 = vrot.slane %v982_v42, 1  ;;  %v1061_v38 = vmul.f32 %v2685_v52, %v2723_v29  ;;  %v1141_v31 = vmul.f32 %v2687_v2, %v2723_v29 }
 0x17e   :  { %v2801_v22 = vsel %vm487_vm13, %v1131_v12, %v3412_v41  ;;  %v3414_v12 = vrot.slane %v2753_v28, 4  ;;  %v957_v33 = vadd.f32 %v955_v20, %v952_v43  ;;  %v1221_v20 = vmul.f32 %v2692_v14, %v2723_v29 }
 0x17f   :  { %v2786_v54 = vpop.permute.xlu1 %911  ;;  %v898_v63 = vpop.permute.xlu0 %897  ;;  %v958_v11 = vadd.f32 %v956_v58, %v953_v44  ;;  %v1148_v59 = vrot.slane %v2813_v7, 3  ;;  %v989_v16 = vsel %vm325_vm11, %v987_v3, %v988_v55  ;;  %v1067_v29 = vrot.slane %v1061_v38, 2 }
 0x180   :  { %v960_v46 = vmul.f32 %v2681_v4, %v2786_v54  ;;  %v967_v60 = vmul.f32 %v2654_v19, %v898_v63  ;;  %v2821_v41 = vsel %vm568_vm14, %v1211_v5, %v3414_v12  ;;  %v2824_v19 = vmul.f32 %v2692_v14, %v902_v17 }
 0x181   :  { %v1047_v48 = vmul.f32 %v2660_v8, %v898_v63  ;;  %v1127_v18 = vmul.f32 %v2662_v49, %v898_v63  ;;  %v1207_v42 = vmul.f32 %v2664_v6, %v898_v63  ;;  %v1068_v12 = vrot.slane %v2810_v9, 2 }
 0x182   :  { %v962_v5 = vadd.f32 %v960_v46, %v957_v33  ;;  %v974_v17 = vrot.slane %v967_v60, 1  ;;  %v1228_v49 = vrot.slane %v2824_v19, 4  ;;  %v1147_v60 = vrot.slane %v1141_v31, 3 }
 0x183   :  { %v904_v56 = vpop.permute.xlu1 %903  ;;  %v2828_v15 = vpop.permute.xlu0 %913  ;;  %v1054_v33 = vrot.slane %v1047_v48, 2  ;;  %v1227_v46 = vrot.slane %v1221_v20, 4  ;;  %v1134_v44 = vrot.slane %v1127_v18, 3  ;;  %v1214_v9 = vrot.slane %v1207_v42, 4 }
 0x184   :  { %v983_v43 = vmul.f32 %v2683_v37, %v904_v56  ;;  %v961_v8 = vmul.f32 %v2681_v4, %v2828_v15  ;;  %v975_v37 = vsel %vm325_vm11, %v972_v25, %v974_v17  ;;  %v978_v63 = vadd.f32 %v973_v1, %v962_v5 }
 0x185   :  { %v1063_v58 = vmul.f32 %v2685_v52, %v904_v56  ;;  %v1143_v4 = vmul.f32 %v2687_v2, %v904_v56  ;;  %v2849_v3 = vsel %vm406_vm12, %v1067_v29, %v1068_v12  ;;  %v1223_v38 = vmul.f32 %v2692_v14, %v904_v56 }
 0x186   :  { %v990_v57 = vrot.slane %v983_v43, 1  ;;  %v963_v6 = vadd.f32 %v961_v8, %v958_v11  ;;  %v1013_v48 = vmul.f32 %v2745_v21, %v2762_v51  ;;  %v1014_v25 = vmul.f32 %v2745_v21, %v2760_v35 }
 0x187   :  { %v3415_v1 = vrot.slane %v2735_v32, 2  ;;  %v2862_v52 = vsel %vm487_vm13, %v1147_v60, %v1148_v59  ;;  %v2865_v2 = vsel %vm568_vm14, %v1227_v46, %v1228_v49  ;;  %v1029_v14 = vmul.f32 %v2697_v53, %v2786_v54  ;;  %v916_v56 = vpop.permute.xlu1 %915  ;;  %v910_v8 = vpop.permute.xlu0 %909 }
 0x188   :  { %v991_v7 = vsel %vm325_vm11, %v988_v55, %v990_v57  ;;  %v979_v19 = vadd.f32 %v975_v37, %v963_v6  ;;  %v3416_v55 = vrot.slane %v2739_v50, 3  ;;  %v3417_v32 = vrot.slane %v2753_v28, 4 }
 0x189   :  { %v2859_v57 = vsel %vm406_vm12, %v3415_v1, %v1054_v33  ;;  %v994_v20 = vadd.f32 %v989_v16, %v978_v63  ;;  %v1070_v17 = vrot.slane %v1063_v58, 2  ;;  %v1150_v42 = vrot.slane %v1143_v4, 3 }
 0x18a   :  { %v2872_v18 = vsel %vm487_vm13, %v3416_v55, %v1134_v44  ;;  %v2877_v31 = vsel %vm568_vm14, %v3417_v32, %v1214_v9  ;;  %v995_v5 = vadd.f32 %v991_v7, %v979_v19  ;;  %v1109_v43 = vmul.f32 %v2704_v10, %v2786_v54 }
 0x18b   :  { %v1030_v11 = vmul.f32 %v2697_v53, %v2828_v15  ;;  %v1230_v50 = vrot.slane %v1223_v38, 4  ;;  %v1189_v29 = vmul.f32 %v2706_v30, %v2786_v54  ;;  %v2887_v28 = vmul.f32 %v2712_v34, %v2786_v54  ;;  %v2901_v4 = vpop.permute.xlu1 %919 }
 0x18c   :  { %v1031_v16 = vmul.f32 %v2697_v53, %v916_v56  ;;  %v1035_v33 = vrot.slane %v1029_v14, 1  ;;  %v1110_v60 = vmul.f32 %v2704_v10, %v2828_v15  ;;  %v1111_v46 = vmul.f32 %v2704_v10, %v916_v56 }
 0x18d   :  { %v1190_v6 = vmul.f32 %v2706_v30, %v2828_v15  ;;  %v1191_v37 = vmul.f32 %v2706_v30, %v916_v56  ;;  %v1011_v63 = vadd.f32 %v2539_v26, %v995_v5  ;;  %v1019_v44 = vrot.slane %v1013_v48, 1 }
 0x18e   :  { %v1020_v9 = vrot.slane %v1014_v25, 1  ;;  %v1071_v54 = vsel %vm406_vm12, %v1068_v12, %v1070_v17  ;;  %v2899_v7 = vsel %vm487_vm13, %v1148_v59, %v1150_v42  ;;  %v1115_v53 = vrot.slane %v1109_v43, 2  ;;  %v2908_v12 = vpop.permute.xlu0 %917 }
 0x18f   :  { %v1036_v58 = vrot.slane %v1030_v11, 1  ;;  %v2904_v10 = vsel %vm568_vm14, %v1228_v49, %v1230_v50  ;;  %v1195_v19 = vrot.slane %v1189_v29, 3  ;;  %v1275_v38 = vrot.slane %v2887_v28, 4 }
 0x190   :  { %v1038_v30 = vrot.slane %v1031_v16, 1  ;;  %v1116_v1 = vrot.slane %v1110_v60, 2  ;;  %v1118_v26 = vrot.slane %v1111_v46, 2  ;;  %v1196_v48 = vrot.slane %v1190_v6, 3 }
 0x191   :  { %v1010_v25 = vadd.f32 %v2559_v23, %v994_v20  ;;  %v1198_v59 = vrot.slane %v1191_v37, 3  ;;  %v1021_v14 = vsel %vm325_vm11, %v1019_v44, %v1020_v9  ;;  %v1093_v55 = vmul.f32 %v2770_v13, %v2762_v51 }
 0x192   :  { %v1015_v49 = vmul.f32 %v2745_v21, %v910_v8  ;;  %v1037_v32 = vsel %vm325_vm11, %v1035_v33, %v1036_v58  ;;  %v1094_v5 = vmul.f32 %v2770_v13, %v2760_v35  ;;  %v1173_v17 = vmul.f32 %v2790_v47, %v2762_v51  ;;  %v2933_v33 = vpop.permute.xlu1 %925 }
 0x193   :  { %v1026_v42 = vadd.f32 %v1021_v14, %v1010_v25  ;;  %v1174_v23 = vmul.f32 %v2790_v47, %v2760_v35  ;;  %v1253_v20 = vmul.f32 %v2772_v36, %v2762_v51  ;;  %v1254_v43 = vmul.f32 %v2772_v36, %v2760_v35 }
 0x194   :  { %v1022_v11 = vrot.slane %v1015_v49, 1  ;;  %v1039_v21 = vsel %vm325_vm11, %v1036_v58, %v1038_v30  ;;  %v2928_v50 = vmul.f32 %v2712_v34, %v2828_v15  ;;  %v2931_v29 = vmul.f32 %v2712_v34, %v916_v56  ;;  %v2940_v58 = vpop.permute.xlu0 %923 }
 0x195   :  { %v1042_v16 = vadd.f32 %v1037_v32, %v1026_v42  ;;  %v1099_v60 = vrot.slane %v1093_v55, 2  ;;  %v1095_v51 = vmul.f32 %v2770_v13, %v910_v8  ;;  %v1175_v35 = vmul.f32 %v2790_v47, %v910_v8 }
 0x196   :  { %v1023_v46 = vsel %vm325_vm11, %v1020_v9, %v1022_v11  ;;  %v1100_v6 = vrot.slane %v1094_v5, 2  ;;  %v1255_v15 = vmul.f32 %v2772_v36, %v910_v8  ;;  %v1179_v34 = vrot.slane %v1173_v17, 3  ;;  %v2954_v5 = vpop.permute.xlu1 %931 }
 0x197   :  { %v1027_v37 = vadd.f32 %v1023_v46, %v1011_v63  ;;  %v1058_v44 = vadd.f32 %v2796_v27, %v1042_v16  ;;  %v1180_v56 = vrot.slane %v1174_v23, 3  ;;  %v1259_v30 = vrot.slane %v1253_v20, 4 }
 0x198   :  { %v1260_v25 = vrot.slane %v1254_v43, 4  ;;  %v1117_v14 = vsel %vm406_vm12, %v1115_v53, %v1116_v1  ;;  %v1119_v9 = vsel %vm406_vm12, %v1116_v1, %v1118_v26  ;;  %v2946_v47 = vsel %vm487_vm13, %v1195_v19, %v1196_v48  ;;  %v2964_v42 = vpop.permute.xlu0 %929 }
 0x199   :  { %v1043_v55 = vadd.f32 %v1039_v21, %v1027_v37  ;;  %v1074_v13 = vadd.f32 %v2849_v3, %v1058_v44  ;;  %v2949_v27 = vsel %vm487_vm13, %v1196_v48, %v1198_v59  ;;  %v1102_v36 = vrot.slane %v1095_v51, 2 }
 0x19a   :  { %v1182_v8 = vrot.slane %v1175_v35, 3  ;;  %v1276_v63 = vrot.slane %v2928_v50, 4  ;;  %v1262_v53 = vrot.slane %v1255_v15, 4  ;;  %v1278_v1 = vrot.slane %v2931_v29, 4  ;;  %v2988_v15 = vpop.permute.xlu1 %935 }
 0x19b   :  { %v1059_v49 = vadd.f32 %v2859_v57, %v1043_v55  ;;  %v1090_v32 = vadd.f32 %v2562_v61, %v1074_v13  ;;  %v1101_v3 = vsel %vm406_vm12, %v1099_v60, %v1100_v6  ;;  %v1181_v19 = vsel %vm487_vm13, %v1179_v34, %v1180_v56 }
 0x19c   :  { %v2960_v26 = vsel %vm568_vm14, %v1259_v30, %v1260_v25  ;;  %v1401_v17 = vrot.slane %v2901_v4, 2  ;;  %v1400_v57 = vrot.slane %v2908_v12, 2  ;;  %v1103_v61 = vsel %vm406_vm12, %v1100_v6, %v1102_v36  ;;  %v2999_v13 = vpop.permute.xlu0 %921 }
 0x19d   :  { %v1075_v48 = vadd.f32 %v1071_v54, %v1059_v49  ;;  %v1106_v59 = vadd.f32 %v1101_v3, %v1090_v32  ;;  %v1183_v23 = vsel %vm487_vm13, %v1180_v56, %v1182_v8  ;;  %v1380_v20 = vrot.slane %v2901_v4, 1 }
 0x19e   :  { %v1368_v43 = vmax.f32 %v2908_v12, %v2940_v58  ;;  %v2973_v54 = vsel %vm568_vm14, %v1260_v25, %v1262_v53  ;;  %v1419_v16 = vrot.slane %v2901_v4, 3  ;;  %v1437_v60 = vrot.slane %v2901_v4, 4 }
 0x19f   :  { %v1091_v11 = vadd.f32 %v2543_v0, %v1075_v48  ;;  %v1122_v21 = vadd.f32 %v1117_v14, %v1106_v59  ;;  %v1379_v46 = vrot.slane %v2908_v12, 1  ;;  %v1418_v51 = vrot.slane %v2908_v12, 3 }
 0x1a0   :  { %v1436_v35 = vrot.slane %v2908_v12, 4  ;;  %v2984_v0 = vsel %vm406_vm12, %v1400_v57, %v1401_v17  ;;  %v1288_v44 = vmax.f32 %v2933_v33, %v2581_v40  ;;  %v1297_v34 = vrot.slane %v2933_v33, 1 }
 0x1a1   :  { %v1107_v6 = vadd.f32 %v1103_v61, %v1091_v11  ;;  %v1138_v37 = vadd.f32 %v2801_v22, %v1122_v21  ;;  %v1369_v56 = vmax.f32 %v2901_v4, %v2933_v33  ;;  %v1287_v12 = vmax.f32 %v2940_v58, %v2586_v45  ;;  %v3028_v11 = vpop.permute.xlu1 %939 }
 0x1a2   :  { %v1370_v22 = vmax.f32 %v1368_v43, %v2586_v45  ;;  %v1336_v14 = vrot.slane %v2933_v33, 2  ;;  %v1296_v55 = vrot.slane %v2940_v58, 1  ;;  %v3004_v36 = vsel %vm487_vm13, %v1418_v51, %v1419_v16 }
 0x1a3   :  { %v1123_v30 = vadd.f32 %v1119_v9, %v1107_v6  ;;  %v1154_v25 = vadd.f32 %v2862_v52, %v1138_v37  ;;  %v3009_v8 = vsel %vm568_vm14, %v1436_v35, %v1437_v60  ;;  %v1335_v45 = vrot.slane %v2940_v58, 2  ;;  %v3043_v37 = vpop.permute.xlu0 %937 }
 0x1a4   :  { %v1290_v52 = vmax.f32 %v1287_v12, %v2964_v42  ;;  %v1446_v32 = vrot.slane %v2933_v33, 4  ;;  %v1445_v53 = vrot.slane %v2940_v58, 4  ;;  %v1371_v3 = vmax.f32 %v1369_v56, %v2581_v40 }
 0x1a5   :  { %v1139_v9 = vadd.f32 %v2872_v18, %v1123_v30  ;;  %v1170_v49 = vadd.f32 %v2568_v24, %v1154_v25  ;;  %v3019_v48 = vmax.f32 %v1288_v44, %v2954_v5  ;;  %v1325_v59 = vrot.slane %v2954_v5, 1 }
 0x1a6   :  { %v1372_v57 = vmax.f32 %v1370_v22, %v2964_v42  ;;  %v1298_v24 = vsel %vm325_vm11, %v1296_v55, %v1297_v34  ;;  %v1324_v18 = vrot.slane %v2964_v42, 1  ;;  %v1337_v40 = vsel %vm406_vm12, %v1335_v45, %v1336_v14 }
 0x1a7   :  { %v1155_v61 = vadd.f32 %v2899_v7, %v1139_v9  ;;  %v1186_v43 = vadd.f32 %v1181_v19, %v1170_v49  ;;  %v1358_v58 = vrot.slane %v2954_v5, 2  ;;  %v1304_v21 = vmax.f32 %v1290_v52, %v1298_v24 }
 0x1a8   :  { %v1374_v51 = vmax.f32 %v1372_v57, %v2988_v15  ;;  %v3040_v35 = vsel %vm568_vm14, %v1445_v53, %v1446_v32  ;;  %v1382_v6 = vrot.slane %v2999_v13, 1  ;;  %v1373_v44 = vmax.f32 %v1371_v3, %v2954_v5 }
 0x1a9   :  { %v1171_v7 = vadd.f32 %v2546_v39, %v1155_v61  ;;  %v1202_v19 = vadd.f32 %v2946_v47, %v1186_v43  ;;  %v1464_v56 = vrot.slane %v2954_v5, 4  ;;  %v1381_v12 = vsel %vm325_vm11, %v1379_v46, %v1380_v20  ;;  %v3418_v43 = vld [vmem:[#allocation52_spill] sm:$0xff] }
 0x1aa   :  { %v1394_v39 = vrot.slane %v3028_v11, 1  ;;  %v1326_v30 = vsel %vm325_vm11, %v1324_v18, %v1325_v59  ;;  %v1391_v25 = vrot.slane %v2988_v15, 1  ;;  %v1318_v55 = vmax.f32 %v1304_v21, %v2717_v62 }
 0x1ab   :  { %v1187_v47 = vadd.f32 %v1183_v23, %v1171_v7  ;;  %v1218_v22 = vadd.f32 %v2821_v41, %v1202_v19  ;;  %v1386_v45 = vmax.f32 %v1374_v51, %v1381_v12  ;;  %v1375_v52 = vmax.f32 %v1373_v44, %v3043_v37  ;;  %v928_v44 = vpop.permute.xlu0 %927 }
 0x1ac   :  { %v1392_v9 = vrot.slane %v3043_v37, 1  ;;  %v1383_v41 = vsel %vm325_vm11, %v1380_v20, %v1382_v6  ;;  %v1403_v23 = vrot.slane %v2999_v13, 2  ;;  %v1410_v57 = vrot.slane %v3043_v37, 2 }
 0x1ad   :  { %v1203_v46 = vadd.f32 %v2949_v27, %v1187_v47  ;;  %v1234_v49 = vadd.f32 %v2865_v2, %v1218_v22  ;;  %v1387_v53 = vmax.f32 %v1375_v52, %v1383_v41  ;;  %v1412_v2 = vrot.slane %v3028_v11, 2 }
 0x1ae   :  { %v1393_v3 = vsel %vm325_vm11, %v1391_v25, %v1392_v9  ;;  %v1395_v62 = vsel %vm325_vm11, %v1392_v9, %v1394_v39  ;;  %v1332_v18 = vmax.f32 %v1318_v55, %v1326_v30  ;;  %v1357_v20 = vrot.slane %v2964_v42, 2  ;;  %v3419_v30 = vld [vmem:[#allocation50_spill] sm:$0xff]  ;;  %v934_v9 = vpop.permute.xlu1 %933 }
 0x1af   :  { %v1219_v61 = vadd.f32 %v2877_v31, %v1203_v46  ;;  %v3070_v24 = vadd.f32 %v3418_v43, %v1234_v49  ;;  %v1398_v27 = vmax.f32 %v1386_v45, %v1393_v3  ;;  %v1409_v21 = vrot.slane %v2988_v15, 2  ;;  %v3420_v46 = vld [vmem:[#allocation51_spill] sm:$0xff] }
 0x1b0   :  { %v1399_v51 = vmax.f32 %v1387_v53, %v1395_v62  ;;  %v1404_v19 = vsel %vm406_vm12, %v1401_v17, %v1403_v23  ;;  %v1421_v31 = vrot.slane %v2999_v13, 3  ;;  %v1430_v12 = vrot.slane %v3028_v11, 3 }
 0x1b1   :  { %v1235_v7 = vadd.f32 %v2904_v10, %v1219_v61  ;;  %v1407_v6 = vmax.f32 %v1398_v27, %v2984_v0  ;;  %v1411_v47 = vsel %vm406_vm12, %v1409_v21, %v1410_v57  ;;  %v1428_v22 = vrot.slane %v3043_v37, 3 }
 0x1b2   :  { %v1408_v39 = vmax.f32 %v1399_v51, %v1404_v19  ;;  %v1463_v10 = vrot.slane %v2964_v42, 4  ;;  %v1413_v55 = vsel %vm406_vm12, %v1410_v57, %v1412_v2  ;;  %v1427_v17 = vrot.slane %v2988_v15, 3  ;;  %v3421_v19 = vld [vmem:[#allocation54_spill] sm:$0xff] }
 0x1b3   :  { %v1251_v25 = vadd.f32 %v3419_v30, %v1235_v7  ;;  %v1416_v45 = vmax.f32 %v1407_v6, %v1411_v47  ;;  %v1439_v52 = vrot.slane %v2999_v13, 4  ;;  %v1289_v49 = vmax.f32 %v928_v44, %v3420_v46 }
 0x1b4   :  { %v1417_v0 = vmax.f32 %v1408_v39, %v1413_v55  ;;  %v1343_v41 = vmax.f32 %v1332_v18, %v1337_v40  ;;  %v1422_v23 = vsel %vm487_vm13, %v1419_v16, %v1421_v31  ;;  %v1299_v3 = vrot.slane %v928_v44, 1 }
 0x1b5   :  { %v1425_v53 = vmax.f32 %v1416_v45, %v3004_v36  ;;  %v1429_v42 = vsel %vm487_vm13, %v1427_v17, %v1428_v22  ;;  %v1431_v62 = vsel %vm487_vm13, %v1428_v22, %v1430_v12  ;;  %v1292_v61 = vmax.f32 %v1289_v49, %v934_v9  ;;  %v3422_v12 = vld [vmem:[#allocation49_spill] sm:$0xff] }
 0x1b6   :  { %v1426_v57 = vmax.f32 %v1417_v0, %v1422_v23  ;;  %v1327_v13 = vrot.slane %v934_v9, 1  ;;  %v1300_v2 = vsel %vm325_vm11, %v1297_v34, %v1299_v3  ;;  %v1448_v40 = vrot.slane %v928_v44, 4  ;;  %v3426_v0 = vld [vmem:[#allocation16_spill] sm:$0xff] }
 0x1b7   :  { %v1434_v43 = vmax.f32 %v1425_v53, %v1429_v42  ;;  %v1359_v16 = vsel %vm406_vm12, %v1357_v20, %v1358_v58  ;;  %v1305_v36 = vmax.f32 %v3019_v48, %v1300_v2  ;;  %v1306_v18 = vmax.f32 %v1292_v61, %v1299_v3 }
 0x1b8   :  { %v1435_v27 = vmax.f32 %v1426_v57, %v1431_v62  ;;  %v1465_v21 = vsel %vm568_vm14, %v1463_v10, %v1464_v56  ;;  %v1440_v51 = vsel %vm568_vm14, %v1437_v60, %v1439_v52  ;;  %v1338_v34 = vrot.slane %v928_v44, 2 }
 0x1b9   :  { %v1443_v7 = vmax.f32 %v1434_v43, %v3009_v8  ;;  %v1354_v31 = vmax.f32 %v1343_v41, %v3421_v19  ;;  %v1319_v20 = vmax.f32 %v1305_v36, %v3422_v12  ;;  %v3423_v48 = vrot.slane %v3420_v46, 1  ;;  %v3428_v41 = vld [vmem:[#allocation13_spill] sm:$0xff] }
 0x1ba   :  { %v1444_v6 = vmax.f32 %v1435_v27, %v1440_v51  ;;  %v1328_v4 = vsel %vm325_vm11, %v1325_v59, %v1327_v13  ;;  %v1466_v22 = vrot.slane %v934_v9, 4  ;;  %v1449_v60 = vsel %vm568_vm14, %v1446_v32, %v1448_v40 }
 0x1bb   :  { %v1320_v39 = vmax.f32 %v1306_v18, %v3423_v48  ;;  %v1452_v47 = vmax.f32 %v1443_v7, %v3040_v35  ;;  %v1473_v8 = vrot.slane %v3043_v37, 4  ;;  %v1333_v44 = vmax.f32 %v1319_v20, %v1328_v4  ;;  %v3424_v35 = vld [vmem:[#allocation53_spill] sm:$0xff] }
 0x1bc   :  { %v1453_v10 = vmax.f32 %v1444_v6, %v1449_v60  ;;  %v1475_v55 = vrot.slane %v3028_v11, 4  ;;  %v1360_v17 = vrot.slane %v934_v9, 2  ;;  %v1339_v59 = vsel %vm406_vm12, %v1336_v14, %v1338_v34 }
 0x1bd   :  { %v1334_v30 = vmax.f32 %v1320_v39, %v1327_v13  ;;  %v1461_v45 = vmax.f32 %v1452_v47, %v3424_v35  ;;  %v1472_v32 = vrot.slane %v2988_v15, 4  ;;  %v1344_v52 = vmax.f32 %v1333_v44, %v1339_v59 }
 0x1be   :  { %v1462_v49 = vmax.f32 %v1453_v10, %v3426_v0  ;;  %v1266_v11 = vadd.f32 %v2960_v26, %v3070_v24  ;;  %v1365_v33 = vmax.f32 %v1354_v31, %v1359_v16  ;;  %v1467_v14 = vsel %vm568_vm14, %v1464_v56, %v1466_v22 }
 0x1bf   :  { %v1345_v37 = vmax.f32 %v1334_v30, %v1338_v34  ;;  %v1470_v9 = vmax.f32 %v1461_v45, %v1465_v21  ;;  %v1474_v15 = vsel %vm568_vm14, %v1472_v32, %v1473_v8  ;;  %v1355_v23 = vmax.f32 %v1344_v52, %v3428_v41  ;;  %v3431_v30 = vld [vmem:[#allocation19_spill] sm:$0xff] }
 0x1c0   :  { %v3429_v53 = vrot.slane %v3420_v46, 2  ;;  %v1471_v42 = vmax.f32 %v1462_v49, %v1467_v14  ;;  %v1267_v62 = vadd.f32 %v2973_v54, %v1251_v25  ;;  %v1476_v57 = vsel %vm568_vm14, %v1473_v8, %v1475_v55  ;;  %v3430_v54 = vld [vmem:[#allocation55_spill] sm:$0xff] }
 0x1c1   :  { %v1479_v26 = vmax.f32 %v1470_v9, %v1474_v15  ;;  %v1361_v24 = vsel %vm406_vm12, %v1358_v58, %v1360_v17  ;;  %v1277_v46 = vsel %vm568_vm14, %v1275_v38, %v1276_v63  ;;  %v1508_v2 = vstv %s3118_s5  ;;  %v3432_v55 = vld [vmem:[#allocation17_spill] sm:$0xff] }
 0x1c2   :  { %v1356_v3 = vmax.f32 %v1345_v37, %v3429_v53  ;;  %v1366_v61 = vmax.f32 %v1355_v23, %v1361_v24  ;;  %v1480_v56 = vmax.f32 %v1471_v42, %v1476_v57  ;;  %v1493_v25 = vmul.f32 %v3430_v54, %v1365_v33 }
 0x1c3   :  { %v1483_v13 = vrot.slane %v1479_v26, 7  ;;  %v1279_v5 = vsel %vm568_vm14, %v1276_v63, %v1278_v1  ;;  %v1282_v27 = vadd.f32 %v1277_v46, %v1266_v11  ;;  %v1284_v7 = vstv %s233_s19 }
 0x1c4   :  { %v1367_v43 = vmax.f32 %v1356_v3, %v1360_v17  ;;  %v1484_v58 = vrot.slane %v1480_v56, 7  ;;  %v1494_v40 = vmul.f32 %v3430_v54, %v1366_v61  ;;  %v1283_v28 = vadd.f32 %v1279_v5, %v1267_v62 }
 0x1c5   :  { %v1489_v36 = vmax.f32 %v1365_v33, %v1483_v13  ;;  %v1499_v29 = vrot.slane %v1493_v25, 1  ;;  %v1285_v6 = vadd.f32 %v1284_v7, %v1282_v27 }
 0x1c6   :  { %v1495_v16 = vmul.f32 %v3430_v54, %v1367_v43  ;;  %v1485_v38 = vsel %vm841_vm15, %v1483_v13, %v1484_v58  ;;  %v1491_v18 = vmax.f32 %v1367_v43, %v1484_v58  ;;  %v1500_v21 = vrot.slane %v1494_v40, 1 }
 0x1c7   :  { %v1490_v34 = vmax.f32 %v1366_v61, %v1485_v38  ;;  %v1509_v19 = vmul.f32 %v1508_v2, %v1489_v36  ;;  %v1286_v12 = vadd.f32 %v1284_v7, %v1283_v28 }
 0x1c8   :  { %v1502_v51 = vrot.slane %v1495_v16, 1  ;;  %v1511_v50 = vmul.f32 %v1508_v2, %v1491_v18  ;;  %v1501_v63 = vsel %vm325_vm11, %v1499_v29, %v1500_v21 }
 0x1c9   :  { %v1510_v31 = vmul.f32 %v1508_v2, %v1490_v34  ;;  %v1515_v48 = vrot.slane %v1509_v19, 1  ;;  %v1506_v47 = vadd.f32 %v1501_v63, %v1285_v6 }
 0x1ca   :  { %v1503_v1 = vsel %vm325_vm11, %v1500_v21, %v1502_v51  ;;  %v1518_v20 = vrot.slane %v1511_v50, 1 }
 0x1cb   :  { %v1516_v39 = vrot.slane %v1510_v31, 1  ;;  %v1507_v4 = vadd.f32 %v1503_v1, %v1286_v12 }
 0x1cd   :  { %v1517_v22 = vsel %vm325_vm11, %v1515_v48, %v1516_v39  ;;  %v1519_v60 = vsel %vm325_vm11, %v1516_v39, %v1518_v20 }
 0x1ce   :  { %v1522_v8 = vadd.f32 %v1517_v22, %v1506_v47  ;;  %v1523_v44 = vadd.f32 %v1519_v60, %v1507_v4 }
 0x1d0   :  { %v1524_v10 = vadd.f32 %v1522_v8, %v3431_v30  ;;  %v1525_v35 = vadd.f32 %v1523_v44, %v3432_v55 }
 0x1d2   :  { %v1526_v17 = vsel %vm1706_vm6, %v1524_v10, 0.0  ;;  %v1527_v59 = vsel %vm1706_vm6, %v1525_v35, 0.0 }
 0x1d3   :  { %1528 = vst [vmem:[%s3434_s27] sm:$0xff] %v1526_v17  ;;  %1529 = vst [vmem:[%s3434_s27 + $0x8] sm:$0xff] %v1527_v59 }
 0x1d4   :  { %1534 = vsyncpa [#allocation6], 1 }
 0x1d5   :  { %1535 = vsyncpa [#allocation8], 1 }

</bundles_post_ra>
